<compile_context>
chip_gen: v7x
topology: tpu7x:2x2x1
jax: 0.10.0
libtpu: 0.0.40
codegen_flags: <defaults>
</compile_context>

<pallas_src>
import jax
import jax.numpy as jnp
from jax.experimental import pallas as pl
from jax.experimental.pallas import tpu as pltpu

NUM_CLASSES = 7          # real classes; "no-object" class index == NUM_CLASSES
EOS_COEF = 0.1
COST_CLASS, COST_BBOX, COST_GIOU = 1.0, 5.0, 2.0
_BIG = 1.0e9
_EPS = 1.0e-7


def _criterion_kernel(logits_ref, pboxes_ref, tlabels_ref, tboxes_ref, out_ref):
    logits = logits_ref[...]     # [B, Q, C1]
    pb = pboxes_ref[...]         # [B, Q, 4]
    labels = tlabels_ref[...]    # [B, T] int32
    tboxes = tboxes_ref[...]     # [B, T, 4]

    B, Q, C1 = logits.shape
    T = labels.shape[1]

    # ---- softmax / log-sum-exp once (shared by matcher class cost and CE) ----
    m = jnp.max(logits, axis=-1, keepdims=True)              # [B, Q, 1]
    e = jnp.exp(logits - m)                                   # [B, Q, C1]
    se = jnp.sum(e, axis=-1, keepdims=True)                   # [B, Q, 1]
    prob = e / se                                             # exact division (parity)
    logit_max = jnp.max(logits, axis=-1)                      # [B, Q]  (lane-dense)
    lse2 = logit_max + jnp.log(jnp.sum(e, axis=-1))           # [B, Q]  log-sum-exp

    # ---- prediction boxes -> lane-dense [B, Q] component rows (in-kernel) ----
    comp = jax.lax.broadcasted_iota(jnp.int32, pb.shape, 2)
    pcx = jnp.sum(jnp.where(comp == 0, pb, 0.0), axis=-1)
    pcy = jnp.sum(jnp.where(comp == 1, pb, 0.0), axis=-1)
    pw = jnp.sum(jnp.where(comp == 2, pb, 0.0), axis=-1)
    ph = jnp.sum(jnp.where(comp == 3, pb, 0.0), axis=-1)
    px1 = pcx - 0.5 * pw
    py1 = pcy - 0.5 * ph
    px2 = pcx + 0.5 * pw
    py2 = pcy + 0.5 * ph
    area_p = (px2 - px1) * (py2 - py1)

    lane_q = jax.lax.broadcasted_iota(jnp.int32, (B, Q), 1)
    lane_qf = lane_q.astype(jnp.float32)
    lane_c = jax.lax.broadcasted_iota(jnp.int32, (B, C1), 1)

    # ---- hoisted pairwise pass (parallel, OFF the serial matcher chain) -------
    cost_rows, l1_rows, giou_rows, tgt_logit_rows = [], [], [], []
    for t in range(T):
        oh_t = (lane_c == labels[:, t:t + 1]).astype(jnp.float32)        # [B, C1]
        cls_t = -jnp.sum(prob * oh_t[:, None, :], axis=-1)               # [B, Q]
        tgt_logit_t = jnp.sum(logits * oh_t[:, None, :], axis=-1)        # [B, Q]

        tb_t = tboxes[:, t]                                              # [B, 4]
        tcx = tb_t[:, 0:1]
        tcy = tb_t[:, 1:2]
        tw = tb_t[:, 2:3]
        th = tb_t[:, 3:4]
        tx1 = tcx - 0.5 * tw
        ty1 = tcy - 0.5 * th
        tx2 = tcx + 0.5 * tw
        ty2 = tcy + 0.5 * th

        # pairwise L1 cost row (also reused as matched L1 loss)
        l1_t = (jnp.abs(pcx - tcx) + jnp.abs(pcy - tcy)
                + jnp.abs(pw - tw) + jnp.abs(ph - th))                   # [B, Q]

        # pairwise GIoU row (exact division for parity with the torch reference)
        area_t = (tx2 - tx1) * (ty2 - ty1)                               # [B, 1]
        iw = jnp.maximum(jnp.minimum(px2, tx2) - jnp.maximum(px1, tx1), 0.0)
        ih = jnp.maximum(jnp.minimum(py2, ty2) - jnp.maximum(py1, ty1), 0.0)
        inter = iw * ih
        union = area_p + area_t - inter
        iou = inter / (union + _EPS)
        ew_ = jnp.maximum(px2, tx2) - jnp.minimum(px1, tx1)
        eh_ = jnp.maximum(py2, ty2) - jnp.minimum(py1, ty1)
        enc = ew_ * eh_
        giou_t = iou - (enc - union) / (enc + _EPS)                      # [B, Q]

        cost_rows.append(COST_BBOX * l1_t + COST_CLASS * cls_t + COST_GIOU * (-giou_t))
        l1_rows.append(l1_t)
        giou_rows.append(giou_t)
        tgt_logit_rows.append(tgt_logit_t)

    # ---- serial greedy matcher: only argmin + penalty + vector accumulates ----
    penalty = jnp.zeros((B, Q), jnp.float32)
    matched = jnp.zeros((B, Q), jnp.float32)        # 1.0 at matched queries
    picked_match = jnp.zeros((B, Q), jnp.float32)   # logit at matched target class
    bbox_vec = jnp.zeros((B, Q), jnp.float32)
    giou_vec = jnp.zeros((B, Q), jnp.float32)
    correct_vec = jnp.zeros((B, Q), jnp.float32)
    for t in range(T):
        masked = cost_rows[t] + penalty
        # argmin over unused queries (first-index tie break)
        rowmin = jnp.min(masked, axis=-1, keepdims=True)                 # [B, 1]
        q_idxf = jnp.min(jnp.where(masked <= rowmin, lane_qf, float(Q)),
                         axis=-1, keepdims=True)                         # [B, 1]
        onehot_q = (lane_qf == q_idxf).astype(jnp.float32)               # [B, Q]
        penalty = penalty + onehot_q * _BIG
        matched = matched + onehot_q
        picked_match = picked_match + onehot_q * tgt_logit_rows[t]
        bbox_vec = bbox_vec + onehot_q * l1_rows[t]
        giou_vec = giou_vec + onehot_q * (1.0 - giou_rows[t])
        # class error: argmax(logits) == target class at the matched query
        correct_vec = correct_vec + onehot_q * (
            tgt_logit_rows[t] >= logit_max).astype(jnp.float32)

    bbox_sum = jnp.sum(bbox_vec)
    giou_sum = jnp.sum(giou_vec)
    correct = jnp.sum(correct_vec)

    # ---- weighted cross entropy over all queries (no [B,Q,C1] target tensor) --
    class_iota = jax.lax.broadcasted_iota(jnp.int32, (B, Q, C1), 2)
    is_noobj = class_iota == (C1 - 1)
    noobj_logit = jnp.sum(jnp.where(is_noobj, logits, 0.0), axis=-1)      # [B, Q]
    picked = picked_match + (1.0 - matched) * noobj_logit                 # [B, Q]
    w = matched + (1.0 - matched) * EOS_COEF                              # empty_weight
    ce_num = jnp.sum(w * (lse2 - picked))
    ce_den = jnp.sum(w)

    # ---- cardinality error: #(argmax != no-object) vs #targets ----------------
    fg_max = jnp.max(jnp.where(is_noobj, -_BIG, logits), axis=-1)         # [B, Q]
    card_pred = jnp.sum((fg_max >= noobj_logit).astype(jnp.float32),
                        axis=-1, keepdims=True)                           # [B, 1]
    card_sum = jnp.sum(jnp.abs(card_pred - float(T)))

    # ---- finalize the five losses in-kernel: one (1,128) vector divide --------
    num_boxes = float(max(B * T, 1))   # clamp(min=1), world_size == 1
    lane = jax.lax.broadcasted_iota(jnp.int32, out_ref.shape, 1)
    num = jnp.zeros(out_ref.shape, jnp.float32)
    den = jnp.ones(out_ref.shape, jnp.float32)
    pairs = (
        (ce_num, ce_den),                                    # 0: loss_ce
        (100.0 * (float(B * T) - correct), float(B * T)),    # 1: class_error
        (card_sum, float(B)),                                # 2: cardinality_error
        (bbox_sum, num_boxes),                               # 3: loss_bbox
        (giou_sum, num_boxes),                               # 4: loss_giou
    )
    for k, (n_k, d_k) in enumerate(pairs):
        num = jnp.where(lane == k, n_k, num)
        den = jnp.where(lane == k, d_k, den)
    out_ref[...] = num / den


# ---------------------------------------------------------------------------
# SetCriterion.forward equivalent
# ---------------------------------------------------------------------------
@jax.jit
def set_criterion_forward(pred_logits, pred_boxes, tgt_labels, tgt_boxes):
    out = pl.pallas_call(
        _criterion_kernel,
        out_shape=jax.ShapeDtypeStruct((1, 128), jnp.float32),
        in_specs=[pl.BlockSpec(memory_space=pltpu.MemorySpace.VMEM)] * 4,
        out_specs=pl.BlockSpec(memory_space=pltpu.MemorySpace.VMEM),
    )(pred_logits, pred_boxes, tgt_labels.astype(jnp.int32), tgt_boxes)

    # losses are already finalized in-kernel; just unpack the lane-dense row
    return {
        'loss_ce': out[0, 0],
        'class_error': out[0, 1],
        'cardinality_error': out[0, 2],
        'loss_bbox': out[0, 3],
        'loss_giou': out[0, 4],
    }


if __name__ == "__main__":
    B, Q, T = 2, 16, 4
    C1 = NUM_CLASSES + 1

    key = jax.random.PRNGKey(0)
    k1, k2, k3, k4, k5, k6 = jax.random.split(key, 6)
    pred_logits = jax.random.normal(k1, (B, Q, C1), jnp.float32)
    pred_boxes = jnp.concatenate(
        [jax.random.uniform(k2, (B, Q, 2), minval=0.2, maxval=0.8),
         jax.random.uniform(k3, (B, Q, 2), minval=0.05, maxval=0.3)], axis=-1)
    tgt_labels = jax.random.randint(k4, (B, T), 0, NUM_CLASSES, dtype=jnp.int32)
    tgt_boxes = jnp.concatenate(
        [jax.random.uniform(k5, (B, T, 2), minval=0.2, maxval=0.8),
         jax.random.uniform(k6, (B, T, 2), minval=0.05, maxval=0.3)], axis=-1)

    losses = set_criterion_forward(pred_logits, pred_boxes, tgt_labels, tgt_boxes)
    jax.block_until_ready(losses)
    print("KERNEL_OK")
</pallas_src>

<mosaic_0001>
module attributes {stable_mosaic.version = 11 : i64} {
  func.func @_criterion_kernel(%arg0: memref<2x16x8xf32, #tpu.memory_space<vmem>>, %arg1: memref<2x16x4xf32, #tpu.memory_space<vmem>>, %arg2: memref<2x4xi32, #tpu.memory_space<vmem>>, %arg3: memref<2x4x4xf32, #tpu.memory_space<vmem>>, %arg4: memref<1x128xf32, #tpu.memory_space<vmem>>) attributes {dimension_semantics = [], scalar_prefetch = 0 : i64, scratch_operands = 0 : i64, tpu.core_type = #tpu.core_type<tc>} {
    %c0 = arith.constant 0 : index
    %c0_0 = arith.constant 0 : index
    %c0_1 = arith.constant 0 : index
    %0 = vector.load %arg0[%c0, %c0_0, %c0_1] : memref<2x16x8xf32, #tpu.memory_space<vmem>>, vector<2x16x8xf32>
    %c0_2 = arith.constant 0 : index
    %c0_3 = arith.constant 0 : index
    %c0_4 = arith.constant 0 : index
    %1 = vector.load %arg1[%c0_2, %c0_3, %c0_4] : memref<2x16x4xf32, #tpu.memory_space<vmem>>, vector<2x16x4xf32>
    %c0_5 = arith.constant 0 : index
    %c0_6 = arith.constant 0 : index
    %2 = vector.load %arg2[%c0_5, %c0_6] : memref<2x4xi32, #tpu.memory_space<vmem>>, vector<2x4xi32>
    %c0_7 = arith.constant 0 : index
    %c0_8 = arith.constant 0 : index
    %c0_9 = arith.constant 0 : index
    %3 = vector.load %arg3[%c0_7, %c0_8, %c0_9] : memref<2x4x4xf32, #tpu.memory_space<vmem>>, vector<2x4x4xf32>
    %cst = arith.constant dense<0xFF800000> : vector<2x16xf32>
    %4 = vector.multi_reduction <maximumf>, %0, %cst [2] : vector<2x16x8xf32> to vector<2x16xf32>
    %5 = vector.shape_cast %4 : vector<2x16xf32> to vector<2x16x1xf32>
    %6 = vector.broadcast %5 : vector<2x16x1xf32> to vector<2x16x8xf32>
    %7 = arith.subf %0, %6 : vector<2x16x8xf32>
    %8 = math.exp %7 : vector<2x16x8xf32>
    %cst_10 = arith.constant dense<0.000000e+00> : vector<2x16xf32>
    %9 = vector.multi_reduction <add>, %8, %cst_10 [2] : vector<2x16x8xf32> to vector<2x16xf32>
    %10 = vector.shape_cast %9 : vector<2x16xf32> to vector<2x16x1xf32>
    %11 = vector.broadcast %10 : vector<2x16x1xf32> to vector<2x16x8xf32>
    %12 = arith.divf %8, %11 : vector<2x16x8xf32>
    %cst_11 = arith.constant dense<0xFF800000> : vector<2x16xf32>
    %13 = vector.multi_reduction <maximumf>, %0, %cst_11 [2] : vector<2x16x8xf32> to vector<2x16xf32>
    %cst_12 = arith.constant dense<0.000000e+00> : vector<2x16xf32>
    %14 = vector.multi_reduction <add>, %8, %cst_12 [2] : vector<2x16x8xf32> to vector<2x16xf32>
    %15 = math.log %14 : vector<2x16xf32>
    %16 = arith.addf %13, %15 : vector<2x16xf32>
    %17 = tpu.iota {dimensions = array<i32: 2>} : vector<2x16x4xi32>
    %c0_i32 = arith.constant 0 : i32
    %18 = vector.broadcast %c0_i32 : i32 to vector<2x16x4xi32>
    %19 = arith.cmpi eq, %17, %18 : vector<2x16x4xi32>
    %cst_13 = arith.constant 0.000000e+00 : f32
    %20 = vector.broadcast %cst_13 : f32 to vector<2x16x4xf32>
    %21 = arith.select %19, %1, %20 : vector<2x16x4xi1>, vector<2x16x4xf32>
    %cst_14 = arith.constant dense<0.000000e+00> : vector<2x16xf32>
    %22 = vector.multi_reduction <add>, %21, %cst_14 [2] : vector<2x16x4xf32> to vector<2x16xf32>
    %c1_i32 = arith.constant 1 : i32
    %23 = vector.broadcast %c1_i32 : i32 to vector<2x16x4xi32>
    %24 = arith.cmpi eq, %17, %23 : vector<2x16x4xi32>
    %cst_15 = arith.constant 0.000000e+00 : f32
    %25 = vector.broadcast %cst_15 : f32 to vector<2x16x4xf32>
    %26 = arith.select %24, %1, %25 : vector<2x16x4xi1>, vector<2x16x4xf32>
    %cst_16 = arith.constant dense<0.000000e+00> : vector<2x16xf32>
    %27 = vector.multi_reduction <add>, %26, %cst_16 [2] : vector<2x16x4xf32> to vector<2x16xf32>
    %c2_i32 = arith.constant 2 : i32
    %28 = vector.broadcast %c2_i32 : i32 to vector<2x16x4xi32>
    %29 = arith.cmpi eq, %17, %28 : vector<2x16x4xi32>
    %cst_17 = arith.constant 0.000000e+00 : f32
    %30 = vector.broadcast %cst_17 : f32 to vector<2x16x4xf32>
    %31 = arith.select %29, %1, %30 : vector<2x16x4xi1>, vector<2x16x4xf32>
    %cst_18 = arith.constant dense<0.000000e+00> : vector<2x16xf32>
    %32 = vector.multi_reduction <add>, %31, %cst_18 [2] : vector<2x16x4xf32> to vector<2x16xf32>
    %c3_i32 = arith.constant 3 : i32
    %33 = vector.broadcast %c3_i32 : i32 to vector<2x16x4xi32>
    %34 = arith.cmpi eq, %17, %33 : vector<2x16x4xi32>
    %cst_19 = arith.constant 0.000000e+00 : f32
    %35 = vector.broadcast %cst_19 : f32 to vector<2x16x4xf32>
    %36 = arith.select %34, %1, %35 : vector<2x16x4xi1>, vector<2x16x4xf32>
    %cst_20 = arith.constant dense<0.000000e+00> : vector<2x16xf32>
    %37 = vector.multi_reduction <add>, %36, %cst_20 [2] : vector<2x16x4xf32> to vector<2x16xf32>
    %cst_21 = arith.constant 5.000000e-01 : f32
    %38 = vector.broadcast %cst_21 : f32 to vector<2x16xf32>
    %39 = arith.mulf %38, %32 : vector<2x16xf32>
    %40 = arith.subf %22, %39 : vector<2x16xf32>
    %cst_22 = arith.constant 5.000000e-01 : f32
    %41 = vector.broadcast %cst_22 : f32 to vector<2x16xf32>
    %42 = arith.mulf %41, %37 : vector<2x16xf32>
    %43 = arith.subf %27, %42 : vector<2x16xf32>
    %cst_23 = arith.constant 5.000000e-01 : f32
    %44 = vector.broadcast %cst_23 : f32 to vector<2x16xf32>
    %45 = arith.mulf %44, %32 : vector<2x16xf32>
    %46 = arith.addf %22, %45 : vector<2x16xf32>
    %cst_24 = arith.constant 5.000000e-01 : f32
    %47 = vector.broadcast %cst_24 : f32 to vector<2x16xf32>
    %48 = arith.mulf %47, %37 : vector<2x16xf32>
    %49 = arith.addf %27, %48 : vector<2x16xf32>
    %50 = arith.subf %46, %40 : vector<2x16xf32>
    %51 = arith.subf %49, %43 : vector<2x16xf32>
    %52 = arith.mulf %50, %51 : vector<2x16xf32>
    %53 = tpu.iota {dimensions = array<i32: 1>} : vector<2x16xi32>
    %54 = arith.sitofp %53 : vector<2x16xi32> to vector<2x16xf32>
    %55 = tpu.iota {dimensions = array<i32: 1>} : vector<2x8xi32>
    %56 = vector.extract_strided_slice %2 {offsets = [0, 0], sizes = [2, 1], strides = [1, 1]} : vector<2x4xi32> to vector<2x1xi32>
    %57 = vector.broadcast %56 : vector<2x1xi32> to vector<2x8xi32>
    %58 = arith.cmpi eq, %55, %57 : vector<2x8xi32>
    %59 = arith.extui %58 : vector<2x8xi1> to vector<2x8xi32>
    %60 = arith.sitofp %59 : vector<2x8xi32> to vector<2x8xf32>
    %61 = vector.shape_cast %60 : vector<2x8xf32> to vector<2x1x8xf32>
    %62 = vector.broadcast %61 : vector<2x1x8xf32> to vector<2x16x8xf32>
    %63 = arith.mulf %12, %62 : vector<2x16x8xf32>
    %cst_25 = arith.constant dense<0.000000e+00> : vector<2x16xf32>
    %64 = vector.multi_reduction <add>, %63, %cst_25 [2] : vector<2x16x8xf32> to vector<2x16xf32>
    %cst_26 = arith.constant 0.000000e+00 : f32
    %65 = vector.broadcast %cst_26 : f32 to vector<2x16xf32>
    %66 = arith.subf %65, %64 : vector<2x16xf32>
    %67 = vector.shape_cast %60 : vector<2x8xf32> to vector<2x1x8xf32>
    %68 = vector.broadcast %67 : vector<2x1x8xf32> to vector<2x16x8xf32>
    %69 = arith.mulf %0, %68 : vector<2x16x8xf32>
    %cst_27 = arith.constant dense<0.000000e+00> : vector<2x16xf32>
    %70 = vector.multi_reduction <add>, %69, %cst_27 [2] : vector<2x16x8xf32> to vector<2x16xf32>
    %71 = vector.extract_strided_slice %3 {offsets = [0, 0, 0], sizes = [2, 1, 4], strides = [1, 1, 1]} : vector<2x4x4xf32> to vector<2x1x4xf32>
    %72 = vector.shape_cast %71 : vector<2x1x4xf32> to vector<2x4xf32>
    %73 = vector.extract_strided_slice %72 {offsets = [0, 0], sizes = [2, 1], strides = [1, 1]} : vector<2x4xf32> to vector<2x1xf32>
    %74 = vector.extract_strided_slice %72 {offsets = [0, 1], sizes = [2, 1], strides = [1, 1]} : vector<2x4xf32> to vector<2x1xf32>
    %75 = vector.extract_strided_slice %72 {offsets = [0, 2], sizes = [2, 1], strides = [1, 1]} : vector<2x4xf32> to vector<2x1xf32>
    %76 = vector.extract_strided_slice %72 {offsets = [0, 3], sizes = [2, 1], strides = [1, 1]} : vector<2x4xf32> to vector<2x1xf32>
    %cst_28 = arith.constant 5.000000e-01 : f32
    %77 = vector.broadcast %cst_28 : f32 to vector<2x1xf32>
    %78 = arith.mulf %77, %75 : vector<2x1xf32>
    %79 = arith.subf %73, %78 : vector<2x1xf32>
    %cst_29 = arith.constant 5.000000e-01 : f32
    %80 = vector.broadcast %cst_29 : f32 to vector<2x1xf32>
    %81 = arith.mulf %80, %76 : vector<2x1xf32>
    %82 = arith.subf %74, %81 : vector<2x1xf32>
    %cst_30 = arith.constant 5.000000e-01 : f32
    %83 = vector.broadcast %cst_30 : f32 to vector<2x1xf32>
    %84 = arith.mulf %83, %75 : vector<2x1xf32>
    %85 = arith.addf %73, %84 : vector<2x1xf32>
    %cst_31 = arith.constant 5.000000e-01 : f32
    %86 = vector.broadcast %cst_31 : f32 to vector<2x1xf32>
    %87 = arith.mulf %86, %76 : vector<2x1xf32>
    %88 = arith.addf %74, %87 : vector<2x1xf32>
    %89 = vector.broadcast %73 : vector<2x1xf32> to vector<2x16xf32>
    %90 = arith.subf %22, %89 : vector<2x16xf32>
    %91 = math.absf %90 : vector<2x16xf32>
    %92 = vector.broadcast %74 : vector<2x1xf32> to vector<2x16xf32>
    %93 = arith.subf %27, %92 : vector<2x16xf32>
    %94 = math.absf %93 : vector<2x16xf32>
    %95 = arith.addf %91, %94 : vector<2x16xf32>
    %96 = vector.broadcast %75 : vector<2x1xf32> to vector<2x16xf32>
    %97 = arith.subf %32, %96 : vector<2x16xf32>
    %98 = math.absf %97 : vector<2x16xf32>
    %99 = arith.addf %95, %98 : vector<2x16xf32>
    %100 = vector.broadcast %76 : vector<2x1xf32> to vector<2x16xf32>
    %101 = arith.subf %37, %100 : vector<2x16xf32>
    %102 = math.absf %101 : vector<2x16xf32>
    %103 = arith.addf %99, %102 : vector<2x16xf32>
    %104 = arith.subf %85, %79 : vector<2x1xf32>
    %105 = arith.subf %88, %82 : vector<2x1xf32>
    %106 = arith.mulf %104, %105 : vector<2x1xf32>
    %107 = vector.broadcast %85 : vector<2x1xf32> to vector<2x16xf32>
    %108 = arith.minimumf %46, %107 : vector<2x16xf32>
    %109 = vector.broadcast %79 : vector<2x1xf32> to vector<2x16xf32>
    %110 = arith.maximumf %40, %109 : vector<2x16xf32>
    %111 = arith.subf %108, %110 : vector<2x16xf32>
    %cst_32 = arith.constant 0.000000e+00 : f32
    %112 = vector.broadcast %cst_32 : f32 to vector<2x16xf32>
    %113 = arith.maximumf %111, %112 : vector<2x16xf32>
    %114 = vector.broadcast %88 : vector<2x1xf32> to vector<2x16xf32>
    %115 = arith.minimumf %49, %114 : vector<2x16xf32>
    %116 = vector.broadcast %82 : vector<2x1xf32> to vector<2x16xf32>
    %117 = arith.maximumf %43, %116 : vector<2x16xf32>
    %118 = arith.subf %115, %117 : vector<2x16xf32>
    %cst_33 = arith.constant 0.000000e+00 : f32
    %119 = vector.broadcast %cst_33 : f32 to vector<2x16xf32>
    %120 = arith.maximumf %118, %119 : vector<2x16xf32>
    %121 = arith.mulf %113, %120 : vector<2x16xf32>
    %122 = vector.broadcast %106 : vector<2x1xf32> to vector<2x16xf32>
    %123 = arith.addf %52, %122 : vector<2x16xf32>
    %124 = arith.subf %123, %121 : vector<2x16xf32>
    %cst_34 = arith.constant 1.000000e-07 : f32
    %125 = vector.broadcast %cst_34 : f32 to vector<2x16xf32>
    %126 = arith.addf %124, %125 : vector<2x16xf32>
    %127 = arith.divf %121, %126 : vector<2x16xf32>
    %128 = vector.broadcast %85 : vector<2x1xf32> to vector<2x16xf32>
    %129 = arith.maximumf %46, %128 : vector<2x16xf32>
    %130 = vector.broadcast %79 : vector<2x1xf32> to vector<2x16xf32>
    %131 = arith.minimumf %40, %130 : vector<2x16xf32>
    %132 = arith.subf %129, %131 : vector<2x16xf32>
    %133 = vector.broadcast %88 : vector<2x1xf32> to vector<2x16xf32>
    %134 = arith.maximumf %49, %133 : vector<2x16xf32>
    %135 = vector.broadcast %82 : vector<2x1xf32> to vector<2x16xf32>
    %136 = arith.minimumf %43, %135 : vector<2x16xf32>
    %137 = arith.subf %134, %136 : vector<2x16xf32>
    %138 = arith.mulf %132, %137 : vector<2x16xf32>
    %139 = arith.subf %138, %124 : vector<2x16xf32>
    %cst_35 = arith.constant 1.000000e-07 : f32
    %140 = vector.broadcast %cst_35 : f32 to vector<2x16xf32>
    %141 = arith.addf %138, %140 : vector<2x16xf32>
    %142 = arith.divf %139, %141 : vector<2x16xf32>
    %143 = arith.subf %127, %142 : vector<2x16xf32>
    %cst_36 = arith.constant 5.000000e+00 : f32
    %144 = vector.broadcast %cst_36 : f32 to vector<2x16xf32>
    %145 = arith.mulf %144, %103 : vector<2x16xf32>
    %cst_37 = arith.constant 1.000000e+00 : f32
    %146 = vector.broadcast %cst_37 : f32 to vector<2x16xf32>
    %147 = arith.mulf %146, %66 : vector<2x16xf32>
    %148 = arith.addf %145, %147 : vector<2x16xf32>
    %cst_38 = arith.constant 0.000000e+00 : f32
    %149 = vector.broadcast %cst_38 : f32 to vector<2x16xf32>
    %150 = arith.subf %149, %143 : vector<2x16xf32>
    %cst_39 = arith.constant 2.000000e+00 : f32
    %151 = vector.broadcast %cst_39 : f32 to vector<2x16xf32>
    %152 = arith.mulf %151, %150 : vector<2x16xf32>
    %153 = arith.addf %148, %152 : vector<2x16xf32>
    %154 = vector.extract_strided_slice %2 {offsets = [0, 1], sizes = [2, 1], strides = [1, 1]} : vector<2x4xi32> to vector<2x1xi32>
    %155 = vector.broadcast %154 : vector<2x1xi32> to vector<2x8xi32>
    %156 = arith.cmpi eq, %55, %155 : vector<2x8xi32>
    %157 = arith.extui %156 : vector<2x8xi1> to vector<2x8xi32>
    %158 = arith.sitofp %157 : vector<2x8xi32> to vector<2x8xf32>
    %159 = vector.shape_cast %158 : vector<2x8xf32> to vector<2x1x8xf32>
    %160 = vector.broadcast %159 : vector<2x1x8xf32> to vector<2x16x8xf32>
    %161 = arith.mulf %12, %160 : vector<2x16x8xf32>
    %cst_40 = arith.constant dense<0.000000e+00> : vector<2x16xf32>
    %162 = vector.multi_reduction <add>, %161, %cst_40 [2] : vector<2x16x8xf32> to vector<2x16xf32>
    %cst_41 = arith.constant 0.000000e+00 : f32
    %163 = vector.broadcast %cst_41 : f32 to vector<2x16xf32>
    %164 = arith.subf %163, %162 : vector<2x16xf32>
    %165 = vector.shape_cast %158 : vector<2x8xf32> to vector<2x1x8xf32>
    %166 = vector.broadcast %165 : vector<2x1x8xf32> to vector<2x16x8xf32>
    %167 = arith.mulf %0, %166 : vector<2x16x8xf32>
    %cst_42 = arith.constant dense<0.000000e+00> : vector<2x16xf32>
    %168 = vector.multi_reduction <add>, %167, %cst_42 [2] : vector<2x16x8xf32> to vector<2x16xf32>
    %169 = vector.extract_strided_slice %3 {offsets = [0, 1, 0], sizes = [2, 1, 4], strides = [1, 1, 1]} : vector<2x4x4xf32> to vector<2x1x4xf32>
    %170 = vector.shape_cast %169 : vector<2x1x4xf32> to vector<2x4xf32>
    %171 = vector.extract_strided_slice %170 {offsets = [0, 0], sizes = [2, 1], strides = [1, 1]} : vector<2x4xf32> to vector<2x1xf32>
    %172 = vector.extract_strided_slice %170 {offsets = [0, 1], sizes = [2, 1], strides = [1, 1]} : vector<2x4xf32> to vector<2x1xf32>
    %173 = vector.extract_strided_slice %170 {offsets = [0, 2], sizes = [2, 1], strides = [1, 1]} : vector<2x4xf32> to vector<2x1xf32>
    %174 = vector.extract_strided_slice %170 {offsets = [0, 3], sizes = [2, 1], strides = [1, 1]} : vector<2x4xf32> to vector<2x1xf32>
    %cst_43 = arith.constant 5.000000e-01 : f32
    %175 = vector.broadcast %cst_43 : f32 to vector<2x1xf32>
    %176 = arith.mulf %175, %173 : vector<2x1xf32>
    %177 = arith.subf %171, %176 : vector<2x1xf32>
    %cst_44 = arith.constant 5.000000e-01 : f32
    %178 = vector.broadcast %cst_44 : f32 to vector<2x1xf32>
    %179 = arith.mulf %178, %174 : vector<2x1xf32>
    %180 = arith.subf %172, %179 : vector<2x1xf32>
    %cst_45 = arith.constant 5.000000e-01 : f32
    %181 = vector.broadcast %cst_45 : f32 to vector<2x1xf32>
    %182 = arith.mulf %181, %173 : vector<2x1xf32>
    %183 = arith.addf %171, %182 : vector<2x1xf32>
    %cst_46 = arith.constant 5.000000e-01 : f32
    %184 = vector.broadcast %cst_46 : f32 to vector<2x1xf32>
    %185 = arith.mulf %184, %174 : vector<2x1xf32>
    %186 = arith.addf %172, %185 : vector<2x1xf32>
    %187 = vector.broadcast %171 : vector<2x1xf32> to vector<2x16xf32>
    %188 = arith.subf %22, %187 : vector<2x16xf32>
    %189 = math.absf %188 : vector<2x16xf32>
    %190 = vector.broadcast %172 : vector<2x1xf32> to vector<2x16xf32>
    %191 = arith.subf %27, %190 : vector<2x16xf32>
    %192 = math.absf %191 : vector<2x16xf32>
    %193 = arith.addf %189, %192 : vector<2x16xf32>
    %194 = vector.broadcast %173 : vector<2x1xf32> to vector<2x16xf32>
    %195 = arith.subf %32, %194 : vector<2x16xf32>
    %196 = math.absf %195 : vector<2x16xf32>
    %197 = arith.addf %193, %196 : vector<2x16xf32>
    %198 = vector.broadcast %174 : vector<2x1xf32> to vector<2x16xf32>
    %199 = arith.subf %37, %198 : vector<2x16xf32>
    %200 = math.absf %199 : vector<2x16xf32>
    %201 = arith.addf %197, %200 : vector<2x16xf32>
    %202 = arith.subf %183, %177 : vector<2x1xf32>
    %203 = arith.subf %186, %180 : vector<2x1xf32>
    %204 = arith.mulf %202, %203 : vector<2x1xf32>
    %205 = vector.broadcast %183 : vector<2x1xf32> to vector<2x16xf32>
    %206 = arith.minimumf %46, %205 : vector<2x16xf32>
    %207 = vector.broadcast %177 : vector<2x1xf32> to vector<2x16xf32>
    %208 = arith.maximumf %40, %207 : vector<2x16xf32>
    %209 = arith.subf %206, %208 : vector<2x16xf32>
    %cst_47 = arith.constant 0.000000e+00 : f32
    %210 = vector.broadcast %cst_47 : f32 to vector<2x16xf32>
    %211 = arith.maximumf %209, %210 : vector<2x16xf32>
    %212 = vector.broadcast %186 : vector<2x1xf32> to vector<2x16xf32>
    %213 = arith.minimumf %49, %212 : vector<2x16xf32>
    %214 = vector.broadcast %180 : vector<2x1xf32> to vector<2x16xf32>
    %215 = arith.maximumf %43, %214 : vector<2x16xf32>
    %216 = arith.subf %213, %215 : vector<2x16xf32>
    %cst_48 = arith.constant 0.000000e+00 : f32
    %217 = vector.broadcast %cst_48 : f32 to vector<2x16xf32>
    %218 = arith.maximumf %216, %217 : vector<2x16xf32>
    %219 = arith.mulf %211, %218 : vector<2x16xf32>
    %220 = vector.broadcast %204 : vector<2x1xf32> to vector<2x16xf32>
    %221 = arith.addf %52, %220 : vector<2x16xf32>
    %222 = arith.subf %221, %219 : vector<2x16xf32>
    %cst_49 = arith.constant 1.000000e-07 : f32
    %223 = vector.broadcast %cst_49 : f32 to vector<2x16xf32>
    %224 = arith.addf %222, %223 : vector<2x16xf32>
    %225 = arith.divf %219, %224 : vector<2x16xf32>
    %226 = vector.broadcast %183 : vector<2x1xf32> to vector<2x16xf32>
    %227 = arith.maximumf %46, %226 : vector<2x16xf32>
    %228 = vector.broadcast %177 : vector<2x1xf32> to vector<2x16xf32>
    %229 = arith.minimumf %40, %228 : vector<2x16xf32>
    %230 = arith.subf %227, %229 : vector<2x16xf32>
    %231 = vector.broadcast %186 : vector<2x1xf32> to vector<2x16xf32>
    %232 = arith.maximumf %49, %231 : vector<2x16xf32>
    %233 = vector.broadcast %180 : vector<2x1xf32> to vector<2x16xf32>
    %234 = arith.minimumf %43, %233 : vector<2x16xf32>
    %235 = arith.subf %232, %234 : vector<2x16xf32>
    %236 = arith.mulf %230, %235 : vector<2x16xf32>
    %237 = arith.subf %236, %222 : vector<2x16xf32>
    %cst_50 = arith.constant 1.000000e-07 : f32
    %238 = vector.broadcast %cst_50 : f32 to vector<2x16xf32>
    %239 = arith.addf %236, %238 : vector<2x16xf32>
    %240 = arith.divf %237, %239 : vector<2x16xf32>
    %241 = arith.subf %225, %240 : vector<2x16xf32>
    %cst_51 = arith.constant 5.000000e+00 : f32
    %242 = vector.broadcast %cst_51 : f32 to vector<2x16xf32>
    %243 = arith.mulf %242, %201 : vector<2x16xf32>
    %cst_52 = arith.constant 1.000000e+00 : f32
    %244 = vector.broadcast %cst_52 : f32 to vector<2x16xf32>
    %245 = arith.mulf %244, %164 : vector<2x16xf32>
    %246 = arith.addf %243, %245 : vector<2x16xf32>
    %cst_53 = arith.constant 0.000000e+00 : f32
    %247 = vector.broadcast %cst_53 : f32 to vector<2x16xf32>
    %248 = arith.subf %247, %241 : vector<2x16xf32>
    %cst_54 = arith.constant 2.000000e+00 : f32
    %249 = vector.broadcast %cst_54 : f32 to vector<2x16xf32>
    %250 = arith.mulf %249, %248 : vector<2x16xf32>
    %251 = arith.addf %246, %250 : vector<2x16xf32>
    %252 = vector.extract_strided_slice %2 {offsets = [0, 2], sizes = [2, 1], strides = [1, 1]} : vector<2x4xi32> to vector<2x1xi32>
    %253 = vector.broadcast %252 : vector<2x1xi32> to vector<2x8xi32>
    %254 = arith.cmpi eq, %55, %253 : vector<2x8xi32>
    %255 = arith.extui %254 : vector<2x8xi1> to vector<2x8xi32>
    %256 = arith.sitofp %255 : vector<2x8xi32> to vector<2x8xf32>
    %257 = vector.shape_cast %256 : vector<2x8xf32> to vector<2x1x8xf32>
    %258 = vector.broadcast %257 : vector<2x1x8xf32> to vector<2x16x8xf32>
    %259 = arith.mulf %12, %258 : vector<2x16x8xf32>
    %cst_55 = arith.constant dense<0.000000e+00> : vector<2x16xf32>
    %260 = vector.multi_reduction <add>, %259, %cst_55 [2] : vector<2x16x8xf32> to vector<2x16xf32>
    %cst_56 = arith.constant 0.000000e+00 : f32
    %261 = vector.broadcast %cst_56 : f32 to vector<2x16xf32>
    %262 = arith.subf %261, %260 : vector<2x16xf32>
    %263 = vector.shape_cast %256 : vector<2x8xf32> to vector<2x1x8xf32>
    %264 = vector.broadcast %263 : vector<2x1x8xf32> to vector<2x16x8xf32>
    %265 = arith.mulf %0, %264 : vector<2x16x8xf32>
    %cst_57 = arith.constant dense<0.000000e+00> : vector<2x16xf32>
    %266 = vector.multi_reduction <add>, %265, %cst_57 [2] : vector<2x16x8xf32> to vector<2x16xf32>
    %267 = vector.extract_strided_slice %3 {offsets = [0, 2, 0], sizes = [2, 1, 4], strides = [1, 1, 1]} : vector<2x4x4xf32> to vector<2x1x4xf32>
    %268 = vector.shape_cast %267 : vector<2x1x4xf32> to vector<2x4xf32>
    %269 = vector.extract_strided_slice %268 {offsets = [0, 0], sizes = [2, 1], strides = [1, 1]} : vector<2x4xf32> to vector<2x1xf32>
    %270 = vector.extract_strided_slice %268 {offsets = [0, 1], sizes = [2, 1], strides = [1, 1]} : vector<2x4xf32> to vector<2x1xf32>
    %271 = vector.extract_strided_slice %268 {offsets = [0, 2], sizes = [2, 1], strides = [1, 1]} : vector<2x4xf32> to vector<2x1xf32>
    %272 = vector.extract_strided_slice %268 {offsets = [0, 3], sizes = [2, 1], strides = [1, 1]} : vector<2x4xf32> to vector<2x1xf32>
    %cst_58 = arith.constant 5.000000e-01 : f32
    %273 = vector.broadcast %cst_58 : f32 to vector<2x1xf32>
    %274 = arith.mulf %273, %271 : vector<2x1xf32>
    %275 = arith.subf %269, %274 : vector<2x1xf32>
    %cst_59 = arith.constant 5.000000e-01 : f32
    %276 = vector.broadcast %cst_59 : f32 to vector<2x1xf32>
    %277 = arith.mulf %276, %272 : vector<2x1xf32>
    %278 = arith.subf %270, %277 : vector<2x1xf32>
    %cst_60 = arith.constant 5.000000e-01 : f32
    %279 = vector.broadcast %cst_60 : f32 to vector<2x1xf32>
    %280 = arith.mulf %279, %271 : vector<2x1xf32>
    %281 = arith.addf %269, %280 : vector<2x1xf32>
    %cst_61 = arith.constant 5.000000e-01 : f32
    %282 = vector.broadcast %cst_61 : f32 to vector<2x1xf32>
    %283 = arith.mulf %282, %272 : vector<2x1xf32>
    %284 = arith.addf %270, %283 : vector<2x1xf32>
    %285 = vector.broadcast %269 : vector<2x1xf32> to vector<2x16xf32>
    %286 = arith.subf %22, %285 : vector<2x16xf32>
    %287 = math.absf %286 : vector<2x16xf32>
    %288 = vector.broadcast %270 : vector<2x1xf32> to vector<2x16xf32>
    %289 = arith.subf %27, %288 : vector<2x16xf32>
    %290 = math.absf %289 : vector<2x16xf32>
    %291 = arith.addf %287, %290 : vector<2x16xf32>
    %292 = vector.broadcast %271 : vector<2x1xf32> to vector<2x16xf32>
    %293 = arith.subf %32, %292 : vector<2x16xf32>
    %294 = math.absf %293 : vector<2x16xf32>
    %295 = arith.addf %291, %294 : vector<2x16xf32>
    %296 = vector.broadcast %272 : vector<2x1xf32> to vector<2x16xf32>
    %297 = arith.subf %37, %296 : vector<2x16xf32>
    %298 = math.absf %297 : vector<2x16xf32>
    %299 = arith.addf %295, %298 : vector<2x16xf32>
    %300 = arith.subf %281, %275 : vector<2x1xf32>
    %301 = arith.subf %284, %278 : vector<2x1xf32>
    %302 = arith.mulf %300, %301 : vector<2x1xf32>
    %303 = vector.broadcast %281 : vector<2x1xf32> to vector<2x16xf32>
    %304 = arith.minimumf %46, %303 : vector<2x16xf32>
    %305 = vector.broadcast %275 : vector<2x1xf32> to vector<2x16xf32>
    %306 = arith.maximumf %40, %305 : vector<2x16xf32>
    %307 = arith.subf %304, %306 : vector<2x16xf32>
    %cst_62 = arith.constant 0.000000e+00 : f32
    %308 = vector.broadcast %cst_62 : f32 to vector<2x16xf32>
    %309 = arith.maximumf %307, %308 : vector<2x16xf32>
    %310 = vector.broadcast %284 : vector<2x1xf32> to vector<2x16xf32>
    %311 = arith.minimumf %49, %310 : vector<2x16xf32>
    %312 = vector.broadcast %278 : vector<2x1xf32> to vector<2x16xf32>
    %313 = arith.maximumf %43, %312 : vector<2x16xf32>
    %314 = arith.subf %311, %313 : vector<2x16xf32>
    %cst_63 = arith.constant 0.000000e+00 : f32
    %315 = vector.broadcast %cst_63 : f32 to vector<2x16xf32>
    %316 = arith.maximumf %314, %315 : vector<2x16xf32>
    %317 = arith.mulf %309, %316 : vector<2x16xf32>
    %318 = vector.broadcast %302 : vector<2x1xf32> to vector<2x16xf32>
    %319 = arith.addf %52, %318 : vector<2x16xf32>
    %320 = arith.subf %319, %317 : vector<2x16xf32>
    %cst_64 = arith.constant 1.000000e-07 : f32
    %321 = vector.broadcast %cst_64 : f32 to vector<2x16xf32>
    %322 = arith.addf %320, %321 : vector<2x16xf32>
    %323 = arith.divf %317, %322 : vector<2x16xf32>
    %324 = vector.broadcast %281 : vector<2x1xf32> to vector<2x16xf32>
    %325 = arith.maximumf %46, %324 : vector<2x16xf32>
    %326 = vector.broadcast %275 : vector<2x1xf32> to vector<2x16xf32>
    %327 = arith.minimumf %40, %326 : vector<2x16xf32>
    %328 = arith.subf %325, %327 : vector<2x16xf32>
    %329 = vector.broadcast %284 : vector<2x1xf32> to vector<2x16xf32>
    %330 = arith.maximumf %49, %329 : vector<2x16xf32>
    %331 = vector.broadcast %278 : vector<2x1xf32> to vector<2x16xf32>
    %332 = arith.minimumf %43, %331 : vector<2x16xf32>
    %333 = arith.subf %330, %332 : vector<2x16xf32>
    %334 = arith.mulf %328, %333 : vector<2x16xf32>
    %335 = arith.subf %334, %320 : vector<2x16xf32>
    %cst_65 = arith.constant 1.000000e-07 : f32
    %336 = vector.broadcast %cst_65 : f32 to vector<2x16xf32>
    %337 = arith.addf %334, %336 : vector<2x16xf32>
    %338 = arith.divf %335, %337 : vector<2x16xf32>
    %339 = arith.subf %323, %338 : vector<2x16xf32>
    %cst_66 = arith.constant 5.000000e+00 : f32
    %340 = vector.broadcast %cst_66 : f32 to vector<2x16xf32>
    %341 = arith.mulf %340, %299 : vector<2x16xf32>
    %cst_67 = arith.constant 1.000000e+00 : f32
    %342 = vector.broadcast %cst_67 : f32 to vector<2x16xf32>
    %343 = arith.mulf %342, %262 : vector<2x16xf32>
    %344 = arith.addf %341, %343 : vector<2x16xf32>
    %cst_68 = arith.constant 0.000000e+00 : f32
    %345 = vector.broadcast %cst_68 : f32 to vector<2x16xf32>
    %346 = arith.subf %345, %339 : vector<2x16xf32>
    %cst_69 = arith.constant 2.000000e+00 : f32
    %347 = vector.broadcast %cst_69 : f32 to vector<2x16xf32>
    %348 = arith.mulf %347, %346 : vector<2x16xf32>
    %349 = arith.addf %344, %348 : vector<2x16xf32>
    %350 = vector.extract_strided_slice %2 {offsets = [0, 3], sizes = [2, 1], strides = [1, 1]} : vector<2x4xi32> to vector<2x1xi32>
    %351 = vector.broadcast %350 : vector<2x1xi32> to vector<2x8xi32>
    %352 = arith.cmpi eq, %55, %351 : vector<2x8xi32>
    %353 = arith.extui %352 : vector<2x8xi1> to vector<2x8xi32>
    %354 = arith.sitofp %353 : vector<2x8xi32> to vector<2x8xf32>
    %355 = vector.shape_cast %354 : vector<2x8xf32> to vector<2x1x8xf32>
    %356 = vector.broadcast %355 : vector<2x1x8xf32> to vector<2x16x8xf32>
    %357 = arith.mulf %12, %356 : vector<2x16x8xf32>
    %cst_70 = arith.constant dense<0.000000e+00> : vector<2x16xf32>
    %358 = vector.multi_reduction <add>, %357, %cst_70 [2] : vector<2x16x8xf32> to vector<2x16xf32>
    %cst_71 = arith.constant 0.000000e+00 : f32
    %359 = vector.broadcast %cst_71 : f32 to vector<2x16xf32>
    %360 = arith.subf %359, %358 : vector<2x16xf32>
    %361 = vector.shape_cast %354 : vector<2x8xf32> to vector<2x1x8xf32>
    %362 = vector.broadcast %361 : vector<2x1x8xf32> to vector<2x16x8xf32>
    %363 = arith.mulf %0, %362 : vector<2x16x8xf32>
    %cst_72 = arith.constant dense<0.000000e+00> : vector<2x16xf32>
    %364 = vector.multi_reduction <add>, %363, %cst_72 [2] : vector<2x16x8xf32> to vector<2x16xf32>
    %365 = vector.extract_strided_slice %3 {offsets = [0, 3, 0], sizes = [2, 1, 4], strides = [1, 1, 1]} : vector<2x4x4xf32> to vector<2x1x4xf32>
    %366 = vector.shape_cast %365 : vector<2x1x4xf32> to vector<2x4xf32>
    %367 = vector.extract_strided_slice %366 {offsets = [0, 0], sizes = [2, 1], strides = [1, 1]} : vector<2x4xf32> to vector<2x1xf32>
    %368 = vector.extract_strided_slice %366 {offsets = [0, 1], sizes = [2, 1], strides = [1, 1]} : vector<2x4xf32> to vector<2x1xf32>
    %369 = vector.extract_strided_slice %366 {offsets = [0, 2], sizes = [2, 1], strides = [1, 1]} : vector<2x4xf32> to vector<2x1xf32>
    %370 = vector.extract_strided_slice %366 {offsets = [0, 3], sizes = [2, 1], strides = [1, 1]} : vector<2x4xf32> to vector<2x1xf32>
    %cst_73 = arith.constant 5.000000e-01 : f32
    %371 = vector.broadcast %cst_73 : f32 to vector<2x1xf32>
    %372 = arith.mulf %371, %369 : vector<2x1xf32>
    %373 = arith.subf %367, %372 : vector<2x1xf32>
    %cst_74 = arith.constant 5.000000e-01 : f32
    %374 = vector.broadcast %cst_74 : f32 to vector<2x1xf32>
    %375 = arith.mulf %374, %370 : vector<2x1xf32>
    %376 = arith.subf %368, %375 : vector<2x1xf32>
    %cst_75 = arith.constant 5.000000e-01 : f32
    %377 = vector.broadcast %cst_75 : f32 to vector<2x1xf32>
    %378 = arith.mulf %377, %369 : vector<2x1xf32>
    %379 = arith.addf %367, %378 : vector<2x1xf32>
    %cst_76 = arith.constant 5.000000e-01 : f32
    %380 = vector.broadcast %cst_76 : f32 to vector<2x1xf32>
    %381 = arith.mulf %380, %370 : vector<2x1xf32>
    %382 = arith.addf %368, %381 : vector<2x1xf32>
    %383 = vector.broadcast %367 : vector<2x1xf32> to vector<2x16xf32>
    %384 = arith.subf %22, %383 : vector<2x16xf32>
    %385 = math.absf %384 : vector<2x16xf32>
    %386 = vector.broadcast %368 : vector<2x1xf32> to vector<2x16xf32>
    %387 = arith.subf %27, %386 : vector<2x16xf32>
    %388 = math.absf %387 : vector<2x16xf32>
    %389 = arith.addf %385, %388 : vector<2x16xf32>
    %390 = vector.broadcast %369 : vector<2x1xf32> to vector<2x16xf32>
    %391 = arith.subf %32, %390 : vector<2x16xf32>
    %392 = math.absf %391 : vector<2x16xf32>
    %393 = arith.addf %389, %392 : vector<2x16xf32>
    %394 = vector.broadcast %370 : vector<2x1xf32> to vector<2x16xf32>
    %395 = arith.subf %37, %394 : vector<2x16xf32>
    %396 = math.absf %395 : vector<2x16xf32>
    %397 = arith.addf %393, %396 : vector<2x16xf32>
    %398 = arith.subf %379, %373 : vector<2x1xf32>
    %399 = arith.subf %382, %376 : vector<2x1xf32>
    %400 = arith.mulf %398, %399 : vector<2x1xf32>
    %401 = vector.broadcast %379 : vector<2x1xf32> to vector<2x16xf32>
    %402 = arith.minimumf %46, %401 : vector<2x16xf32>
    %403 = vector.broadcast %373 : vector<2x1xf32> to vector<2x16xf32>
    %404 = arith.maximumf %40, %403 : vector<2x16xf32>
    %405 = arith.subf %402, %404 : vector<2x16xf32>
    %cst_77 = arith.constant 0.000000e+00 : f32
    %406 = vector.broadcast %cst_77 : f32 to vector<2x16xf32>
    %407 = arith.maximumf %405, %406 : vector<2x16xf32>
    %408 = vector.broadcast %382 : vector<2x1xf32> to vector<2x16xf32>
    %409 = arith.minimumf %49, %408 : vector<2x16xf32>
    %410 = vector.broadcast %376 : vector<2x1xf32> to vector<2x16xf32>
    %411 = arith.maximumf %43, %410 : vector<2x16xf32>
    %412 = arith.subf %409, %411 : vector<2x16xf32>
    %cst_78 = arith.constant 0.000000e+00 : f32
    %413 = vector.broadcast %cst_78 : f32 to vector<2x16xf32>
    %414 = arith.maximumf %412, %413 : vector<2x16xf32>
    %415 = arith.mulf %407, %414 : vector<2x16xf32>
    %416 = vector.broadcast %400 : vector<2x1xf32> to vector<2x16xf32>
    %417 = arith.addf %52, %416 : vector<2x16xf32>
    %418 = arith.subf %417, %415 : vector<2x16xf32>
    %cst_79 = arith.constant 1.000000e-07 : f32
    %419 = vector.broadcast %cst_79 : f32 to vector<2x16xf32>
    %420 = arith.addf %418, %419 : vector<2x16xf32>
    %421 = arith.divf %415, %420 : vector<2x16xf32>
    %422 = vector.broadcast %379 : vector<2x1xf32> to vector<2x16xf32>
    %423 = arith.maximumf %46, %422 : vector<2x16xf32>
    %424 = vector.broadcast %373 : vector<2x1xf32> to vector<2x16xf32>
    %425 = arith.minimumf %40, %424 : vector<2x16xf32>
    %426 = arith.subf %423, %425 : vector<2x16xf32>
    %427 = vector.broadcast %382 : vector<2x1xf32> to vector<2x16xf32>
    %428 = arith.maximumf %49, %427 : vector<2x16xf32>
    %429 = vector.broadcast %376 : vector<2x1xf32> to vector<2x16xf32>
    %430 = arith.minimumf %43, %429 : vector<2x16xf32>
    %431 = arith.subf %428, %430 : vector<2x16xf32>
    %432 = arith.mulf %426, %431 : vector<2x16xf32>
    %433 = arith.subf %432, %418 : vector<2x16xf32>
    %cst_80 = arith.constant 1.000000e-07 : f32
    %434 = vector.broadcast %cst_80 : f32 to vector<2x16xf32>
    %435 = arith.addf %432, %434 : vector<2x16xf32>
    %436 = arith.divf %433, %435 : vector<2x16xf32>
    %437 = arith.subf %421, %436 : vector<2x16xf32>
    %cst_81 = arith.constant 5.000000e+00 : f32
    %438 = vector.broadcast %cst_81 : f32 to vector<2x16xf32>
    %439 = arith.mulf %438, %397 : vector<2x16xf32>
    %cst_82 = arith.constant 1.000000e+00 : f32
    %440 = vector.broadcast %cst_82 : f32 to vector<2x16xf32>
    %441 = arith.mulf %440, %360 : vector<2x16xf32>
    %442 = arith.addf %439, %441 : vector<2x16xf32>
    %cst_83 = arith.constant 0.000000e+00 : f32
    %443 = vector.broadcast %cst_83 : f32 to vector<2x16xf32>
    %444 = arith.subf %443, %437 : vector<2x16xf32>
    %cst_84 = arith.constant 2.000000e+00 : f32
    %445 = vector.broadcast %cst_84 : f32 to vector<2x16xf32>
    %446 = arith.mulf %445, %444 : vector<2x16xf32>
    %447 = arith.addf %442, %446 : vector<2x16xf32>
    %cst_85 = arith.constant 0.000000e+00 : f32
    %448 = vector.broadcast %cst_85 : f32 to vector<2x16xf32>
    %cst_86 = arith.constant 0.000000e+00 : f32
    %449 = vector.broadcast %cst_86 : f32 to vector<2x16xf32>
    %cst_87 = arith.constant 0.000000e+00 : f32
    %450 = vector.broadcast %cst_87 : f32 to vector<2x16xf32>
    %cst_88 = arith.constant 0.000000e+00 : f32
    %451 = vector.broadcast %cst_88 : f32 to vector<2x16xf32>
    %cst_89 = arith.constant 0.000000e+00 : f32
    %452 = vector.broadcast %cst_89 : f32 to vector<2x16xf32>
    %cst_90 = arith.constant 0.000000e+00 : f32
    %453 = vector.broadcast %cst_90 : f32 to vector<2x16xf32>
    %454 = arith.addf %153, %448 : vector<2x16xf32>
    %cst_91 = arith.constant dense<0x7F800000> : vector<2xf32>
    %455 = vector.multi_reduction <minimumf>, %454, %cst_91 [1] : vector<2x16xf32> to vector<2xf32>
    %456 = vector.shape_cast %455 : vector<2xf32> to vector<2x1xf32>
    %457 = vector.broadcast %456 : vector<2x1xf32> to vector<2x16xf32>
    %458 = arith.cmpf ole, %454, %457 : vector<2x16xf32>
    %cst_92 = arith.constant 1.600000e+01 : f32
    %459 = vector.broadcast %cst_92 : f32 to vector<2x16xf32>
    %460 = arith.select %458, %54, %459 : vector<2x16xi1>, vector<2x16xf32>
    %cst_93 = arith.constant dense<0x7F800000> : vector<2xf32>
    %461 = vector.multi_reduction <minimumf>, %460, %cst_93 [1] : vector<2x16xf32> to vector<2xf32>
    %462 = vector.shape_cast %461 : vector<2xf32> to vector<2x1xf32>
    %463 = vector.broadcast %462 : vector<2x1xf32> to vector<2x16xf32>
    %464 = arith.cmpf oeq, %54, %463 : vector<2x16xf32>
    %465 = arith.extui %464 : vector<2x16xi1> to vector<2x16xi32>
    %466 = arith.sitofp %465 : vector<2x16xi32> to vector<2x16xf32>
    %cst_94 = arith.constant 1.000000e+09 : f32
    %467 = vector.broadcast %cst_94 : f32 to vector<2x16xf32>
    %468 = arith.mulf %466, %467 : vector<2x16xf32>
    %469 = arith.addf %448, %468 : vector<2x16xf32>
    %470 = arith.addf %449, %466 : vector<2x16xf32>
    %471 = arith.mulf %466, %70 : vector<2x16xf32>
    %472 = arith.addf %450, %471 : vector<2x16xf32>
    %473 = arith.mulf %466, %103 : vector<2x16xf32>
    %474 = arith.addf %451, %473 : vector<2x16xf32>
    %cst_95 = arith.constant 1.000000e+00 : f32
    %475 = vector.broadcast %cst_95 : f32 to vector<2x16xf32>
    %476 = arith.subf %475, %143 : vector<2x16xf32>
    %477 = arith.mulf %466, %476 : vector<2x16xf32>
    %478 = arith.addf %452, %477 : vector<2x16xf32>
    %479 = arith.cmpf oge, %70, %13 : vector<2x16xf32>
    %480 = arith.extui %479 : vector<2x16xi1> to vector<2x16xi32>
    %481 = arith.sitofp %480 : vector<2x16xi32> to vector<2x16xf32>
    %482 = arith.mulf %466, %481 : vector<2x16xf32>
    %483 = arith.addf %453, %482 : vector<2x16xf32>
    %484 = arith.addf %251, %469 : vector<2x16xf32>
    %cst_96 = arith.constant dense<0x7F800000> : vector<2xf32>
    %485 = vector.multi_reduction <minimumf>, %484, %cst_96 [1] : vector<2x16xf32> to vector<2xf32>
    %486 = vector.shape_cast %485 : vector<2xf32> to vector<2x1xf32>
    %487 = vector.broadcast %486 : vector<2x1xf32> to vector<2x16xf32>
    %488 = arith.cmpf ole, %484, %487 : vector<2x16xf32>
    %cst_97 = arith.constant 1.600000e+01 : f32
    %489 = vector.broadcast %cst_97 : f32 to vector<2x16xf32>
    %490 = arith.select %488, %54, %489 : vector<2x16xi1>, vector<2x16xf32>
    %cst_98 = arith.constant dense<0x7F800000> : vector<2xf32>
    %491 = vector.multi_reduction <minimumf>, %490, %cst_98 [1] : vector<2x16xf32> to vector<2xf32>
    %492 = vector.shape_cast %491 : vector<2xf32> to vector<2x1xf32>
    %493 = vector.broadcast %492 : vector<2x1xf32> to vector<2x16xf32>
    %494 = arith.cmpf oeq, %54, %493 : vector<2x16xf32>
    %495 = arith.extui %494 : vector<2x16xi1> to vector<2x16xi32>
    %496 = arith.sitofp %495 : vector<2x16xi32> to vector<2x16xf32>
    %cst_99 = arith.constant 1.000000e+09 : f32
    %497 = vector.broadcast %cst_99 : f32 to vector<2x16xf32>
    %498 = arith.mulf %496, %497 : vector<2x16xf32>
    %499 = arith.addf %469, %498 : vector<2x16xf32>
    %500 = arith.addf %470, %496 : vector<2x16xf32>
    %501 = arith.mulf %496, %168 : vector<2x16xf32>
    %502 = arith.addf %472, %501 : vector<2x16xf32>
    %503 = arith.mulf %496, %201 : vector<2x16xf32>
    %504 = arith.addf %474, %503 : vector<2x16xf32>
    %cst_100 = arith.constant 1.000000e+00 : f32
    %505 = vector.broadcast %cst_100 : f32 to vector<2x16xf32>
    %506 = arith.subf %505, %241 : vector<2x16xf32>
    %507 = arith.mulf %496, %506 : vector<2x16xf32>
    %508 = arith.addf %478, %507 : vector<2x16xf32>
    %509 = arith.cmpf oge, %168, %13 : vector<2x16xf32>
    %510 = arith.extui %509 : vector<2x16xi1> to vector<2x16xi32>
    %511 = arith.sitofp %510 : vector<2x16xi32> to vector<2x16xf32>
    %512 = arith.mulf %496, %511 : vector<2x16xf32>
    %513 = arith.addf %483, %512 : vector<2x16xf32>
    %514 = arith.addf %349, %499 : vector<2x16xf32>
    %cst_101 = arith.constant dense<0x7F800000> : vector<2xf32>
    %515 = vector.multi_reduction <minimumf>, %514, %cst_101 [1] : vector<2x16xf32> to vector<2xf32>
    %516 = vector.shape_cast %515 : vector<2xf32> to vector<2x1xf32>
    %517 = vector.broadcast %516 : vector<2x1xf32> to vector<2x16xf32>
    %518 = arith.cmpf ole, %514, %517 : vector<2x16xf32>
    %cst_102 = arith.constant 1.600000e+01 : f32
    %519 = vector.broadcast %cst_102 : f32 to vector<2x16xf32>
    %520 = arith.select %518, %54, %519 : vector<2x16xi1>, vector<2x16xf32>
    %cst_103 = arith.constant dense<0x7F800000> : vector<2xf32>
    %521 = vector.multi_reduction <minimumf>, %520, %cst_103 [1] : vector<2x16xf32> to vector<2xf32>
    %522 = vector.shape_cast %521 : vector<2xf32> to vector<2x1xf32>
    %523 = vector.broadcast %522 : vector<2x1xf32> to vector<2x16xf32>
    %524 = arith.cmpf oeq, %54, %523 : vector<2x16xf32>
    %525 = arith.extui %524 : vector<2x16xi1> to vector<2x16xi32>
    %526 = arith.sitofp %525 : vector<2x16xi32> to vector<2x16xf32>
    %cst_104 = arith.constant 1.000000e+09 : f32
    %527 = vector.broadcast %cst_104 : f32 to vector<2x16xf32>
    %528 = arith.mulf %526, %527 : vector<2x16xf32>
    %529 = arith.addf %499, %528 : vector<2x16xf32>
    %530 = arith.addf %500, %526 : vector<2x16xf32>
    %531 = arith.mulf %526, %266 : vector<2x16xf32>
    %532 = arith.addf %502, %531 : vector<2x16xf32>
    %533 = arith.mulf %526, %299 : vector<2x16xf32>
    %534 = arith.addf %504, %533 : vector<2x16xf32>
    %cst_105 = arith.constant 1.000000e+00 : f32
    %535 = vector.broadcast %cst_105 : f32 to vector<2x16xf32>
    %536 = arith.subf %535, %339 : vector<2x16xf32>
    %537 = arith.mulf %526, %536 : vector<2x16xf32>
    %538 = arith.addf %508, %537 : vector<2x16xf32>
    %539 = arith.cmpf oge, %266, %13 : vector<2x16xf32>
    %540 = arith.extui %539 : vector<2x16xi1> to vector<2x16xi32>
    %541 = arith.sitofp %540 : vector<2x16xi32> to vector<2x16xf32>
    %542 = arith.mulf %526, %541 : vector<2x16xf32>
    %543 = arith.addf %513, %542 : vector<2x16xf32>
    %544 = arith.addf %447, %529 : vector<2x16xf32>
    %cst_106 = arith.constant dense<0x7F800000> : vector<2xf32>
    %545 = vector.multi_reduction <minimumf>, %544, %cst_106 [1] : vector<2x16xf32> to vector<2xf32>
    %546 = vector.shape_cast %545 : vector<2xf32> to vector<2x1xf32>
    %547 = vector.broadcast %546 : vector<2x1xf32> to vector<2x16xf32>
    %548 = arith.cmpf ole, %544, %547 : vector<2x16xf32>
    %cst_107 = arith.constant 1.600000e+01 : f32
    %549 = vector.broadcast %cst_107 : f32 to vector<2x16xf32>
    %550 = arith.select %548, %54, %549 : vector<2x16xi1>, vector<2x16xf32>
    %cst_108 = arith.constant dense<0x7F800000> : vector<2xf32>
    %551 = vector.multi_reduction <minimumf>, %550, %cst_108 [1] : vector<2x16xf32> to vector<2xf32>
    %552 = vector.shape_cast %551 : vector<2xf32> to vector<2x1xf32>
    %553 = vector.broadcast %552 : vector<2x1xf32> to vector<2x16xf32>
    %554 = arith.cmpf oeq, %54, %553 : vector<2x16xf32>
    %555 = arith.extui %554 : vector<2x16xi1> to vector<2x16xi32>
    %556 = arith.sitofp %555 : vector<2x16xi32> to vector<2x16xf32>
    %557 = arith.addf %530, %556 : vector<2x16xf32>
    %558 = arith.mulf %556, %364 : vector<2x16xf32>
    %559 = arith.addf %532, %558 : vector<2x16xf32>
    %560 = arith.mulf %556, %397 : vector<2x16xf32>
    %561 = arith.addf %534, %560 : vector<2x16xf32>
    %cst_109 = arith.constant 1.000000e+00 : f32
    %562 = vector.broadcast %cst_109 : f32 to vector<2x16xf32>
    %563 = arith.subf %562, %437 : vector<2x16xf32>
    %564 = arith.mulf %556, %563 : vector<2x16xf32>
    %565 = arith.addf %538, %564 : vector<2x16xf32>
    %566 = arith.cmpf oge, %364, %13 : vector<2x16xf32>
    %567 = arith.extui %566 : vector<2x16xi1> to vector<2x16xi32>
    %568 = arith.sitofp %567 : vector<2x16xi32> to vector<2x16xf32>
    %569 = arith.mulf %556, %568 : vector<2x16xf32>
    %570 = arith.addf %543, %569 : vector<2x16xf32>
    %571 = vector.shape_cast %561 : vector<2x16xf32> to vector<1x2x16xf32>
    %cst_110 = arith.constant dense<0.000000e+00> : vector<1xf32>
    %572 = vector.multi_reduction <add>, %571, %cst_110 [1, 2] : vector<1x2x16xf32> to vector<1xf32>
    %573 = vector.shape_cast %572 : vector<1xf32> to vector<1x1x1xf32>
    %574 = vector.extract %573[0, 0, 0] : f32 from vector<1x1x1xf32>
    %575 = vector.shape_cast %565 : vector<2x16xf32> to vector<1x2x16xf32>
    %cst_111 = arith.constant dense<0.000000e+00> : vector<1xf32>
    %576 = vector.multi_reduction <add>, %575, %cst_111 [1, 2] : vector<1x2x16xf32> to vector<1xf32>
    %577 = vector.shape_cast %576 : vector<1xf32> to vector<1x1x1xf32>
    %578 = vector.extract %577[0, 0, 0] : f32 from vector<1x1x1xf32>
    %579 = vector.shape_cast %570 : vector<2x16xf32> to vector<1x2x16xf32>
    %cst_112 = arith.constant dense<0.000000e+00> : vector<1xf32>
    %580 = vector.multi_reduction <add>, %579, %cst_112 [1, 2] : vector<1x2x16xf32> to vector<1xf32>
    %581 = vector.shape_cast %580 : vector<1xf32> to vector<1x1x1xf32>
    %582 = vector.extract %581[0, 0, 0] : f32 from vector<1x1x1xf32>
    %583 = tpu.iota {dimensions = array<i32: 2>} : vector<2x16x8xi32>
    %c7_i32 = arith.constant 7 : i32
    %584 = vector.broadcast %c7_i32 : i32 to vector<2x16x8xi32>
    %585 = arith.cmpi eq, %583, %584 : vector<2x16x8xi32>
    %cst_113 = arith.constant 0.000000e+00 : f32
    %586 = vector.broadcast %cst_113 : f32 to vector<2x16x8xf32>
    %587 = arith.select %585, %0, %586 : vector<2x16x8xi1>, vector<2x16x8xf32>
    %cst_114 = arith.constant dense<0.000000e+00> : vector<2x16xf32>
    %588 = vector.multi_reduction <add>, %587, %cst_114 [2] : vector<2x16x8xf32> to vector<2x16xf32>
    %cst_115 = arith.constant 1.000000e+00 : f32
    %589 = vector.broadcast %cst_115 : f32 to vector<2x16xf32>
    %590 = arith.subf %589, %557 : vector<2x16xf32>
    %591 = arith.mulf %590, %588 : vector<2x16xf32>
    %592 = arith.addf %559, %591 : vector<2x16xf32>
    %cst_116 = arith.constant 1.000000e+00 : f32
    %593 = vector.broadcast %cst_116 : f32 to vector<2x16xf32>
    %594 = arith.subf %593, %557 : vector<2x16xf32>
    %cst_117 = arith.constant 1.000000e-01 : f32
    %595 = vector.broadcast %cst_117 : f32 to vector<2x16xf32>
    %596 = arith.mulf %594, %595 : vector<2x16xf32>
    %597 = arith.addf %557, %596 : vector<2x16xf32>
    %598 = arith.subf %16, %592 : vector<2x16xf32>
    %599 = arith.mulf %597, %598 : vector<2x16xf32>
    %600 = vector.shape_cast %599 : vector<2x16xf32> to vector<1x2x16xf32>
    %cst_118 = arith.constant dense<0.000000e+00> : vector<1xf32>
    %601 = vector.multi_reduction <add>, %600, %cst_118 [1, 2] : vector<1x2x16xf32> to vector<1xf32>
    %602 = vector.shape_cast %601 : vector<1xf32> to vector<1x1x1xf32>
    %603 = vector.extract %602[0, 0, 0] : f32 from vector<1x1x1xf32>
    %604 = vector.shape_cast %597 : vector<2x16xf32> to vector<1x2x16xf32>
    %cst_119 = arith.constant dense<0.000000e+00> : vector<1xf32>
    %605 = vector.multi_reduction <add>, %604, %cst_119 [1, 2] : vector<1x2x16xf32> to vector<1xf32>
    %606 = vector.shape_cast %605 : vector<1xf32> to vector<1x1x1xf32>
    %607 = vector.extract %606[0, 0, 0] : f32 from vector<1x1x1xf32>
    %cst_120 = arith.constant -1.000000e+09 : f32
    %608 = vector.broadcast %cst_120 : f32 to vector<2x16x8xf32>
    %609 = arith.select %585, %608, %0 : vector<2x16x8xi1>, vector<2x16x8xf32>
    %cst_121 = arith.constant dense<0xFF800000> : vector<2x16xf32>
    %610 = vector.multi_reduction <maximumf>, %609, %cst_121 [2] : vector<2x16x8xf32> to vector<2x16xf32>
    %611 = arith.cmpf oge, %610, %588 : vector<2x16xf32>
    %612 = arith.extui %611 : vector<2x16xi1> to vector<2x16xi32>
    %613 = arith.sitofp %612 : vector<2x16xi32> to vector<2x16xf32>
    %cst_122 = arith.constant dense<0.000000e+00> : vector<2xf32>
    %614 = vector.multi_reduction <add>, %613, %cst_122 [1] : vector<2x16xf32> to vector<2xf32>
    %615 = vector.shape_cast %614 : vector<2xf32> to vector<2x1xf32>
    %cst_123 = arith.constant 4.000000e+00 : f32
    %616 = vector.broadcast %cst_123 : f32 to vector<2x1xf32>
    %617 = arith.subf %615, %616 : vector<2x1xf32>
    %618 = math.absf %617 : vector<2x1xf32>
    %619 = vector.shape_cast %618 : vector<2x1xf32> to vector<1x2x1xf32>
    %cst_124 = arith.constant dense<0.000000e+00> : vector<1xf32>
    %620 = vector.multi_reduction <add>, %619, %cst_124 [1, 2] : vector<1x2x1xf32> to vector<1xf32>
    %621 = vector.shape_cast %620 : vector<1xf32> to vector<1x1x1xf32>
    %622 = vector.extract %621[0, 0, 0] : f32 from vector<1x1x1xf32>
    %623 = tpu.iota {dimensions = array<i32: 1>} : vector<1x128xi32>
    %cst_125 = arith.constant 0.000000e+00 : f32
    %624 = vector.broadcast %cst_125 : f32 to vector<1x128xf32>
    %cst_126 = arith.constant 1.000000e+00 : f32
    %625 = vector.broadcast %cst_126 : f32 to vector<1x128xf32>
    %cst_127 = arith.constant 8.000000e+00 : f32
    %626 = arith.subf %cst_127, %582 : f32
    %cst_128 = arith.constant 1.000000e+02 : f32
    %627 = arith.mulf %cst_128, %626 : f32
    %c0_i32_129 = arith.constant 0 : i32
    %628 = vector.broadcast %c0_i32_129 : i32 to vector<1x128xi32>
    %629 = arith.cmpi eq, %623, %628 : vector<1x128xi32>
    %630 = vector.broadcast %603 : f32 to vector<1x128xf32>
    %631 = arith.select %629, %630, %624 : vector<1x128xi1>, vector<1x128xf32>
    %c0_i32_130 = arith.constant 0 : i32
    %632 = vector.broadcast %c0_i32_130 : i32 to vector<1x128xi32>
    %633 = arith.cmpi eq, %623, %632 : vector<1x128xi32>
    %634 = vector.broadcast %607 : f32 to vector<1x128xf32>
    %635 = arith.select %633, %634, %625 : vector<1x128xi1>, vector<1x128xf32>
    %c1_i32_131 = arith.constant 1 : i32
    %636 = vector.broadcast %c1_i32_131 : i32 to vector<1x128xi32>
    %637 = arith.cmpi eq, %623, %636 : vector<1x128xi32>
    %638 = vector.broadcast %627 : f32 to vector<1x128xf32>
    %639 = arith.select %637, %638, %631 : vector<1x128xi1>, vector<1x128xf32>
    %c1_i32_132 = arith.constant 1 : i32
    %640 = vector.broadcast %c1_i32_132 : i32 to vector<1x128xi32>
    %641 = arith.cmpi eq, %623, %640 : vector<1x128xi32>
    %cst_133 = arith.constant 8.000000e+00 : f32
    %642 = vector.broadcast %cst_133 : f32 to vector<1x128xf32>
    %643 = arith.select %641, %642, %635 : vector<1x128xi1>, vector<1x128xf32>
    %c2_i32_134 = arith.constant 2 : i32
    %644 = vector.broadcast %c2_i32_134 : i32 to vector<1x128xi32>
    %645 = arith.cmpi eq, %623, %644 : vector<1x128xi32>
    %646 = vector.broadcast %622 : f32 to vector<1x128xf32>
    %647 = arith.select %645, %646, %639 : vector<1x128xi1>, vector<1x128xf32>
    %c2_i32_135 = arith.constant 2 : i32
    %648 = vector.broadcast %c2_i32_135 : i32 to vector<1x128xi32>
    %649 = arith.cmpi eq, %623, %648 : vector<1x128xi32>
    %cst_136 = arith.constant 2.000000e+00 : f32
    %650 = vector.broadcast %cst_136 : f32 to vector<1x128xf32>
    %651 = arith.select %649, %650, %643 : vector<1x128xi1>, vector<1x128xf32>
    %c3_i32_137 = arith.constant 3 : i32
    %652 = vector.broadcast %c3_i32_137 : i32 to vector<1x128xi32>
    %653 = arith.cmpi eq, %623, %652 : vector<1x128xi32>
    %654 = vector.broadcast %574 : f32 to vector<1x128xf32>
    %655 = arith.select %653, %654, %647 : vector<1x128xi1>, vector<1x128xf32>
    %c3_i32_138 = arith.constant 3 : i32
    %656 = vector.broadcast %c3_i32_138 : i32 to vector<1x128xi32>
    %657 = arith.cmpi eq, %623, %656 : vector<1x128xi32>
    %cst_139 = arith.constant 8.000000e+00 : f32
    %658 = vector.broadcast %cst_139 : f32 to vector<1x128xf32>
    %659 = arith.select %657, %658, %651 : vector<1x128xi1>, vector<1x128xf32>
    %c4_i32 = arith.constant 4 : i32
    %660 = vector.broadcast %c4_i32 : i32 to vector<1x128xi32>
    %661 = arith.cmpi eq, %623, %660 : vector<1x128xi32>
    %662 = vector.broadcast %578 : f32 to vector<1x128xf32>
    %663 = arith.select %661, %662, %655 : vector<1x128xi1>, vector<1x128xf32>
    %c4_i32_140 = arith.constant 4 : i32
    %664 = vector.broadcast %c4_i32_140 : i32 to vector<1x128xi32>
    %665 = arith.cmpi eq, %623, %664 : vector<1x128xi32>
    %cst_141 = arith.constant 8.000000e+00 : f32
    %666 = vector.broadcast %cst_141 : f32 to vector<1x128xf32>
    %667 = arith.select %665, %666, %659 : vector<1x128xi1>, vector<1x128xf32>
    %668 = arith.divf %663, %667 : vector<1x128xf32>
    %c0_142 = arith.constant 0 : index
    %c0_143 = arith.constant 0 : index
    %669 = vector.load %arg4[%c0_142, %c0_143] : memref<1x128xf32, #tpu.memory_space<vmem>>, vector<1x128xf32>
    tpu.vector_store %arg4[%c0_142, %c0_143], %668 {strides = array<i32>} : memref<1x128xf32, #tpu.memory_space<vmem>>, vector<1x128xf32>,
    return
  }
}

</mosaic_0001>

<bundles_post_ra>
// kernel: set_criterion_forward.1
= control target key start
LH: loop header
LB: loop body
LE: loop exit
PB: predicated region body
PF: predicated region fallthrough
CT: control target
= control target key end

     0   :  { %vm28_vm0 = vcmask 64512   ;;  %v5024_v3 = vmov 0   ;;  %s3130_s27 = smov 126   ;;  %v85_v14 = vlaneseq  ;;  %v5026_v15 = vmov 1   ;;  %s5015_s0 = inlined_call_operand.vmem [shape: f32[2,16,8], index: 0, kind: input, shape index: {}]   ;;  %s5016_s3 = inlined_call_operand.vmem [shape: f32[2,4,4], index: 3, kind: input, shape index: {}]   ;;  %s5017_s2 = inlined_call_operand.vmem [shape: s32[2,4], index: 2, kind: input, shape index: {}]   ;;  %s5018_s1 = inlined_call_operand.vmem [shape: f32[2,16,4], index: 1, kind: input, shape index: {}]   ;;  %s5019_s4 = inlined_call_operand.vmem [shape: f32[1,128], index: 4, kind: output, shape index: {}]  }
   0x1   :  { %v3165_v0 = vld [vmem:[%s5015_s0] sm:$0xff]  ;;  %v3170_v1 = vld [vmem:[%s5015_s0 + $0x10] sm:$0xff]  ;;  %v3175_v2 = vld [vmem:[%s5015_s0 + $0x8] sm:$0xff]  ;;  %3017 = vset.pattern.permute.xlu0 %v5024_v3  ;;  %3018 = vset.pattern.permute.xlu1 %v5024_v3  ;;  %vm92_vm2 = vcmask 31744   ;;  %vm1642_vm7 = vcmask 130112   ;;  %vm1653_vm8 = vcmask 1041409  }
   0x2   :  { %v29_v4 = vsel %vm28_vm0, %v3165_v0, -inf  ;;  %v35_v5 = vsel %vm28_vm0, %v3170_v1, -inf  ;;  %v3186_v6 = vld [vmem:[%s5015_s0 + $0x18] sm:$0xff]  ;;  %v32_v7 = vsel %vm28_vm0, %v3175_v2, -inf  ;;  %v3195_v9 = vld [vmem:[%s5016_s3 + $0x4] sm:$0xf] }
   0x3   :  { %30 = vmax.xlane.f32.xlu0 %v29_v4  ;;  %36 = vmax.xlane.f32.xlu1 %v35_v5  ;;  %v38_v8 = vsel %vm28_vm0, %v3186_v6, -inf  ;;  %v269_v10 = vmul.f32 0.5, %v3195_v9  ;;  %v3201_v11 = vld [vmem:[%s5016_s3] sm:$0xf]  ;;  %v3212_v16 = vand.u32 127, %v85_v14  ;;  %v23_v19 = vld [vmem:[%s5018_s1 + $0x10] sm:$0xff] }
   0x4   :  { %v268_v12 = vmul.f32 0.5, %v3201_v11  ;;  %v3207_v13 = vld [vmem:[%s5017_s2] sm:$0x3]  ;;  %v22_v21 = vld [vmem:[%s5018_s1 + $0x8] sm:$0xff]  ;;  %v24_v24 = vld [vmem:[%s5018_s1 + $0x18] sm:$0xff]  ;;  %vm1656_vm9 = vcmask 123904  }
   0x5   :  { %5222 = vst [vmem:[#allocation2_spill] sm:$0xff] %v3207_v13  ;;  %5223 = vst [vmem:[#allocation3_spill] sm:$0xff] %v3212_v16  ;;  %v21_v17 = vld [vmem:[%s5018_s1] sm:$0xff]  ;;  %vm122_vm1 = vcmp.eq.s32.totalorder %v3212_v16, 2  ;;  %vm139_vm3 = vcmp.eq.s32.totalorder %v3212_v16, 3  ;;  %vm87_vm4 = vcmp.eq.s32.totalorder %v3212_v16, 0 }
   0x6   :  { %v123_v18 = vsel %vm122_vm1, %v21_v17, 0.0  ;;  %v125_v22 = vsel %vm122_vm1, %v23_v19, 0.0  ;;  %v124_v23 = vsel %vm122_vm1, %v22_v21, 0.0  ;;  %v126_v27 = vsel %vm122_vm1, %v24_v24, 0.0  ;;  %s3132_s1 = smov 127  }
   0x7   :  { %33 = vmax.xlane.f32.xlu0 %v32_v7  ;;  %39 = vmax.xlane.f32.xlu1 %v38_v8  ;;  %v127_v20 = vsel %vm92_vm2, %v123_v18, 0.0  ;;  %v133_v25 = vsel %vm92_vm2, %v125_v22, 0.0  ;;  %v130_v26 = vsel %vm92_vm2, %v124_v23, 0.0  ;;  %v143_v28 = vsel %vm139_vm3, %v24_v24, 0.0 }
   0x8   :  { %v136_v29 = vsel %vm92_vm2, %v126_v27, 0.0  ;;  %v153_v30 = vsel %vm92_vm2, %v143_v28, 0.0  ;;  %v140_v31 = vsel %vm139_vm3, %v21_v17, 0.0  ;;  %v89_v32 = vsel %vm87_vm4, %v22_v21, 0.0 }
   0x9   :  { %v144_v33 = vsel %vm92_vm2, %v140_v31, 0.0  ;;  %v96_v34 = vsel %vm92_vm2, %v89_v32, 0.0  ;;  %v141_v35 = vsel %vm139_vm3, %v22_v21, 0.0  ;;  %v91_v36 = vsel %vm87_vm4, %v24_v24, 0.0 }
   0xa   :  { %v147_v37 = vsel %vm92_vm2, %v141_v35, 0.0  ;;  %vm105_vm5 = vcmp.eq.s32.totalorder %v3212_v16, 1  ;;  %v102_v38 = vsel %vm92_vm2, %v91_v36, 0.0  ;;  %v142_v39 = vsel %vm139_vm3, %v23_v19, 0.0 }
   0xb   :  { %v107_v40 = vsel %vm105_vm5, %v22_v21, 0.0  ;;  %v150_v41 = vsel %vm92_vm2, %v142_v39, 0.0  ;;  %v88_v43 = vsel %vm87_vm4, %v21_v17, 0.0  ;;  %v109_v44 = vsel %vm105_vm5, %v24_v24, 0.0 }
   0xc   :  { %v113_v42 = vsel %vm92_vm2, %v107_v40, 0.0  ;;  %v93_v45 = vsel %vm92_vm2, %v88_v43, 0.0  ;;  %v119_v46 = vsel %vm92_vm2, %v109_v44, 0.0  ;;  %v90_v47 = vsel %vm87_vm4, %v23_v19, 0.0 }
   0xd   :  { %v99_v48 = vsel %vm92_vm2, %v90_v47, 0.0  ;;  %v106_v49 = vsel %vm105_vm5, %v21_v17, 0.0  ;;  %v108_v51 = vsel %vm105_vm5, %v23_v19, 0.0  ;;  %v3135_v44 = vmov 1966171168  }
   0xe   :  { %v110_v50 = vsel %vm92_vm2, %v106_v49, 0.0  ;;  %v116_v52 = vsel %vm92_vm2, %v108_v51, 0.0  ;;  %v3363_v47 = vshrl.u32 %v85_v14, 7  ;;  %v5022_v51 = vmov 0.0  }
  0x10   :  { %5244 = vst [vmem:[#allocation24_spill] sm:$0xff] %v3363_v47 }
  0x18   :  { %274 = vrot.lane.b32.xlu1 %v269_v10, %s3130_s27 }
  0x1d   :  { %272 = vrot.lane.b32.xlu0 %v268_v12, %s3130_s27 }
  0x21   :  { %194 = vperm.xlu0 %3017, %v3207_v13  }
  0x25   :  { %3019 = vset.pattern.permute.xlu0 %v5026_v15 }
  0x3c   :  { %128 = vadd.xlane.f32.xlu1 %v127_v20 }
  0x40   :  { %134 = vadd.xlane.f32.xlu1 %v133_v25  ;;  %131 = vadd.xlane.f32.xlu0 %v130_v26 }
  0x44   :  { %137 = vadd.xlane.f32.xlu1 %v136_v29  ;;  %154 = vadd.xlane.f32.xlu0 %v153_v30 }
  0x48   :  { %145 = vadd.xlane.f32.xlu1 %v144_v33  ;;  %97 = vadd.xlane.f32.xlu0 %v96_v34  ;;  %v5020_v33 = vmov 3  }
  0x4c   :  { %148 = vadd.xlane.f32.xlu1 %v147_v37  ;;  %103 = vadd.xlane.f32.xlu0 %v102_v38 }
  0x50   :  { %151 = vadd.xlane.f32.xlu1 %v150_v41  ;;  %114 = vadd.xlane.f32.xlu0 %v113_v42 }
  0x54   :  { %94 = vadd.xlane.f32.xlu1 %v93_v45  ;;  %120 = vadd.xlane.f32.xlu0 %v119_v46  ;;  %v201_v45 = vunpack.c.l.s4 %v3135_v44 }
  0x58   :  { %100 = vadd.xlane.f32.xlu1 %v99_v48  ;;  %v202_v48 = vunpack.c.0.s8 %v201_v45 }
  0x5c   :  { %111 = vadd.xlane.f32.xlu1 %v110_v50  ;;  %v3369_v50 = vsub.s32 %v202_v48, %v3363_v47 }
  0x5e   :  { %5246 = vst [vmem:[#allocation26_spill] sm:$0xff] %v3369_v50 }
  0x60   :  { %117 = vadd.xlane.f32.xlu1 %v116_v52 }
  0x90   :  { %v3278_v53 = vpop.xlane.xlu0 %30  ;;  %v3280_v54 = vpop.xlane.xlu1 %36 }
  0x91   :  { %5224 = vst [vmem:[#allocation4_spill] sm:$0xff] %v3278_v53  ;;  %5225 = vst [vmem:[#allocation5_spill] sm:$0xff] %v3280_v54  ;;  %v43_v57 = vsub.f32 %v3170_v1, %v3280_v54  ;;  %v41_v18 = vsub.f32 %v3165_v0, %v3278_v53 }
  0x93   :  { %v49_v62 = vmul.f32 1.442695, %v43_v57  ;;  %v45_v19 = vmul.f32 1.442695, %v41_v18 }
  0x94   :  { %v3282_v55 = vpop.xlane.xlu0 %33  ;;  %v3284_v56 = vpop.xlane.xlu1 %39 }
  0x95   :  { %5226 = vst [vmem:[#allocation6_spill] sm:$0xff] %v3282_v55  ;;  %5227 = vst [vmem:[#allocation7_spill] sm:$0xff] %v3284_v56  ;;  %v42_v58 = vsub.f32 %v3175_v2, %v3282_v55  ;;  %v44_v20 = vsub.f32 %v3186_v6, %v3284_v56  ;;  %v5021_v6 = vmov 2  }
  0x97   :  { %v47_v59 = vmul.f32 1.442695, %v42_v58  ;;  %v51_v21 = vmul.f32 1.442695, %v44_v20  ;;  %v3375_v58 = vsub.s32 0, %v3363_v47 }
  0x98   :  { %v273_v60 = vpop.permute.xlu0 %272  ;;  %v275_v61 = vpop.permute.xlu1 %274 }
  0x99   :  { %v278_v63 = vsub.f32 %v3201_v11, %v273_v60  ;;  %v280_v4 = vadd.f32 %v273_v60, %v3201_v11  ;;  %v279_v5 = vsub.f32 %v3195_v9, %v275_v61  ;;  %v281_v7 = vadd.f32 %v275_v61, %v3195_v9  ;;  %5247 = vst [vmem:[#allocation27_spill] sm:$0xff] %v3375_v58 }
  0x9a   :  { %3034 = vpow2.f32 %v47_v59 }
  0x9b   :  { %v392_v8 = vsub.f32 %v280_v4, %v278_v63  ;;  %3036 = vpow2.f32 %v49_v62  ;;  %v393_v1 = vsub.f32 %v281_v7, %v279_v5 }
  0x9c   :  { %3038 = vpow2.f32 %v45_v19 }
  0x9d   :  { %396 = vrot.lane.b32.xlu1 %v392_v8, %s3132_s1  ;;  %3040 = vpow2.f32 %v51_v21 }
  0xa0   :  { %v195_v35 = vpop.permute.xlu0 %194 }
  0xa1   :  { %398 = vrot.lane.b32.xlu1 %v393_v1, %s3132_s1  ;;  %vm196_vm6 = vcmp.eq.s32.totalorder %v3212_v16, %v195_v35 }
  0xa2   :  { %v2968_v52 = vsel %vm196_vm6, 1.0, %v5022_v51 }
  0xa3   :  { %v206_v57 = vrot.slane %v2968_v52, %v3369_v50 }
  0xa4   :  { %v3294_v2 = vpop.eup %3034 }
  0xa5   :  { %v56_v10 = vsel %vm28_vm0, %v3294_v2, 0.0  ;;  %v3298_v12 = vpop.eup %3036  ;;  %v214_v14 = vrot.slane %v206_v57, %v3369_v50 }
  0xa6   :  { %57 = vadd.xlane.f32.xlu0 %v56_v10  ;;  %v59_v17 = vsel %vm28_vm0, %v3298_v12, 0.0  ;;  %v3306_v22 = vpop.eup %3038 }
  0xa7   :  { %v53_v23 = vsel %vm28_vm0, %v3306_v22, 0.0  ;;  %v3310_v24 = vpop.eup %3040  ;;  %v3382_v61 = vrot.slane %v214_v14, %v3375_v58 }
  0xa8   :  { %v62_v0 = vsel %vm28_vm0, %v3310_v24, 0.0 }
  0xa9   :  { %5249 = vst [vmem:[#allocation29_spill] sm:$0xff] %v3382_v61 }
  0xaa   :  { %60 = vadd.xlane.f32.xlu0 %v59_v17 }
  0xc0   :  { %457 = vperm.xlu0 %3019, %v280_v4  }
  0xc4   :  { %480 = vperm.xlu0 %3019, %v279_v5  }
  0xc5   :  { %54 = vadd.xlane.f32.xlu1 %v53_v23 }
  0xc8   :  { %309 = vperm.xlu0 %3019, %v3201_v11  }
  0xc9   :  { %63 = vadd.xlane.f32.xlu1 %v62_v0  ;;  %v3318_v25 = vpop.xlane.xlu1 %128 }
  0xca   :  { %5228 = vst [vmem:[#allocation8_spill] sm:$0xff] %v3318_v25 }
  0xcc   :  { %3024 = vset.pattern.permute.xlu0 %v5021_v6 }
  0xcd   :  { %340 = vperm.xlu0 %3024, %v3195_v9   ;;  %v3320_v26 = vpop.xlane.xlu1 %134  ;;  %v3350_v39 = vpop.xlane.xlu0 %131 }
  0xce   :  { %5229 = vst [vmem:[#allocation9_spill] sm:$0xff] %v3320_v26  ;;  %5238 = vst [vmem:[#allocation18_spill] sm:$0xff] %v3350_v39 }
  0xd1   :  { %3025 = vset.pattern.permute.xlu0 %v5024_v3  ;;  %v3322_v27 = vpop.xlane.xlu1 %137  ;;  %v3352_v42 = vpop.xlane.xlu0 %154 }
  0xd2   :  { %410 = vperm.xlu0 %3025, %v281_v7   ;;  %5230 = vst [vmem:[#allocation10_spill] sm:$0xff] %v3322_v27  ;;  %5239 = vst [vmem:[#allocation19_spill] sm:$0xff] %v3352_v42 }
  0xd5   :  { %v3325_v28 = vpop.xlane.xlu1 %145 }
  0xd6   :  { %5231 = vst [vmem:[#allocation11_spill] sm:$0xff] %v3325_v28 }
  0xd9   :  { %v3327_v29 = vpop.xlane.xlu1 %148 }
  0xda   :  { %406 = vperm.xlu1 %3018, %v280_v4   ;;  %5232 = vst [vmem:[#allocation12_spill] sm:$0xff] %v3327_v29 }
  0xdd   :  { %v3331_v30 = vpop.xlane.xlu1 %151 }
  0xde   :  { %428 = vperm.xlu1 %3018, %v278_v63   ;;  %5233 = vst [vmem:[#allocation13_spill] sm:$0xff] %v3331_v30 }
  0xe1   :  { %v3335_v31 = vpop.xlane.xlu1 %94 }
  0xe2   :  { %432 = vperm.xlu1 %3018, %v279_v5   ;;  %5234 = vst [vmem:[#allocation14_spill] sm:$0xff] %v3335_v31 }
  0xe5   :  { %v3340_v32 = vpop.xlane.xlu1 %100 }
  0xe6   :  { %3020 = vset.pattern.permute.xlu1 %v5026_v15  ;;  %5235 = vst [vmem:[#allocation15_spill] sm:$0xff] %v3340_v32 }
  0xe7   :  { %460 = vperm.xlu1 %3020, %v281_v7  }
  0xe9   :  { %v3344_v34 = vpop.xlane.xlu1 %111 }
  0xea   :  { %5236 = vst [vmem:[#allocation16_spill] sm:$0xff] %v3344_v34 }
  0xeb   :  { %477 = vperm.xlu1 %3020, %v278_v63  }
  0xed   :  { %v3347_v36 = vpop.xlane.xlu1 %117 }
  0xee   :  { %5237 = vst [vmem:[#allocation17_spill] sm:$0xff] %v3347_v36 }
  0xef   :  { %3021 = vset.pattern.permute.xlu1 %v5024_v3 }
  0xf0   :  { %284 = vperm.xlu1 %3021, %v3201_v11  }
  0xf4   :  { %288 = vperm.xlu1 %3021, %v3195_v9  }
  0xf8   :  { %3022 = vset.pattern.permute.xlu1 %v5026_v15 }
  0xf9   :  { %312 = vperm.xlu1 %3022, %v3195_v9  }
  0xfd   :  { %3023 = vset.pattern.permute.xlu1 %v5021_v6 }
  0xfe   :  { %337 = vperm.xlu1 %3023, %v3201_v11  }
 0x102   :  { %3026 = vset.pattern.permute.xlu1 %v5020_v33 }
 0x103   :  { %365 = vperm.xlu1 %3026, %v3201_v11   ;;  %v3354_v11 = vpop.xlane.xlu0 %97 }
 0x104   :  { %5240 = vst [vmem:[#allocation20_spill] sm:$0xff] %v3354_v11 }
 0x107   :  { %368 = vperm.xlu1 %3026, %v3195_v9   ;;  %v3356_v43 = vpop.xlane.xlu0 %103 }
 0x108   :  { %5241 = vst [vmem:[#allocation21_spill] sm:$0xff] %v3356_v43 }
 0x10b   :  { %3027 = vset.pattern.permute.xlu1 %v5024_v3  ;;  %v3358_v9 = vpop.xlane.xlu0 %114 }
 0x10c   :  { %5242 = vst [vmem:[#allocation22_spill] sm:$0xff] %v3358_v9 }
 0x10f   :  { %v397_v37 = vpop.permute.xlu1 %396  ;;  %v3360_v46 = vpop.xlane.xlu0 %120 }
 0x110   :  { %v402_v38 = vmul.f32 %v397_v37, %v392_v8  ;;  %5243 = vst [vmem:[#allocation23_spill] sm:$0xff] %v3360_v46  ;;  %v207_v8 = vcombine.high %v206_v57, %v206_v57 }
 0x112   :  { %510 = vperm.xlu1 %3027, %v402_v38   ;;  %v221_v10 = vrot.slane %v207_v8, %v3369_v50 }
 0x113   :  { %v399_v40 = vpop.permute.xlu1 %398 }
 0x114   :  { %v403_v41 = vmul.f32 %v399_v40, %v393_v1  ;;  %v3404_v20 = vrot.slane %v221_v10, %v3375_v58 }
 0x116   :  { %514 = vperm.xlu0 %3025, %v403_v41   ;;  %5255 = vst [vmem:[#allocation35_spill] sm:$0xff] %v3404_v20 }
 0x133   :  { %v3366_v49 = vpop.xlane.xlu0 %57 }
 0x134   :  { %5245 = vst [vmem:[#allocation25_spill] sm:$0xff] %v3366_v49  ;;  %3042 = vrcp.f32 %v3366_v49 }
 0x137   :  { %v3389_v5 = vpop.xlane.xlu0 %60 }
 0x138   :  { %5251 = vst [vmem:[#allocation31_spill] sm:$0xff] %v3389_v5 }
 0x13e   :  { %v3043_v59 = vpop.eup %3042 }
 0x13f   :  { %v3379_v60 = vmul.f32 %v3043_v59, %v3294_v2  ;;  %v165_v59 = vmul.f32 0.5, %v3327_v29 }
 0x141   :  { %5248 = vst [vmem:[#allocation28_spill] sm:$0xff] %v3379_v60  ;;  %v233_v62 = vmul.f32 %v3382_v61, %v3379_v60 }
 0x143   :  { %v239_v63 = vsel %vm28_vm0, %v233_v62, 0.0  ;;  %v157_v62 = vmul.f32 0.5, %v3350_v39 }
 0x144   :  { %240 = vadd.xlane.f32.xlu1 %v239_v63  ;;  %v3440_v63 = vpop.permute.xlu0 %457 }
 0x145   :  { %5267 = vst [vmem:[#allocation47_spill] sm:$0xff] %v3440_v63 }
 0x152   :  { %v3387_v4 = vpop.xlane.xlu1 %54 }
 0x153   :  { %5250 = vst [vmem:[#allocation30_spill] sm:$0xff] %v3387_v4  ;;  %3044 = vrcp.f32 %v3387_v4 }
 0x154   :  { %3046 = vrcp.f32 %v3389_v5 }
 0x156   :  { %v3393_v7 = vpop.xlane.xlu1 %63 }
 0x157   :  { %5252 = vst [vmem:[#allocation32_spill] sm:$0xff] %v3393_v7  ;;  %3048 = vrcp.f32 %v3393_v7 }
 0x15a   :  { %v3408_v23 = vpop.permute.xlu1 %406 }
 0x15b   :  { %5256 = vst [vmem:[#allocation36_spill] sm:$0xff] %v3408_v23 }
 0x15d   :  { %v3045_v1 = vpop.eup %3044 }
 0x15e   :  { %v3047_v2 = vpop.eup %3046  ;;  %v3398_v17 = vmul.f32 %v3045_v1, %v3306_v22  ;;  %v3417_v37 = vpop.permute.xlu1 %428  ;;  %v3447_v1 = vsub.f32 %v3358_v9, %v165_v59 }
 0x15f   :  { %v3401_v18 = vmul.f32 %v3047_v2, %v3298_v12  ;;  %5258 = vst [vmem:[#allocation38_spill] sm:$0xff] %v3417_v37  ;;  %v3451_v2 = vrot.slane %v3440_v63, %v3375_v58  ;;  %v3455_v10 = vrot.slane %v3417_v37, %v3375_v58 }
 0x160   :  { %5253 = vst [vmem:[#allocation33_spill] sm:$0xff] %v3398_v17  ;;  %v232_v21 = vmul.f32 %v3382_v61, %v3398_v17  ;;  %5268 = vst [vmem:[#allocation48_spill] sm:$0xff] %v3447_v1 }
 0x161   :  { %5254 = vst [vmem:[#allocation34_spill] sm:$0xff] %v3401_v18  ;;  %v3049_v19 = vpop.eup %3048  ;;  %v234_v35 = vmul.f32 %v3404_v20, %v3401_v18 }
 0x162   :  { %v236_v0 = vsel %vm28_vm0, %v232_v21, 0.0  ;;  %v3414_v22 = vmul.f32 %v3049_v19, %v3310_v24  ;;  %v3422_v41 = vpop.permute.xlu1 %432  ;;  %v3458_v19 = vsub.f32 %v3354_v11, %v157_v62 }
 0x163   :  { %237 = vadd.xlane.f32.xlu0 %v236_v0  ;;  %v242_v12 = vsel %vm28_vm0, %v234_v35, 0.0  ;;  %5259 = vst [vmem:[#allocation39_spill] sm:$0xff] %v3422_v41  ;;  %v3463_v0 = vadd.f32 %v157_v62, %v3354_v11  ;;  %v3466_v35 = vadd.f32 %v165_v59, %v3358_v9 }
 0x164   :  { %5257 = vst [vmem:[#allocation37_spill] sm:$0xff] %v3414_v22  ;;  %v235_v38 = vmul.f32 %v3404_v20, %v3414_v22  ;;  %5269 = vst [vmem:[#allocation49_spill] sm:$0xff] %v3458_v19  ;;  %v445_v33 = vmax.f32 %v3458_v19, %v3455_v10  ;;  %v3502_v20 = vpop.permute.xlu0 %480 }
 0x165   :  { %5271 = vst [vmem:[#allocation51_spill] sm:$0xff] %v3463_v0  ;;  %5272 = vst [vmem:[#allocation52_spill] sm:$0xff] %v3466_v35  ;;  %v181_v59 = vsub.f32 %v3463_v0, %v3458_v19  ;;  %v185_v51 = vsub.f32 %v3466_v35, %v3447_v1  ;;  %v559_v56 = vmax.f32 %v3466_v35, %v3451_v2 }
 0x166   :  { %v245_v40 = vsel %vm28_vm0, %v235_v38, 0.0  ;;  %v3424_v44 = vpop.permute.xlu1 %460  ;;  %5275 = vst [vmem:[#allocation55_spill] sm:$0xff] %v3502_v20  ;;  %v3581_v22 = vrot.slane %v3502_v20, %v3375_v58 }
 0x167   :  { %243 = vadd.xlane.f32.xlu0 %v242_v12  ;;  %5260 = vst [vmem:[#allocation40_spill] sm:$0xff] %v3424_v44  ;;  %v3470_v12 = vrot.slane %v3408_v23, %v3375_v58  ;;  %v3490_v5 = vmul.f32 %v185_v51, %v181_v59 }
 0x168   :  { %v3504_v61 = vpop.permute.xlu0 %309 }
 0x169   :  { %v423_v62 = vmin.f32 %v3463_v0, %v3470_v12  ;;  %5274 = vst [vmem:[#allocation54_spill] sm:$0xff] %v3490_v5  ;;  %5276 = vst [vmem:[#allocation56_spill] sm:$0xff] %v3504_v61 }
 0x16a   :  { %v3426_v45 = vpop.permute.xlu1 %477 }
 0x16b   :  { %246 = vadd.xlane.f32.xlu0 %v245_v40  ;;  %5261 = vst [vmem:[#allocation41_spill] sm:$0xff] %v3426_v45  ;;  %v3444_v8 = vrot.slane %v3426_v45, %v3375_v58  ;;  %v473_v40 = vmin.f32 %v3466_v35, %v3451_v2  ;;  %v449_v15 = vsub.f32 %v423_v62, %v445_v33 }
 0x16c   :  { %v551_v33 = vmin.f32 %v3458_v19, %v3455_v10 }
 0x16d   :  { %v493_v38 = vmax.f32 %v3447_v1, %v3444_v8  ;;  %v563_v49 = vmin.f32 %v3447_v1, %v3444_v8  ;;  %v453_v53 = vmax.f32 %v449_v15, 0.0 }
 0x16f   :  { %v3428_v48 = vpop.permute.xlu1 %284  ;;  %v497_v3 = vsub.f32 %v473_v40, %v493_v38  ;;  %v547_v40 = vmax.f32 %v3463_v0, %v3470_v12  ;;  %v567_v62 = vsub.f32 %v559_v56, %v563_v49 }
 0x170   :  { %5262 = vst [vmem:[#allocation42_spill] sm:$0xff] %v3428_v48 }
 0x171   :  { %v501_v4 = vmax.f32 %v497_v3, 0.0  ;;  %v555_v3 = vsub.f32 %v547_v40, %v551_v33  ;;  %v159_v33 = vmul.f32 0.5, %v3322_v27 }
 0x173   :  { %v3430_v24 = vpop.permute.xlu1 %288  ;;  %v505_v38 = vmul.f32 %v501_v4, %v453_v53  ;;  %v571_v54 = vmul.f32 %v567_v62, %v555_v3  ;;  %v156_v4 = vmul.f32 0.5, %v3318_v25  ;;  %v3528_v62 = vpop.permute.xlu0 %340  ;;  %v3542_v0 = vsub.f32 %v3356_v43, %v159_v33 }
 0x174   :  { %5263 = vst [vmem:[#allocation43_spill] sm:$0xff] %v3430_v24  ;;  %5277 = vst [vmem:[#allocation57_spill] sm:$0xff] %v3528_v62 }
 0x175   :  { %v579_v15 = vadd.f32 1e-07, %v571_v54  ;;  %5279 = vst [vmem:[#allocation59_spill] sm:$0xff] %v3542_v0  ;;  %v3548_v19 = vadd.f32 %v156_v4, %v3335_v31 }
 0x178   :  { %v3432_v52 = vpop.permute.xlu1 %312 }
 0x179   :  { %5264 = vst [vmem:[#allocation44_spill] sm:$0xff] %v3432_v52 }
 0x17d   :  { %v3434_v57 = vpop.permute.xlu1 %337 }
 0x17e   :  { %5265 = vst [vmem:[#allocation45_spill] sm:$0xff] %v3434_v57  ;;  %v3512_v53 = vrot.slane %v3434_v57, %v3375_v58 }
 0x180   :  { %v353_v3 = vsub.f32 %v3350_v39, %v3512_v53  ;;  %v3545_v39 = vadd.f32 %v159_v33, %v3356_v43  ;;  %v3562_v33 = vpop.permute.xlu0 %410 }
 0x181   :  { %5284 = vst [vmem:[#allocation64_spill] sm:$0xff] %v3562_v33 }
 0x182   :  { %v3436_v14 = vpop.permute.xlu1 %365  ;;  %5280 = vst [vmem:[#allocation60_spill] sm:$0xff] %v3545_v39 }
 0x183   :  { %5266 = vst [vmem:[#allocation46_spill] sm:$0xff] %v3436_v14  ;;  %v3522_v49 = vrot.slane %v3436_v14, %v3375_v58  ;;  %v167_v14 = vmul.f32 0.5, %v3352_v42 }
 0x185   :  { %v3560_v37 = vadd.f32 %v167_v14, %v3360_v46 }
 0x186   :  { %v3460_v21 = vpop.permute.xlu1 %368 }
 0x187   :  { %5270 = vst [vmem:[#allocation50_spill] sm:$0xff] %v3460_v21  ;;  %5283 = vst [vmem:[#allocation63_spill] sm:$0xff] %v3560_v37 }
 0x191   :  { %v3478_v6 = vpop.permute.xlu1 %510 }
 0x192   :  { %5273 = vst [vmem:[#allocation53_spill] sm:$0xff] %v3478_v6  ;;  %v3488_v7 = vrot.slane %v3478_v6, %v3375_v58  ;;  %v166_v6 = vmul.f32 0.5, %v3331_v30 }
 0x194   :  { %v527_v55 = vadd.f32 %v3488_v7, %v3490_v5  ;;  %v3508_v5 = vrot.slane %v3428_v48, %v3375_v58  ;;  %v381_v48 = vsub.f32 %v3327_v29, %v3522_v49  ;;  %v3557_v29 = vsub.f32 %v3360_v46, %v167_v14 }
 0x195   :  { %v3575_v45 = vadd.f32 %v166_v6, %v3347_v36 }
 0x196   :  { %v531_v51 = vsub.f32 %v527_v55, %v505_v38  ;;  %v3516_v55 = vrot.slane %v3504_v61, %v3375_v58  ;;  %v301_v56 = vsub.f32 %v3354_v11, %v3508_v5  ;;  %v164_v11 = vmul.f32 0.5, %v3325_v28  ;;  %5282 = vst [vmem:[#allocation62_spill] sm:$0xff] %v3557_v29 }
 0x197   :  { %v495_v42 = vmax.f32 %v3557_v29, %v3581_v22 }
 0x198   :  { %v535_v59 = vadd.f32 1e-07, %v531_v51  ;;  %v325_v40 = vsub.f32 %v3358_v9, %v3516_v55  ;;  %v305_v57 = vand.u32 2147483647, %v301_v56  ;;  %v575_v61 = vsub.f32 %v571_v54, %v531_v51 }
 0x199   :  { %v3539_v9 = vsub.f32 %v3335_v31, %v156_v4  ;;  %v357_v56 = vand.u32 2147483647, %v353_v3  ;;  %v3554_v51 = vsub.f32 %v3344_v34, %v164_v11  ;;  %v3566_v4 = vrot.slane %v3424_v44, %v3375_v58 }
 0x19a   :  { %3050 = vrcp.f32 %v535_v59  ;;  %v329_v35 = vand.u32 2147483647, %v325_v40  ;;  %v3572_v63 = vadd.f32 %v164_v11, %v3344_v34  ;;  %v3590_v11 = vsub.f32 %v3347_v36, %v166_v6 }
 0x19b   :  { %3052 = vrcp.f32 %v579_v15  ;;  %v158_v15 = vmul.f32 0.5, %v3320_v26  ;;  %5278 = vst [vmem:[#allocation58_spill] sm:$0xff] %v3539_v9  ;;  %5281 = vst [vmem:[#allocation61_spill] sm:$0xff] %v3554_v51  ;;  %v492_v14 = vmax.f32 %v3554_v51, %v3444_v8  ;;  %v422_v6 = vmin.f32 %v3548_v19, %v3470_v12 }
 0x19c   :  { %v333_v40 = vadd.f32 %v329_v35, %v305_v57  ;;  %5285 = vst [vmem:[#allocation65_spill] sm:$0xff] %v3572_v63  ;;  %5287 = vst [vmem:[#allocation67_spill] sm:$0xff] %v3590_v11  ;;  %v472_v57 = vmin.f32 %v3572_v63, %v3451_v2  ;;  %v3596_v35 = vrot.slane %v3562_v33, %v3375_v58 }
 0x19d   :  { %v3551_v54 = vsub.f32 %v3340_v32, %v158_v15  ;;  %v494_v20 = vmax.f32 %v3590_v11, %v3581_v22  ;;  %v475_v13 = vmin.f32 %v3560_v37, %v3566_v4 }
 0x19e   :  { %v496_v33 = vsub.f32 %v472_v57, %v492_v14  ;;  %v186_v14 = vsub.f32 %v3575_v45, %v3590_v11  ;;  %v3625_v57 = vpop.permute.xlu0 %514 }
 0x19f   :  { %5289 = vst [vmem:[#allocation69_spill] sm:$0xff] %v3625_v57  ;;  %v523_v43 = vrot.slane %v3625_v57, %v3375_v58 }
 0x1a0   :  { %v500_v27 = vmax.f32 %v496_v33, 0.0 }
 0x1a4   :  { %v3051_v59 = vpop.eup %3050 }
 0x1a5   :  { %v541_v1 = vmul.f32 %v3051_v59, %v505_v38  ;;  %v3053_v23 = vpop.eup %3052  ;;  %v385_v38 = vand.u32 2147483647, %v381_v48  ;;  %v3569_v59 = vadd.f32 %v158_v15, %v3340_v32  ;;  %v3585_v48 = vrot.slane %v3422_v41, %v3375_v58 }
 0x1a6   :  { %v585_v3 = vmul.f32 %v3053_v23, %v575_v61  ;;  %v361_v61 = vadd.f32 %v357_v56, %v333_v40  ;;  %v444_v15 = vmax.f32 %v3539_v9, %v3455_v10  ;;  %v474_v41 = vmin.f32 %v3575_v45, %v3566_v4 }
 0x1a7   :  { %v180_v40 = vsub.f32 %v3548_v19, %v3539_v9  ;;  %v446_v44 = vmax.f32 %v3551_v54, %v3585_v48  ;;  %v424_v18 = vmin.f32 %v3569_v59, %v3596_v35  ;;  %v182_v60 = vsub.f32 %v3569_v59, %v3551_v54 }
 0x1a8   :  { %v3587_v23 = vsub.f32 %v541_v1, %v585_v3  ;;  %v183_v1 = vsub.f32 %v3545_v39, %v3542_v0  ;;  %v3604_v56 = vadd.f32 %v385_v38, %v361_v61  ;;  %v184_v3 = vsub.f32 %v3572_v63, %v3554_v51 }
 0x1a9   :  { %v187_v38 = vsub.f32 %v3560_v37, %v3557_v29  ;;  %v448_v17 = vsub.f32 %v422_v6, %v444_v15  ;;  %v498_v47 = vsub.f32 %v474_v41, %v494_v20  ;;  %v447_v15 = vmax.f32 %v3542_v0, %v3585_v48 }
 0x1aa   :  { %5286 = vst [vmem:[#allocation66_spill] sm:$0xff] %v3587_v23  ;;  %5288 = vst [vmem:[#allocation68_spill] sm:$0xff] %v3604_v56  ;;  %v603_v61 = vsub.f32 0.0, %v3587_v23  ;;  %v595_v23 = vmul.f32 5.0, %v3604_v56  ;;  %v3634_v6 = vmul.f32 %v184_v3, %v180_v40  ;;  %v450_v30 = vsub.f32 %v424_v18, %v446_v44 }
 0x1ab   :  { %v452_v20 = vmax.f32 %v448_v17, 0.0  ;;  %v3642_v56 = vmul.f32 %v186_v14, %v182_v60  ;;  %v425_v40 = vmin.f32 %v3545_v39, %v3596_v35  ;;  %v499_v3 = vsub.f32 %v475_v13, %v495_v42 }
 0x1ac   :  { %5290 = vst [vmem:[#allocation70_spill] sm:$0xff] %v3634_v6  ;;  %v607_v46 = vmul.f32 2.0, %v603_v61  ;;  %v526_v41 = vadd.f32 %v3488_v7, %v3634_v6  ;;  %v502_v33 = vmax.f32 %v498_v47, 0.0  ;;  %v550_v44 = vmin.f32 %v3539_v9, %v3455_v10 }
 0x1ad   :  { %5291 = vst [vmem:[#allocation71_spill] sm:$0xff] %v3642_v56  ;;  %v451_v17 = vsub.f32 %v425_v40, %v447_v15  ;;  %v528_v7 = vadd.f32 %v523_v43, %v3642_v56  ;;  %v546_v60 = vmax.f32 %v3548_v19, %v3470_v12  ;;  %v560_v13 = vmax.f32 %v3575_v45, %v3566_v4 }
 0x1ae   :  { %v503_v47 = vmax.f32 %v499_v3, 0.0  ;;  %v548_v12 = vmax.f32 %v3569_v59, %v3596_v35  ;;  %v565_v40 = vmin.f32 %v3557_v29, %v3581_v22  ;;  %v553_v3 = vmin.f32 %v3542_v0, %v3585_v48 }
 0x1af   :  { %v554_v10 = vsub.f32 %v546_v60, %v550_v44  ;;  %v455_v61 = vmax.f32 %v451_v17, 0.0 }
 0x1d1   :  { %v241_v50 = vpop.xlane.xlu1 %240 }
 0x1d2   :  { %v249_v16 = vsub.f32 0.0, %v241_v50  ;;  %v562_v50 = vmin.f32 %v3554_v51, %v3444_v8  ;;  %v504_v8 = vmul.f32 %v500_v27, %v452_v20  ;;  %v564_v27 = vmin.f32 %v3590_v11, %v3581_v22 }
 0x1d4   :  { %v599_v26 = vadd.f32 %v595_v23, %v249_v16  ;;  %v558_v16 = vmax.f32 %v3572_v63, %v3451_v2  ;;  %v454_v23 = vmax.f32 %v450_v30, 0.0  ;;  %v552_v30 = vmin.f32 %v3551_v54, %v3585_v48 }
 0x1d5   :  { %v568_v20 = vsub.f32 %v560_v13, %v564_v27  ;;  %v321_v13 = vrot.slane %v3432_v52, %v3375_v58  ;;  %v352_v27 = vsub.f32 %v3318_v25, %v3512_v53  ;;  %v5296_v25 = vld [vmem:[#allocation13_spill] sm:$0xff] }
 0x1d6   :  { %v3646_v18 = vadd.f32 %v607_v46, %v599_v26  ;;  %v3658_v26 = vsub.f32 %v526_v41, %v504_v8  ;;  %v566_v42 = vsub.f32 %v558_v16, %v562_v50  ;;  %v3660_v46 = vmul.f32 %v187_v38, %v183_v1 }
 0x1d7   :  { %v3662_v2 = vmul.f32 %v502_v33, %v454_v23  ;;  %v561_v1 = vmax.f32 %v3560_v37, %v3566_v4  ;;  %v3677_v41 = vmul.f32 %v503_v47, %v455_v61  ;;  %v556_v33 = vsub.f32 %v548_v12, %v552_v30 }
 0x1d8   :  { %1625 = vperm.xlu0 %3025, %v3646_v18   ;;  %5292 = vst [vmem:[#allocation72_spill] sm:$0xff] %v3660_v46  ;;  %v529_v14 = vadd.f32 %v523_v43, %v3660_v46  ;;  %v534_v38 = vadd.f32 1e-07, %v3658_v26  ;;  %v570_v50 = vmul.f32 %v566_v42, %v554_v10  ;;  %v549_v43 = vmax.f32 %v3545_v39, %v3596_v35 }
 0x1d9   :  { %v3672_v15 = vsub.f32 %v528_v7, %v3662_v2  ;;  %v572_v17 = vmul.f32 %v568_v20, %v556_v33  ;;  %v569_v23 = vsub.f32 %v561_v1, %v565_v40  ;;  %v300_v35 = vsub.f32 %v3335_v31, %v3508_v5  ;;  %v5293_v20 = vld [vmem:[#allocation23_spill] sm:$0xff] }
 0x1da   :  { %v3686_v16 = vsub.f32 %v529_v14, %v3677_v41  ;;  %3054 = vrcp.f32 %v534_v38  ;;  %v578_v44 = vadd.f32 1e-07, %v570_v50  ;;  %v557_v7 = vsub.f32 %v549_v43, %v553_v3 }
 0x1db   :  { %v536_v4 = vadd.f32 1e-07, %v3672_v15  ;;  %v580_v22 = vadd.f32 1e-07, %v572_v17  ;;  %v297_v42 = vrot.slane %v3430_v24, %v3375_v58  ;;  %v324_v47 = vsub.f32 %v3344_v34, %v3516_v55 }
 0x1dc   :  { %v537_v60 = vadd.f32 1e-07, %v3686_v16  ;;  %v573_v48 = vmul.f32 %v569_v23, %v557_v7  ;;  %v326_v10 = vsub.f32 %v3347_v36, %v321_v13  ;;  %v349_v61 = vrot.slane %v3528_v62, %v3375_v58  ;;  %v5294_v23 = vld [vmem:[#allocation9_spill] sm:$0xff] }
 0x1dd   :  { %3056 = vrcp.f32 %v536_v4  ;;  %v304_v14 = vand.u32 2147483647, %v300_v35  ;;  %v380_v5 = vsub.f32 %v3325_v28, %v3522_v49  ;;  %v302_v1 = vsub.f32 %v3340_v32, %v297_v42 }
 0x1de   :  { %3058 = vrcp.f32 %v578_v44  ;;  %v581_v30 = vadd.f32 1e-07, %v573_v48  ;;  %v377_v55 = vrot.slane %v3460_v21, %v3375_v58  ;;  %v574_v38 = vsub.f32 %v570_v50, %v3658_v26 }
 0x1df   :  { %3060 = vrcp.f32 %v537_v60  ;;  %v328_v53 = vand.u32 2147483647, %v324_v47  ;;  %v327_v40 = vsub.f32 %v5293_v20, %v321_v13  ;;  %v356_v3 = vand.u32 2147483647, %v352_v27  ;;  %v5295_v60 = vld [vmem:[#allocation21_spill] sm:$0xff] }
 0x1e0   :  { %3062 = vrcp.f32 %v580_v22  ;;  %v330_v43 = vand.u32 2147483647, %v326_v10  ;;  %v354_v7 = vsub.f32 %v5294_v23, %v349_v61  ;;  %v303_v49 = vsub.f32 %v5295_v60, %v297_v42 }
 0x1e1   :  { %3064 = vrcp.f32 %v581_v30  ;;  %v332_v22 = vadd.f32 %v328_v53, %v304_v14  ;;  %v384_v35 = vand.u32 2147483647, %v380_v5  ;;  %v306_v28 = vand.u32 2147483647, %v302_v1  ;;  %v5300_v53 = vld [vmem:[#allocation19_spill] sm:$0xff] }
 0x1e2   :  { %v382_v21 = vsub.f32 %v5296_v25, %v377_v55  ;;  %v576_v26 = vsub.f32 %v572_v17, %v3672_v15  ;;  %v331_v50 = vand.u32 2147483647, %v327_v40  ;;  %v358_v42 = vand.u32 2147483647, %v354_v7 }
 0x1e3   :  { %v360_v13 = vadd.f32 %v356_v3, %v332_v22  ;;  %v334_v27 = vadd.f32 %v330_v43, %v306_v28  ;;  %v307_v14 = vand.u32 2147483647, %v303_v49  ;;  %v577_v15 = vsub.f32 %v573_v48, %v3686_v16 }
 0x1e4   :  { %v3055_v12 = vpop.eup %3054  ;;  %v386_v1 = vand.u32 2147483647, %v382_v21 }
 0x1e5   :  { %v539_v4 = vmul.f32 %v3055_v12, %v504_v8  ;;  %v5298_v12 = vld [vmem:[#allocation10_spill] sm:$0xff]  ;;  %v3718_v5 = vadd.f32 %v384_v35, %v360_v13  ;;  %v335_v17 = vadd.f32 %v331_v50, %v307_v14  ;;  %v362_v40 = vadd.f32 %v358_v42, %v334_v27 }
 0x1e6   :  { %v355_v20 = vsub.f32 %v5298_v12, %v349_v61 }
 0x1e7   :  { %v3057_v33 = vpop.eup %3056  ;;  %5299 = vst [vmem:[#allocation13_spill] sm:$0xff] %v3718_v5  ;;  %v3727_v21 = vadd.f32 %v386_v1, %v362_v40 }
 0x1e8   :  { %v3059_v44 = vpop.eup %3058  ;;  %v543_v8 = vmul.f32 %v3057_v33, %v3662_v2  ;;  %v359_v61 = vand.u32 2147483647, %v355_v20  ;;  %v594_v33 = vmul.f32 5.0, %v3718_v5 }
 0x1e9   :  { %v583_v36 = vmul.f32 %v3059_v44, %v574_v38  ;;  %v3061_v47 = vpop.eup %3060  ;;  %v383_v38 = vsub.f32 %v5300_v53, %v377_v55  ;;  %5302 = vst [vmem:[#allocation19_spill] sm:$0xff] %v3727_v21 }
 0x1ea   :  { %v3063_v10 = vpop.eup %3062  ;;  %v545_v2 = vmul.f32 %v3061_v47, %v3677_v41  ;;  %v363_v49 = vadd.f32 %v359_v61, %v335_v17  ;;  %v596_v41 = vmul.f32 5.0, %v3727_v21  ;;  %v5305_v17 = vld [vmem:[#allocation3_spill] sm:$0xff]  ;;  %v5331_v21 = vld [vmem:[#allocation52_spill] sm:$0xff] }
 0x1eb   :  { %v3714_v30 = vsub.f32 %v539_v4, %v583_v36  ;;  %v587_v44 = vmul.f32 %v3063_v10, %v576_v26  ;;  %v3065_v3 = vpop.eup %3064  ;;  %v387_v55 = vand.u32 2147483647, %v383_v38  ;;  %v3738_v40 = vcvt.s32.f32 %v5305_v17 }
 0x1ec   :  { %v589_v7 = vmul.f32 %v3065_v3, %v577_v15  ;;  %v5307_v3 = vld [vmem:[#allocation24_spill] sm:$0xff] }
 0x1ed   :  { %5297 = vst [vmem:[#allocation21_spill] sm:$0xff] %v3714_v30  ;;  %v602_v28 = vsub.f32 0.0, %v3714_v30  ;;  %v3723_v36 = vsub.f32 %v543_v8, %v587_v44  ;;  %v3733_v13 = vadd.f32 %v387_v55, %v363_v49  ;;  %5306 = vst [vmem:[#allocation75_spill] sm:$0xff] %v3738_v40  ;;  %1677 = vbcast.lane.b32.xlu0 %v3738_v40, 256 }
 0x1ee   :  { %v3730_v35 = vsub.f32 %v545_v2, %v589_v7  ;;  %v1637_v2 = vadd.s32 4294967288, %v5305_v17  ;;  %v3745_v61 = vsub.s32 %v5305_v17, %v5307_v3 }
 0x1ef   :  { %5301 = vst [vmem:[#allocation10_spill] sm:$0xff] %v3723_v36  ;;  %v606_v48 = vmul.f32 2.0, %v602_v28  ;;  %v604_v22 = vsub.f32 0.0, %v3723_v36  ;;  %5304 = vst [vmem:[#allocation74_spill] sm:$0xff] %v3733_v13  ;;  %v597_v42 = vmul.f32 5.0, %v3733_v13  ;;  %v5332_v13 = vld [vmem:[#allocation55_spill] sm:$0xff] }
 0x1f0   :  { %v238_v43 = vpop.xlane.xlu0 %237  ;;  %5303 = vst [vmem:[#allocation73_spill] sm:$0xff] %v3730_v35  ;;  %v605_v8 = vsub.f32 0.0, %v3730_v35  ;;  %5308 = vst [vmem:[#allocation76_spill] sm:$0xff] %v3745_v61 }
 0x1f1   :  { %v248_v4 = vsub.f32 0.0, %v238_v43  ;;  %v608_v27 = vmul.f32 2.0, %v604_v22  ;;  %1681 = vbcast.lane.b32.xlu0 %v3738_v40, 264  ;;  %v3748_v43 = vsub.s32 %v1637_v2, %v5307_v3 }
 0x1f2   :  { %v609_v44 = vmul.f32 2.0, %v605_v8 }
 0x1f3   :  { %v598_v16 = vadd.f32 %v594_v33, %v248_v4  ;;  %5309 = vst [vmem:[#allocation77_spill] sm:$0xff] %v3748_v43 }
 0x1f4   :  { %v244_v26 = vpop.xlane.xlu0 %243 }
 0x1f5   :  { %v250_v50 = vsub.f32 0.0, %v244_v26  ;;  %v610_v20 = vadd.f32 %v606_v48, %v598_v16 }
 0x1f7   :  { %v600_v47 = vadd.f32 %v596_v41, %v250_v50  ;;  %1622 = vperm.xlu1 %3027, %v610_v20  }
 0x1f8   :  { %v247_v10 = vpop.xlane.xlu0 %246 }
 0x1f9   :  { %v251_v14 = vsub.f32 0.0, %v247_v10  ;;  %v612_v1 = vadd.f32 %v608_v27, %v600_v47  ;;  %v3759_v47 = vsub.s32 1, %v5307_v3 }
 0x1fb   :  { %v601_v38 = vadd.f32 %v597_v42, %v251_v14  ;;  %1628 = vperm.xlu1 %3027, %v612_v1  }
 0x1fd   :  { %v613_v15 = vadd.f32 %v609_v44, %v601_v38 }
 0x1ff   :  { %1631 = vperm.xlu1 %3027, %v613_v15  }
 0x257   :  { %v1626_v4 = vpop.permute.xlu0 %1625 }
 0x258   :  { %v1641_v49 = vrot.slane %v1626_v4, %v3748_v43 }
 0x25f   :  { %v3761_v27 = vpop.permute.xlu0 %1677 }
 0x260   :  { %5310 = vst [vmem:[#allocation78_spill] sm:$0xff] %v3761_v27 }
 0x263   :  { %v3767_v44 = vpop.permute.xlu0 %1681 }
 0x264   :  { %5311 = vst [vmem:[#allocation79_spill] sm:$0xff] %v3767_v44 }
 0x276   :  { %v1623_v28 = vpop.permute.xlu1 %1622 }
 0x277   :  { %v1636_v55 = vrot.slane %v1623_v28, %v3745_v61 }
 0x279   :  { %v1643_v22 = vsel %vm1642_vm7, %v1641_v49, %v1636_v55 }
 0x27a   :  { %v1629_v33 = vpop.permute.xlu1 %1628 }
 0x27b   :  { %v1647_v16 = vrot.slane %v1629_v33, %v3745_v61  ;;  %v5312_v33 = vmov 1  }
 0x27e   :  { %v1632_v7 = vpop.permute.xlu1 %1631 }
 0x27f   :  { %v1651_v48 = vrot.slane %v1632_v7, %v3748_v43 }
 0x281   :  { %v1652_v26 = vsel %vm1642_vm7, %v1651_v48, %v1647_v16 }
 0x282   :  { %v1654_v41 = vsel %vm1653_vm8, %v1652_v26, %v1643_v22 }
 0x283   :  { %v1657_v50 = vsel %vm1656_vm9, %v1654_v41, inf }
 0x284   :  { %1658 = vmin.xlane.f32.xlu1 %v1657_v50 }
 0x311   :  { %v1659_v8 = vpop.xlane.xlu1 %1658 }
 0x312   :  { %v1664_v10 = vrot.slane %v1659_v8, %v3375_v58  ;;  %v1668_v42 = vrot.slane %v1659_v8, %v3759_v47 }
 0x314   :  { %vm1673_vm10 = vcmp.le.f32.partialorder %v612_v1, %v1668_v42  ;;  %vm1671_vm11 = vcmp.le.f32.partialorder %v610_v20, %v1664_v10  ;;  %vm1672_vm12 = vcmp.le.f32.partialorder %v3646_v18, %v1664_v10  ;;  %vm1674_vm13 = vcmp.le.f32.partialorder %v613_v15, %v1668_v42  ;;  %v5313_v20 = vld [vmem:[#allocation2_spill] sm:$0xff] }
 0x315   :  { %v1687_v14 = vsel %vm1673_vm10, %v3761_v27, 16.0  ;;  %v1685_v38 = vsel %vm1671_vm11, %v3761_v27, 16.0  ;;  %v1686_v28 = vsel %vm1672_vm12, %v3767_v44, 16.0  ;;  %v1688_v2 = vsel %vm1674_vm13, %v3767_v44, 16.0 }
 0x316   :  { %1700 = vperm.xlu1 %3027, %v1687_v14   ;;  %1694 = vperm.xlu0 %3025, %v1685_v38   ;;  %v5314_v1 = vmov 0   ;;  %v5315_v10 = vmov 0.0   ;;  %v5316_v14 = vld [vmem:[#allocation26_spill] sm:$0xff] }
 0x31a   :  { %1697 = vperm.xlu0 %3025, %v1686_v28  }
 0x31e   :  { %1703 = vperm.xlu0 %3025, %v1688_v2  }
 0x322   :  { %3028 = vset.pattern.permute.xlu0 %v5312_v33 }
 0x323   :  { %615 = vperm.xlu0 %3028, %v5313_v20  }
 0x327   :  { %3029 = vset.pattern.permute.xlu0 %v5314_v1 }
 0x395   :  { %v1695_v4 = vpop.permute.xlu0 %1694  ;;  %v1701_v7 = vpop.permute.xlu1 %1700 }
 0x396   :  { %v1717_v18 = vrot.slane %v1701_v7, %v3745_v61  ;;  %v1708_v48 = vrot.slane %v1695_v4, %v3745_v61 }
 0x399   :  { %v1698_v55 = vpop.permute.xlu0 %1697 }
 0x39a   :  { %v1712_v49 = vrot.slane %v1698_v55, %v3748_v43  ;;  %v5319_v55 = vld [vmem:[#allocation28_spill] sm:$0xff] }
 0x39c   :  { %v1713_v22 = vsel %vm1642_vm7, %v1712_v49, %v1708_v48  ;;  %v5320_v49 = vld [vmem:[#allocation33_spill] sm:$0xff] }
 0x39d   :  { %v1704_v16 = vpop.permute.xlu0 %1703 }
 0x39e   :  { %v1721_v15 = vrot.slane %v1704_v16, %v3748_v43 }
 0x3a0   :  { %v1722_v26 = vsel %vm1642_vm7, %v1721_v15, %v1717_v18  ;;  %v5321_v15 = vld [vmem:[#allocation34_spill] sm:$0xff] }
 0x3a1   :  { %v1723_v41 = vsel %vm1653_vm8, %v1722_v26, %v1713_v22 }
 0x3a2   :  { %v616_v50 = vpop.permute.xlu0 %615  ;;  %v1725_v8 = vsel %vm1656_vm9, %v1723_v41, inf  ;;  %v5322_v41 = vld [vmem:[#allocation37_spill] sm:$0xff] }
 0x3a3   :  { %vm617_vm14 = vcmp.eq.s32.totalorder %v5305_v17, %v616_v50  ;;  %1726 = vmin.xlane.f32.xlu0 %v1725_v8 }
 0x3a4   :  { %v2969_v42 = vsel %vm617_vm14, 1.0, %v5315_v10 }
 0x3a5   :  { %v627_v38 = vrot.slane %v2969_v42, %v5316_v14 }
 0x3a7   :  { %v628_v28 = vcombine.high %v627_v38, %v627_v38  ;;  %v635_v2 = vrot.slane %v627_v38, %v5316_v14 }
 0x3a9   :  { %v642_v33 = vrot.slane %v628_v28, %v5316_v14  ;;  %v3789_v20 = vrot.slane %v635_v2, %v3375_v58 }
 0x3ab   :  { %5317 = vst [vmem:[#allocation2_spill] sm:$0xff] %v3789_v20  ;;  %v3792_v4 = vrot.slane %v642_v33, %v3375_v58  ;;  %v654_v7 = vmul.f32 %v3789_v20, %v5319_v55  ;;  %v653_v16 = vmul.f32 %v3789_v20, %v5320_v49  ;;  %v5333_v20 = vld [vmem:[#allocation49_spill] sm:$0xff] }
 0x3ad   :  { %5318 = vst [vmem:[#allocation80_spill] sm:$0xff] %v3792_v4  ;;  %v660_v18 = vsel %vm28_vm0, %v654_v7, 0.0  ;;  %v657_v48 = vsel %vm28_vm0, %v653_v16, 0.0  ;;  %v655_v22 = vmul.f32 %v3792_v4, %v5321_v15  ;;  %v656_v50 = vmul.f32 %v3792_v4, %v5322_v41  ;;  %v5325_v7 = vld [vmem:[#allocation41_spill] sm:$0xff] }
 0x3ae   :  { %661 = vadd.xlane.f32.xlu0 %v660_v18  ;;  %658 = vadd.xlane.f32.xlu1 %v657_v48  ;;  %v826_v16 = vrot.slane %v5325_v7, %v3759_v47  ;;  %v5326_v18 = vld [vmem:[#allocation47_spill] sm:$0xff]  ;;  %v3836_v4 = vrot.slane %v5332_v13, %v3759_v47 }
 0x3af   :  { %v663_v26 = vsel %vm28_vm0, %v655_v22, 0.0  ;;  %v666_v8 = vsel %vm28_vm0, %v656_v50, 0.0  ;;  %v812_v48 = vrot.slane %v5326_v18, %v3759_v47  ;;  %v5327_v22 = vld [vmem:[#allocation38_spill] sm:$0xff]  ;;  %v5328_v50 = vld [vmem:[#allocation36_spill] sm:$0xff] }
 0x3b1   :  { %v819_v36 = vmin.f32 %v3572_v63, %v812_v48  ;;  %v820_v5 = vmin.f32 %v5331_v21, %v812_v48  ;;  %v891_v55 = vmax.f32 %v3572_v63, %v812_v48  ;;  %v892_v49 = vmax.f32 %v5331_v21, %v812_v48 }
 0x3b2   :  { %664 = vadd.xlane.f32.xlu0 %v663_v26  ;;  %v790_v26 = vrot.slane %v5327_v22, %v3759_v47  ;;  %v5334_v22 = vld [vmem:[#allocation39_spill] sm:$0xff] }
 0x3b3   :  { %v3841_v18 = vrot.slane %v5334_v22, %v3759_v47  ;;  %v5337_v22 = vld [vmem:[#allocation53_spill] sm:$0xff] }
 0x3b4   :  { %v797_v30 = vmax.f32 %v3539_v9, %v790_v26  ;;  %v852_v14 = vrot.slane %v5337_v22, %v3759_v47 }
 0x3b5   :  { %v800_v27 = vmax.f32 %v3542_v0, %v3841_v18 }
 0x3b6   :  { %667 = vadd.xlane.f32.xlu0 %v666_v8  ;;  %v776_v8 = vrot.slane %v5328_v50, %v3759_v47  ;;  %v798_v50 = vmax.f32 %v5333_v20, %v790_v26 }
 0x3b8   :  { %v783_v3 = vmin.f32 %v3548_v19, %v776_v8  ;;  %v879_v43 = vmax.f32 %v3548_v19, %v776_v8 }
 0x430   :  { %v1727_v42 = vpop.xlane.xlu0 %1726 }
 0x431   :  { %vm1728_vm15 = vcmp.eq.f32.partialorder %v3738_v40, %v1727_v42  ;;  %v833_v42 = vmax.f32 %v3554_v51, %v826_v16  ;;  %v5336_v40 = vld [vmem:[#allocation51_spill] sm:$0xff] }
 0x432   :  { %v3808_v38 = vsel %vm1728_vm15, 1.0, %v5315_v10  ;;  %v784_v41 = vmin.f32 %v5336_v40, %v776_v8  ;;  %v801_v10 = vsub.f32 %v783_v3, %v797_v30  ;;  %v895_v3 = vmin.f32 %v3554_v51, %v826_v16 }
 0x433   :  { %5323 = vst [vmem:[#allocation81_spill] sm:$0xff] %v3808_v38  ;;  %v3811_v28 = vmul.f32 1e+09, %v3808_v38  ;;  %v5330_v38 = vld [vmem:[#allocation48_spill] sm:$0xff] }
 0x434   :  { %v802_v17 = vsub.f32 %v784_v41, %v798_v50  ;;  %v896_v1 = vmin.f32 %v5330_v38, %v826_v16  ;;  %v859_v41 = vadd.f32 %v852_v14, %v3634_v6  ;;  %v856_v50 = vrot.slane %v3625_v57, %v3759_v47 }
 0x435   :  { %5324 = vst [vmem:[#allocation82_spill] sm:$0xff] %v3811_v28  ;;  %v1882_v2 = vrot.slane %v3811_v28, %v3375_v58  ;;  %v1893_v33 = vrot.slane %v3811_v28, %v3759_v47  ;;  %v837_v28 = vsub.f32 %v819_v36, %v833_v42  ;;  %v836_v36 = vmax.f32 %v3557_v29, %v3836_v4 }
 0x436   :  { %v799_v42 = vmax.f32 %v3551_v54, %v3841_v18  ;;  %v805_v44 = vmax.f32 %v801_v10, 0.0  ;;  %v806_v58 = vmax.f32 %v802_v17, 0.0 }
 0x437   :  { %1888 = vbcast.lane.b32.xlu0 %v1882_v2, 264  ;;  %1884 = vbcast.lane.b32.xlu1 %v1882_v2, 256  ;;  %v5329_v2 = vld [vmem:[#allocation40_spill] sm:$0xff]  ;;  %v841_v22 = vmax.f32 %v837_v28, 0.0 }
 0x438   :  { %v3828_v35 = vrot.slane %v5329_v2, %v3759_v47  ;;  %v5335_v2 = vld [vmem:[#allocation64_spill] sm:$0xff] }
 0x439   :  { %v3845_v7 = vrot.slane %v5335_v2, %v3759_v47  ;;  %v835_v2 = vmax.f32 %v3590_v11, %v3836_v4 }
 0x43a   :  { %v821_v15 = vmin.f32 %v3575_v45, %v3828_v35  ;;  %v822_v30 = vmin.f32 %v3560_v37, %v3828_v35  ;;  %v893_v51 = vmax.f32 %v3575_v45, %v3828_v35 }
 0x43b   :  { %1895 = vbcast.lane.b32.xlu1 %v1893_v33, 256  ;;  %v786_v48 = vmin.f32 %v3545_v39, %v3845_v7 }
 0x43c   :  { %v839_v21 = vsub.f32 %v821_v15, %v835_v2  ;;  %v884_v15 = vmin.f32 %v5333_v20, %v790_v26  ;;  %v899_v2 = vsub.f32 %v891_v55, %v895_v3  ;;  %v840_v10 = vsub.f32 %v822_v30, %v836_v36 }
 0x43d   :  { %v881_v55 = vmax.f32 %v3569_v59, %v3845_v7 }
 0x43e   :  { %v843_v57 = vmax.f32 %v839_v21, 0.0 }
 0x43f   :  { %1899 = vbcast.lane.b32.xlu1 %v1893_v33, 264  ;;  %v834_v33 = vmax.f32 %v5330_v38, %v826_v16  ;;  %v3879_v16 = vmul.f32 %v841_v22, %v805_v44  ;;  %v804_v22 = vsub.f32 %v786_v48, %v800_v27  ;;  %v862_v48 = vadd.f32 %v856_v50, %v3660_v46  ;;  %v662_v46 = vpop.xlane.xlu0 %661 }
 0x441   :  { %v838_v13 = vsub.f32 %v820_v5, %v834_v33  ;;  %v785_v5 = vmin.f32 %v3569_v59, %v3845_v7  ;;  %v883_v33 = vmin.f32 %v3539_v9, %v790_v26  ;;  %v5338_v9 = vld [vmem:[#allocation54_spill] sm:$0xff]  ;;  %v3887_v17 = vsub.f32 %v859_v41, %v3879_v16  ;;  %v5339_v41 = vld [vmem:[#allocation56_spill] sm:$0xff] }
 0x442   :  { %v860_v28 = vadd.f32 %v852_v14, %v5338_v9  ;;  %v861_v14 = vadd.f32 %v856_v50, %v3642_v56  ;;  %v808_v3 = vmax.f32 %v804_v22, 0.0  ;;  %v714_v22 = vrot.slane %v3432_v52, %v3759_v47 }
 0x443   :  { %v842_v63 = vmax.f32 %v838_v13, 0.0  ;;  %v803_v61 = vsub.f32 %v785_v5, %v799_v42  ;;  %v880_v13 = vmax.f32 %v5336_v40, %v776_v8  ;;  %v900_v42 = vsub.f32 %v892_v49, %v896_v1 }
 0x444   :  { %v887_v5 = vsub.f32 %v879_v43, %v883_v33  ;;  %v844_v43 = vmax.f32 %v840_v10, 0.0  ;;  %v894_v1 = vmax.f32 %v3560_v37, %v3828_v35 }
 0x445   :  { %v3881_v6 = vmul.f32 %v842_v63, %v806_v58  ;;  %v807_v44 = vmax.f32 %v803_v61, 0.0  ;;  %v897_v58 = vmin.f32 %v3590_v11, %v3836_v4  ;;  %v885_v63 = vmin.f32 %v3551_v54, %v3841_v18 }
 0x446   :  { %v888_v21 = vsub.f32 %v880_v13, %v884_v15  ;;  %v3898_v26 = vmul.f32 %v899_v2, %v887_v5  ;;  %v867_v61 = vadd.f32 1e-07, %v3887_v17  ;;  %v882_v13 = vmax.f32 %v3545_v39, %v3845_v7  ;;  %v5340_v2 = vld [vmem:[#allocation42_spill] sm:$0xff] }
 0x447   :  { %v3890_v8 = vsub.f32 %v860_v28, %v3881_v6  ;;  %v3900_v36 = vmul.f32 %v843_v57, %v807_v44  ;;  %v901_v49 = vsub.f32 %v893_v51, %v897_v58  ;;  %v898_v57 = vmin.f32 %v3557_v29, %v3836_v4  ;;  %v5341_v58 = vld [vmem:[#allocation45_spill] sm:$0xff] }
 0x448   :  { %v3905_v27 = vmul.f32 %v900_v42, %v888_v21  ;;  %v710_v28 = vrot.slane %v5339_v41, %v3759_v47  ;;  %v889_v35 = vsub.f32 %v881_v55, %v885_v63  ;;  %v886_v51 = vmin.f32 %v3542_v0, %v3841_v18 }
 0x449   :  { %v868_v33 = vadd.f32 1e-07, %v3890_v8  ;;  %v3910_v30 = vsub.f32 %v861_v14, %v3900_v36  ;;  %v911_v50 = vadd.f32 1e-07, %v3898_v26  ;;  %v3921_v15 = vmul.f32 %v844_v43, %v808_v3  ;;  %v5342_v43 = vld [vmem:[#allocation20_spill] sm:$0xff] }
 0x44a   :  { %v692_v10 = vrot.slane %v5340_v2, %v3759_v47  ;;  %3066 = vrcp.f32 %v867_v61  ;;  %v912_v4 = vadd.f32 1e-07, %v3905_v27  ;;  %v3926_v14 = vmul.f32 %v901_v49, %v889_v35  ;;  %v5343_v49 = vld [vmem:[#allocation46_spill] sm:$0xff] }
 0x44b   :  { %3068 = vrcp.f32 %v868_v33  ;;  %v869_v42 = vadd.f32 1e-07, %v3910_v30  ;;  %v3930_v7 = vsub.f32 %v862_v48, %v3921_v15  ;;  %v902_v5 = vsub.f32 %v894_v1, %v898_v57  ;;  %v5344_v57 = vld [vmem:[#allocation22_spill] sm:$0xff] }
 0x44c   :  { %v717_v18 = vsub.f32 %v3344_v34, %v710_v28  ;;  %v696_v44 = vrot.slane %v3430_v24, %v3759_v47  ;;  %v732_v63 = vrot.slane %v5341_v58, %v3759_v47  ;;  %3070 = vrcp.f32 %v911_v50  ;;  %v5347_v58 = vld [vmem:[#allocation18_spill] sm:$0xff] }
 0x44d   :  { %v890_v21 = vsub.f32 %v882_v13, %v886_v51  ;;  %v699_v55 = vsub.f32 %v3335_v31, %v692_v10  ;;  %v700_v61 = vsub.f32 %v5342_v43, %v692_v10  ;;  %3072 = vrcp.f32 %v912_v4  ;;  %v5345_v10 = vld [vmem:[#allocation17_spill] sm:$0xff]  ;;  %v5346_v43 = vld [vmem:[#allocation8_spill] sm:$0xff]  ;;  %v5348_v24 = vld [vmem:[#allocation50_spill] sm:$0xff] }
 0x44e   :  { %v913_v1 = vadd.f32 1e-07, %v3926_v14  ;;  %v754_v48 = vrot.slane %v5343_v49, %v3759_v47  ;;  %3074 = vrcp.f32 %v869_v42  ;;  %v870_v33 = vadd.f32 1e-07, %v3930_v7 }
 0x44f   :  { %v3945_v3 = vmul.f32 %v902_v5, %v890_v21  ;;  %v718_v35 = vsub.f32 %v5344_v57, %v710_v28  ;;  %v736_v13 = vrot.slane %v3528_v62, %v3759_v47  ;;  %v701_v51 = vsub.f32 %v3340_v32, %v696_v44  ;;  %v5349_v21 = vld [vmem:[#allocation11_spill] sm:$0xff]  ;;  %v5350_v57 = vld [vmem:[#allocation12_spill] sm:$0xff] }
 0x450   :  { %v721_v50 = vand.u32 2147483647, %v717_v18  ;;  %v719_v4 = vsub.f32 %v5345_v10, %v714_v22  ;;  %v739_v31 = vsub.f32 %v5346_v43, %v732_v63  ;;  %v740_v52 = vsub.f32 %v5347_v58, %v732_v63 }
 0x451   :  { %v703_v49 = vand.u32 2147483647, %v699_v55  ;;  %v704_v42 = vand.u32 2147483647, %v700_v61  ;;  %v758_v5 = vrot.slane %v5348_v24, %v3759_v47  ;;  %3076 = vrcp.f32 %v913_v1  ;;  %v5351_v61 = vld [vmem:[#allocation23_spill] sm:$0xff] }
 0x452   :  { %v761_v28 = vsub.f32 %v5349_v21, %v754_v48  ;;  %v762_v34 = vsub.f32 %v5350_v57, %v754_v48  ;;  %3078 = vrcp.f32 %v870_v33  ;;  %v914_v32 = vadd.f32 1e-07, %v3945_v3 }
 0x453   :  { %v722_v62 = vand.u32 2147483647, %v718_v35  ;;  %v741_v10 = vsub.f32 %v5294_v23, %v736_v13  ;;  %v702_v43 = vsub.f32 %v5295_v60, %v696_v44  ;;  %v705_v63 = vand.u32 2147483647, %v701_v51 }
 0x454   :  { %v3067_v18 = vpop.eup %3066  ;;  %v720_v58 = vsub.f32 %v5351_v61, %v714_v22  ;;  %v723_v2 = vand.u32 2147483647, %v719_v4  ;;  %v743_v24 = vand.u32 2147483647, %v739_v31  ;;  %v744_v1 = vand.u32 2147483647, %v740_v52 }
 0x455   :  { %v3069_v55 = vpop.eup %3068  ;;  %v725_v41 = vadd.f32 %v721_v50, %v703_v49  ;;  %v726_v21 = vadd.f32 %v722_v62, %v704_v42  ;;  %v907_v48 = vsub.f32 %v3898_v26, %v3887_v17  ;;  %v908_v33 = vsub.f32 %v3905_v27, %v3890_v8 }
 0x456   :  { %v3071_v35 = vpop.eup %3070  ;;  %v765_v57 = vand.u32 2147483647, %v761_v28  ;;  %v766_v23 = vand.u32 2147483647, %v762_v34  ;;  %v763_v44 = vsub.f32 %v5296_v25, %v758_v5  ;;  %3080 = vrcp.f32 %v914_v32  ;;  %v659_v28 = vpop.xlane.xlu1 %658 }
 0x457   :  { %v3073_v51 = vpop.eup %3072  ;;  %v742_v22 = vsub.f32 %v5298_v12, %v736_v13  ;;  %v745_v31 = vand.u32 2147483647, %v741_v10  ;;  %v872_v52 = vmul.f32 %v3067_v18, %v3879_v16  ;;  %v874_v62 = vmul.f32 %v3069_v55, %v3881_v6 }
 0x458   :  { %v3075_v49 = vpop.eup %3074  ;;  %v724_v17 = vand.u32 2147483647, %v720_v58  ;;  %v747_v26 = vadd.f32 %v743_v24, %v725_v41  ;;  %v748_v50 = vadd.f32 %v744_v1, %v726_v21  ;;  %v727_v8 = vadd.f32 %v723_v2, %v705_v63  ;;  %v665_v21 = vpop.xlane.xlu0 %664 }
 0x459   :  { %v706_v27 = vand.u32 2147483647, %v702_v43  ;;  %v916_v4 = vmul.f32 %v3071_v35, %v907_v48  ;;  %v918_v34 = vmul.f32 %v3073_v51, %v908_v33  ;;  %v909_v42 = vsub.f32 %v3926_v14, %v3910_v30 }
 0x45a   :  { %v3972_v32 = vadd.f32 %v765_v57, %v747_v26  ;;  %v3974_v13 = vadd.f32 %v766_v23, %v748_v50  ;;  %v767_v10 = vand.u32 2147483647, %v763_v44  ;;  %v764_v16 = vsub.f32 %v5300_v53, %v758_v5 }
 0x45b   :  { %v3077_v6 = vpop.eup %3076  ;;  %v3977_v18 = vsub.f32 %v872_v52, %v916_v4  ;;  %v3979_v24 = vsub.f32 %v874_v62, %v918_v34  ;;  %v876_v41 = vmul.f32 %v3075_v49, %v3900_v36  ;;  %v746_v58 = vand.u32 2147483647, %v742_v22 }
 0x45c   :  { %5352 = vst [vmem:[#allocation48_spill] sm:$0xff] %v3972_v32  ;;  %5353 = vst [vmem:[#allocation51_spill] sm:$0xff] %v3974_v13  ;;  %v3079_v2 = vpop.eup %3078  ;;  %v749_v43 = vadd.f32 %v745_v31, %v727_v8  ;;  %v728_v30 = vadd.f32 %v724_v17, %v706_v27  ;;  %v669_v14 = vsub.f32 0.0, %v659_v28  ;;  %v670_v57 = vsub.f32 0.0, %v662_v46  ;;  %v668_v49 = vpop.xlane.xlu0 %667 }
 0x45d   :  { %5354 = vst [vmem:[#allocation23_spill] sm:$0xff] %v3977_v18  ;;  %5355 = vst [vmem:[#allocation83_spill] sm:$0xff] %v3979_v24  ;;  %v920_v63 = vmul.f32 %v3077_v6, %v909_v42  ;;  %v910_v23 = vsub.f32 %v3945_v3, %v3930_v7  ;;  %v927_v5 = vmul.f32 5.0, %v3972_v32  ;;  %v928_v55 = vmul.f32 5.0, %v3974_v13  ;;  %v5390_v13 = vld [vmem:[#allocation58_spill] sm:$0xff]  ;;  %v5391_v32 = vld [vmem:[#allocation39_spill] sm:$0xff] }
 0x45e   :  { %v3986_v1 = vadd.f32 %v767_v10, %v749_v43  ;;  %v768_v48 = vand.u32 2147483647, %v764_v16  ;;  %v935_v36 = vsub.f32 0.0, %v3977_v18  ;;  %v936_v33 = vsub.f32 0.0, %v3979_v24  ;;  %v5388_v24 = vld [vmem:[#allocation65_spill] sm:$0xff] }
 0x45f   :  { %v3990_v35 = vsub.f32 %v876_v41, %v920_v63  ;;  %v878_v44 = vmul.f32 %v3079_v2, %v3921_v15  ;;  %v750_v51 = vadd.f32 %v746_v58, %v728_v30  ;;  %v931_v22 = vadd.f32 %v927_v5, %v669_v14 }
 0x460   :  { %5356 = vst [vmem:[#allocation84_spill] sm:$0xff] %v3986_v1  ;;  %v3081_v46 = vpop.eup %3080  ;;  %v932_v31 = vadd.f32 %v928_v55, %v670_v57  ;;  %v671_v7 = vsub.f32 0.0, %v665_v21  ;;  %v929_v52 = vmul.f32 5.0, %v3986_v1  ;;  %v939_v17 = vmul.f32 2.0, %v935_v36  ;;  %v5360_v36 = vld [vmem:[#allocation77_spill] sm:$0xff] }
 0x461   :  { %5357 = vst [vmem:[#allocation85_spill] sm:$0xff] %v3990_v35  ;;  %v922_v3 = vmul.f32 %v3081_v46, %v910_v23  ;;  %v3994_v62 = vadd.f32 %v768_v48, %v750_v51  ;;  %v940_v26 = vmul.f32 2.0, %v936_v33  ;;  %v937_v50 = vsub.f32 0.0, %v3990_v35 }
 0x462   :  { %v933_v27 = vadd.f32 %v929_v52, %v671_v7  ;;  %v672_v4 = vsub.f32 0.0, %v668_v49  ;;  %v943_v15 = vadd.f32 %v939_v17, %v931_v22 }
 0x463   :  { %5358 = vst [vmem:[#allocation86_spill] sm:$0xff] %v3994_v62  ;;  %v3997_v8 = vsub.f32 %v878_v44, %v922_v3  ;;  %v944_v34 = vadd.f32 %v940_v26, %v932_v31  ;;  %v930_v42 = vmul.f32 5.0, %v3994_v62  ;;  %v941_v41 = vmul.f32 2.0, %v937_v50  ;;  %v5361_v44 = vld [vmem:[#allocation76_spill] sm:$0xff]  ;;  %v5362_v26 = vld [vmem:[#allocation27_spill] sm:$0xff] }
 0x464   :  { %v5389_v62 = vld [vmem:[#allocation55_spill] sm:$0xff] }
 0x465   :  { %5359 = vst [vmem:[#allocation87_spill] sm:$0xff] %v3997_v8  ;;  %v938_v2 = vsub.f32 0.0, %v3997_v8  ;;  %v934_v58 = vadd.f32 %v930_v42, %v672_v4  ;;  %v945_v43 = vadd.f32 %v941_v41, %v933_v27  ;;  %v5363_v27 = vld [vmem:[#allocation78_spill] sm:$0xff]  ;;  %v5365_v41 = vmov 2  }
 0x467   :  { %v942_v14 = vmul.f32 2.0, %v938_v2 }
 0x469   :  { %v946_v57 = vadd.f32 %v942_v14, %v934_v58 }
 0x4a9   :  { %v1885_v28 = vpop.permute.xlu1 %1884  ;;  %v1889_v10 = vpop.permute.xlu0 %1888 }
 0x4aa   :  { %v1905_v16 = vadd.f32 %v1885_v28, %v943_v15  ;;  %v1906_v6 = vadd.f32 %v1889_v10, %v944_v34  ;;  %v5364_v34 = vld [vmem:[#allocation79_spill] sm:$0xff] }
 0x4ac   :  { %1914 = vperm.xlu0 %3029, %v1905_v16   ;;  %1917 = vperm.xlu1 %3027, %v1906_v6  }
 0x4ad   :  { %v1896_v21 = vpop.permute.xlu1 %1895 }
 0x4ae   :  { %v1907_v30 = vadd.f32 %v1896_v21, %v945_v43 }
 0x4b0   :  { %1920 = vperm.xlu1 %3027, %v1907_v30  }
 0x4b1   :  { %v1900_v63 = vpop.permute.xlu1 %1899 }
 0x4b2   :  { %v1908_v23 = vadd.f32 %v1900_v63, %v946_v57 }
 0x4b4   :  { %1923 = vperm.xlu0 %3029, %v1908_v23  }
 0x52b   :  { %v1918_v5 = vpop.permute.xlu1 %1917  ;;  %v1915_v55 = vpop.permute.xlu0 %1914 }
 0x52c   :  { %v1932_v33 = vrot.slane %v1918_v5, %v5360_v36  ;;  %v1928_v46 = vrot.slane %v1915_v55, %v5361_v44 }
 0x52e   :  { %v1933_v7 = vsel %vm1642_vm7, %v1932_v33, %v1928_v46  ;;  %v5367_v46 = vld [vmem:[#allocation3_spill] sm:$0xff] }
 0x52f   :  { %v1921_v48 = vpop.permute.xlu1 %1920 }
 0x530   :  { %v1937_v22 = vrot.slane %v1921_v48, %v5361_v44 }
 0x533   :  { %v1924_v51 = vpop.permute.xlu0 %1923 }
 0x534   :  { %v1941_v31 = vrot.slane %v1924_v51, %v5360_v36  ;;  %v5368_v51 = vmov 0.0  }
 0x536   :  { %v1942_v3 = vsel %vm1642_vm7, %v1941_v31, %v1937_v22  ;;  %v5369_v31 = vld [vmem:[#allocation26_spill] sm:$0xff] }
 0x537   :  { %v1943_v52 = vsel %vm1653_vm8, %v1942_v3, %v1933_v7 }
 0x538   :  { %v1945_v49 = vsel %vm1656_vm9, %v1943_v52, inf }
 0x539   :  { %1946 = vmin.xlane.f32.xlu1 %v1945_v49 }
 0x5c6   :  { %v1947_v17 = vpop.xlane.xlu1 %1946 }
 0x5c7   :  { %v1952_v50 = vrot.slane %v1947_v17, %v5362_v26  ;;  %v1956_v15 = vrot.slane %v1947_v17, %v3759_v47 }
 0x5c9   :  { %vm1959_vm2 = vcmp.le.f32.partialorder %v1905_v16, %v1952_v50  ;;  %vm1960_vm6 = vcmp.le.f32.partialorder %v1906_v6, %v1952_v50  ;;  %vm1961_vm10 = vcmp.le.f32.partialorder %v1907_v30, %v1956_v15  ;;  %vm1962_vm11 = vcmp.le.f32.partialorder %v1908_v23, %v1956_v15  ;;  %v4019_v16 = vld [vmem:[%s5017_s2] sm:$0x3]  ;;  %v5371_v50 = vld [vmem:[#allocation33_spill] sm:$0xff] }
 0x5ca   :  { %v1963_v4 = vsel %vm1959_vm2, %v5363_v27, 16.0  ;;  %v1964_v42 = vsel %vm1960_vm6, %v5364_v34, 16.0  ;;  %v1965_v28 = vsel %vm1961_vm10, %v5363_v27, 16.0  ;;  %v1966_v10 = vsel %vm1962_vm11, %v5364_v34, 16.0 }
 0x5cb   :  { %1972 = vperm.xlu0 %3029, %v1963_v4   ;;  %v5366_v6 = vmov 0  }
 0x5cf   :  { %1975 = vperm.xlu0 %3029, %v1964_v42  }
 0x5d3   :  { %1978 = vperm.xlu0 %3029, %v1965_v28   ;;  %v5373_v28 = vld [vmem:[#allocation28_spill] sm:$0xff] }
 0x5d7   :  { %1981 = vperm.xlu0 %3029, %v1966_v10  }
 0x5db   :  { %3030 = vset.pattern.permute.xlu0 %v5365_v41 }
 0x5dc   :  { %948 = vperm.xlu0 %3030, %v4019_v16  }
 0x5e0   :  { %3031 = vset.pattern.permute.xlu0 %v5366_v6 }
 0x64a   :  { %v1973_v2 = vpop.permute.xlu0 %1972 }
 0x64b   :  { %v1986_v14 = vrot.slane %v1973_v2, %v5361_v44  ;;  %v5374_v2 = vld [vmem:[#allocation34_spill] sm:$0xff] }
 0x64e   :  { %v1976_v58 = vpop.permute.xlu0 %1975 }
 0x64f   :  { %v1990_v21 = vrot.slane %v1976_v58, %v5360_v36 }
 0x651   :  { %v1991_v23 = vsel %vm1642_vm7, %v1990_v21, %v1986_v14  ;;  %v5375_v21 = vld [vmem:[#allocation37_spill] sm:$0xff] }
 0x652   :  { %v1979_v43 = vpop.permute.xlu0 %1978 }
 0x653   :  { %v1995_v57 = vrot.slane %v1979_v43, %v5361_v44 }
 0x656   :  { %v1982_v30 = vpop.permute.xlu0 %1981 }
 0x657   :  { %v1999_v63 = vrot.slane %v1982_v30, %v5360_v36 }
 0x659   :  { %v2000_v5 = vsel %vm1642_vm7, %v1999_v63, %v1995_v57  ;;  %v5376_v63 = vld [vmem:[#allocation75_spill] sm:$0xff] }
 0x65a   :  { %v2001_v55 = vsel %vm1653_vm8, %v2000_v5, %v1991_v23 }
 0x65b   :  { %v949_v48 = vpop.permute.xlu0 %948  ;;  %v2003_v33 = vsel %vm1656_vm9, %v2001_v55, inf  ;;  %v5378_v55 = vld [vmem:[#allocation82_spill] sm:$0xff] }
 0x65c   :  { %vm950_vm12 = vcmp.eq.s32.totalorder %v5367_v46, %v949_v48  ;;  %2004 = vmin.xlane.f32.xlu0 %v2003_v33 }
 0x65d   :  { %v2970_v22 = vsel %vm950_vm12, 1.0, %v5368_v51 }
 0x65e   :  { %v960_v7 = vrot.slane %v2970_v22, %v5369_v31 }
 0x660   :  { %v961_v3 = vcombine.high %v960_v7, %v960_v7  ;;  %v968_v52 = vrot.slane %v960_v7, %v5369_v31  ;;  %v5380_v7 = vld [vmem:[#allocation24_spill] sm:$0xff] }
 0x662   :  { %v975_v49 = vrot.slane %v961_v3, %v5369_v31  ;;  %v4037_v17 = vrot.slane %v968_v52, %v5362_v26  ;;  %v4067_v3 = vsub.s32 2, %v5380_v7  ;;  %v5381_v52 = vld [vmem:[#allocation41_spill] sm:$0xff] }
 0x664   :  { %5370 = vst [vmem:[#allocation77_spill] sm:$0xff] %v4037_v17  ;;  %v986_v4 = vmul.f32 %v4037_v17, %v5371_v50  ;;  %v4042_v15 = vrot.slane %v975_v49, %v5362_v26  ;;  %v987_v10 = vmul.f32 %v4037_v17, %v5373_v28  ;;  %v1159_v49 = vrot.slane %v5381_v52, %v4067_v3 }
 0x665   :  { %v4088_v18 = vrot.slane %v5389_v62, %v4067_v3 }
 0x666   :  { %5372 = vst [vmem:[#allocation76_spill] sm:$0xff] %v4042_v15  ;;  %v990_v42 = vsel %vm28_vm0, %v986_v4, 0.0  ;;  %v993_v41 = vsel %vm28_vm0, %v987_v10, 0.0  ;;  %v988_v58 = vmul.f32 %v4042_v15, %v5374_v2  ;;  %v989_v30 = vmul.f32 %v4042_v15, %v5375_v21  ;;  %v5382_v4 = vld [vmem:[#allocation47_spill] sm:$0xff]  ;;  %v5383_v10 = vld [vmem:[#allocation38_spill] sm:$0xff]  ;;  %v5392_v15 = vld [vmem:[#allocation64_spill] sm:$0xff] }
 0x667   :  { %991 = vadd.xlane.f32.xlu1 %v990_v42  ;;  %v1145_v42 = vrot.slane %v5382_v4, %v4067_v3  ;;  %v4097_v17 = vrot.slane %v5392_v15, %v4067_v3  ;;  %v1168_v15 = vmax.f32 %v3590_v11, %v4088_v18 }
 0x668   :  { %v996_v43 = vsel %vm28_vm0, %v988_v58, 0.0  ;;  %v999_v14 = vsel %vm28_vm0, %v989_v30, 0.0  ;;  %v5384_v58 = vld [vmem:[#allocation36_spill] sm:$0xff]  ;;  %v1167_v30 = vmax.f32 %v5330_v38, %v1159_v49 }
 0x669   :  { %v1152_v35 = vmin.f32 %v5388_v24, %v1145_v42  ;;  %v1224_v52 = vmax.f32 %v5388_v24, %v1145_v42 }
 0x66b   :  { %994 = vadd.xlane.f32.xlu1 %v993_v41  ;;  %v1123_v41 = vrot.slane %v5383_v10, %v4067_v3 }
 0x66d   :  { %v1131_v8 = vmax.f32 %v5333_v20, %v1123_v41  ;;  %v1130_v1 = vmax.f32 %v5390_v13, %v1123_v41 }
 0x66f   :  { %997 = vadd.xlane.f32.xlu1 %v996_v43  ;;  %v1109_v43 = vrot.slane %v5384_v58, %v4067_v3 }
 0x671   :  { %v1116_v10 = vmin.f32 %v3548_v19, %v1109_v43  ;;  %v1212_v6 = vmax.f32 %v3548_v19, %v1109_v43 }
 0x673   :  { %1000 = vadd.xlane.f32.xlu1 %v999_v14  ;;  %v5385_v14 = vld [vmem:[#allocation40_spill] sm:$0xff]  ;;  %v1134_v21 = vsub.f32 %v1116_v10, %v1130_v1  ;;  %v5394_v10 = vld [vmem:[#allocation69_spill] sm:$0xff] }
 0x674   :  { %v1189_v28 = vrot.slane %v5394_v10, %v4067_v3 }
 0x6e9   :  { %v2005_v57 = vpop.xlane.xlu0 %2004 }
 0x6ea   :  { %vm2006_vm13 = vcmp.eq.f32.partialorder %v5376_v63, %v2005_v57  ;;  %v4080_v57 = vrot.slane %v5385_v14, %v4067_v3  ;;  %v1117_v14 = vmin.f32 %v5336_v40, %v1109_v43 }
 0x6eb   :  { %v4056_v23 = vsel %vm2006_vm13, 1.0, %v5368_v51  ;;  %v1138_v51 = vmax.f32 %v1134_v21, 0.0 }
 0x6ec   :  { %5377 = vst [vmem:[#allocation27_spill] sm:$0xff] %v4056_v23  ;;  %v2009_v5 = vmul.f32 1e+09, %v4056_v23  ;;  %v4093_v23 = vrot.slane %v5391_v32, %v4067_v3  ;;  %v1154_v4 = vmin.f32 %v3575_v45, %v4080_v57  ;;  %v5393_v32 = vld [vmem:[#allocation53_spill] sm:$0xff]  ;;  %v1135_v63 = vsub.f32 %v1117_v14, %v1131_v8 }
 0x6ed   :  { %v1155_v8 = vmin.f32 %v3560_v37, %v4080_v57  ;;  %v1229_v14 = vmin.f32 %v5330_v38, %v1159_v49 }
 0x6ee   :  { %v4060_v48 = vadd.f32 %v2009_v5, %v5378_v55  ;;  %v5386_v5 = vld [vmem:[#allocation61_spill] sm:$0xff]  ;;  %v1139_v50 = vmax.f32 %v1135_v63, 0.0  ;;  %v1133_v31 = vmax.f32 %v3542_v0, %v4093_v23 }
 0x6ef   :  { %v1166_v55 = vmax.f32 %v5386_v5, %v1159_v49  ;;  %v1228_v2 = vmin.f32 %v5386_v5, %v1159_v49  ;;  %v1226_v5 = vmax.f32 %v3575_v45, %v4080_v57 }
 0x6f0   :  { %5379 = vst [vmem:[#allocation78_spill] sm:$0xff] %v4060_v48  ;;  %v2160_v33 = vrot.slane %v4060_v48, %v5362_v26  ;;  %v2171_v22 = vrot.slane %v4060_v48, %v3759_v47  ;;  %v1185_v48 = vrot.slane %v5393_v32, %v4067_v3 }
 0x6f1   :  { %v1170_v62 = vsub.f32 %v1152_v35, %v1166_v55  ;;  %v1118_v35 = vmin.f32 %v3569_v59, %v4097_v17  ;;  %v1217_v55 = vmin.f32 %v5333_v20, %v1123_v41  ;;  %v5395_v20 = vld [vmem:[#allocation70_spill] sm:$0xff] }
 0x6f2   :  { %2166 = vbcast.lane.b32.xlu0 %v2160_v33, 264  ;;  %2162 = vbcast.lane.b32.xlu1 %v2160_v33, 256  ;;  %v5387_v33 = vld [vmem:[#allocation52_spill] sm:$0xff]  ;;  %v1193_v1 = vadd.f32 %v1185_v48, %v5338_v9 }
 0x6f3   :  { %v1225_v7 = vmax.f32 %v5387_v33, %v1145_v42  ;;  %v1174_v24 = vmax.f32 %v1170_v62, 0.0  ;;  %v1213_v62 = vmax.f32 %v5336_v40, %v1109_v43 }
 0x6f5   :  { %v4133_v9 = vmul.f32 %v1174_v24, %v1138_v51  ;;  %v1230_v24 = vmin.f32 %v3590_v11, %v4088_v18  ;;  %v1218_v51 = vmin.f32 %v3551_v54, %v4093_v23 }
 0x6f6   :  { %2173 = vbcast.lane.b32.xlu1 %v2171_v22, 256 }
 0x6fa   :  { %2177 = vbcast.lane.b32.xlu1 %v2171_v22, 264  ;;  %v1153_v22 = vmin.f32 %v5387_v33, %v1145_v42  ;;  %v1119_v42 = vmin.f32 %v3545_v39, %v4097_v17  ;;  %v1172_v33 = vsub.f32 %v1154_v4, %v1168_v15  ;;  %v1216_v15 = vmin.f32 %v5390_v13, %v1123_v41 }
 0x6fb   :  { %v1233_v4 = vsub.f32 %v1225_v7, %v1229_v14  ;;  %v1214_v41 = vmax.f32 %v3569_v59, %v4097_v17 }
 0x6fc   :  { %v1171_v58 = vsub.f32 %v1153_v22, %v1167_v30  ;;  %v1169_v30 = vmax.f32 %v3557_v29, %v4088_v18  ;;  %v1132_v22 = vmax.f32 %v3551_v54, %v4093_v23  ;;  %v1176_v10 = vmax.f32 %v1172_v33, 0.0 }
 0x6fd   :  { %v1220_v7 = vsub.f32 %v1212_v6, %v1216_v15  ;;  %v1215_v15 = vmax.f32 %v3545_v39, %v4097_v17 }
 0x6fe   :  { %v1175_v32 = vmax.f32 %v1171_v58, 0.0  ;;  %v1192_v58 = vadd.f32 %v1185_v48, %v5395_v20  ;;  %v1136_v46 = vsub.f32 %v1118_v35, %v1132_v22  ;;  %v1173_v63 = vsub.f32 %v1155_v8, %v1169_v30 }
 0x6ff   :  { %v1194_v48 = vadd.f32 %v1189_v28, %v3642_v56  ;;  %v1232_v22 = vsub.f32 %v1224_v52, %v1228_v2  ;;  %v1221_v35 = vsub.f32 %v1213_v62, %v1217_v55  ;;  %v1227_v52 = vmax.f32 %v3560_v37, %v4080_v57  ;;  %v5396_v55 = vld [vmem:[#allocation72_spill] sm:$0xff]  ;;  %v5411_v56 = vld [vmem:[#allocation18_spill] sm:$0xff] }
 0x700   :  { %v4131_v49 = vmul.f32 %v1175_v32, %v1139_v50  ;;  %v4142_v43 = vsub.f32 %v1192_v58, %v4133_v9  ;;  %v1140_v32 = vmax.f32 %v1136_v46, 0.0  ;;  %v1137_v50 = vsub.f32 %v1119_v42, %v1133_v31  ;;  %v5397_v58 = vld [vmem:[#allocation56_spill] sm:$0xff] }
 0x701   :  { %v4150_v33 = vmul.f32 %v1233_v4, %v1221_v35  ;;  %v1177_v2 = vmax.f32 %v1173_v63, 0.0  ;;  %v4157_v31 = vmul.f32 %v1232_v22, %v1220_v7  ;;  %v1234_v42 = vsub.f32 %v1226_v5, %v1230_v24  ;;  %v5398_v63 = vld [vmem:[#allocation42_spill] sm:$0xff]  ;;  %v5400_v24 = vld [vmem:[#allocation43_spill] sm:$0xff]  ;;  %v5401_v7 = vld [vmem:[#allocation44_spill] sm:$0xff] }
 0x702   :  { %v4139_v21 = vsub.f32 %v1193_v1, %v4131_v49  ;;  %v4152_v30 = vmul.f32 %v1176_v10, %v1140_v32  ;;  %v1195_v8 = vadd.f32 %v1189_v28, %v5396_v55  ;;  %v1200_v6 = vadd.f32 1e-07, %v4142_v43 }
 0x703   :  { %v1141_v1 = vmax.f32 %v1137_v50, 0.0  ;;  %v1231_v10 = vmin.f32 %v3557_v29, %v4088_v18  ;;  %v1043_v62 = vrot.slane %v5397_v58, %v4067_v3  ;;  %v1222_v57 = vsub.f32 %v1214_v41, %v1218_v51 }
 0x704   :  { %v1201_v46 = vadd.f32 1e-07, %v4139_v21  ;;  %v4162_v14 = vsub.f32 %v1194_v48, %v4152_v30  ;;  %v1219_v5 = vmin.f32 %v3542_v0, %v4093_v23  ;;  %v1245_v28 = vadd.f32 1e-07, %v4150_v33  ;;  %v5399_v23 = vld [vmem:[#allocation16_spill] sm:$0xff] }
 0x705   :  { %v4173_v4 = vmul.f32 %v1177_v2, %v1141_v1  ;;  %v1025_v48 = vrot.slane %v5398_v63, %v4067_v3  ;;  %v1244_v18 = vadd.f32 1e-07, %v4157_v31  ;;  %v4178_v22 = vmul.f32 %v1234_v42, %v1222_v57  ;;  %v5402_v2 = vld [vmem:[#allocation45_spill] sm:$0xff]  ;;  %v5404_v57 = vld [vmem:[#allocation20_spill] sm:$0xff] }
 0x706   :  { %3082 = vrcp.f32 %v1201_v46  ;;  %v1202_v35 = vadd.f32 1e-07, %v4162_v14  ;;  %v1235_v32 = vsub.f32 %v1227_v52, %v1231_v10  ;;  %v1050_v50 = vsub.f32 %v5399_v23, %v1043_v62 }
 0x707   :  { %3084 = vrcp.f32 %v1200_v6  ;;  %v4182_v17 = vsub.f32 %v1195_v8, %v4173_v4  ;;  %v1029_v51 = vrot.slane %v5400_v24, %v4067_v3  ;;  %v1047_v41 = vrot.slane %v5401_v7, %v4067_v3  ;;  %v5403_v6 = vld [vmem:[#allocation14_spill] sm:$0xff] }
 0x708   :  { %v1065_v46 = vrot.slane %v5402_v2, %v4067_v3  ;;  %3086 = vrcp.f32 %v1245_v28  ;;  %v1223_v42 = vsub.f32 %v1215_v15, %v1219_v5  ;;  %v1032_v1 = vsub.f32 %v5403_v6, %v1025_v48  ;;  %v5405_v8 = vld [vmem:[#allocation46_spill] sm:$0xff]  ;;  %v5407_v28 = vld [vmem:[#allocation57_spill] sm:$0xff]  ;;  %v5408_v5 = vld [vmem:[#allocation15_spill] sm:$0xff] }
 0x709   :  { %v1033_v63 = vsub.f32 %v5404_v57, %v1025_v48  ;;  %3088 = vrcp.f32 %v1244_v18  ;;  %v1246_v52 = vadd.f32 1e-07, %v4178_v22  ;;  %v1087_v10 = vrot.slane %v5405_v8, %v4067_v3  ;;  %v5406_v7 = vld [vmem:[#allocation22_spill] sm:$0xff]  ;;  %v5409_v48 = vld [vmem:[#allocation17_spill] sm:$0xff]  ;;  %v5410_v57 = vld [vmem:[#allocation8_spill] sm:$0xff]  ;;  %v4206_v8 = vpop.xlane.xlu1 %991 }
 0x70a   :  { %3090 = vrcp.f32 %v1202_v35  ;;  %v1203_v24 = vadd.f32 1e-07, %v4182_v17  ;;  %v4197_v23 = vmul.f32 %v1235_v32, %v1223_v42  ;;  %v1051_v58 = vsub.f32 %v5406_v7, %v1043_v62  ;;  %v5412_v32 = vld [vmem:[#allocation50_spill] sm:$0xff]  ;;  %v5413_v62 = vld [vmem:[#allocation11_spill] sm:$0xff] }
 0x70b   :  { %v1069_v15 = vrot.slane %v5407_v28, %v4067_v3  ;;  %v1034_v6 = vsub.f32 %v5408_v5, %v1029_v51  ;;  %v1054_v2 = vand.u32 2147483647, %v1050_v50  ;;  %v1052_v18 = vsub.f32 %v5409_v48, %v1047_v41  ;;  %v5414_v28 = vld [vmem:[#allocation12_spill] sm:$0xff] }
 0x70c   :  { %v1072_v55 = vsub.f32 %v5410_v57, %v1065_v46  ;;  %v1073_v0 = vsub.f32 %v5411_v56, %v1065_v46  ;;  %v1036_v35 = vand.u32 2147483647, %v1032_v1  ;;  %v1037_v20 = vand.u32 2147483647, %v1033_v63  ;;  %v5415_v57 = vld [vmem:[#allocation9_spill] sm:$0xff] }
 0x70d   :  { %v1091_v42 = vrot.slane %v5412_v32, %v4067_v3  ;;  %3092 = vrcp.f32 %v1246_v52  ;;  %v1094_v7 = vsub.f32 %v5413_v62, %v1087_v10  ;;  %v1095_v37 = vsub.f32 %v5414_v28, %v1087_v10  ;;  %v995_v11 = vpop.xlane.xlu1 %994 }
 0x70e   :  { %3094 = vrcp.f32 %v1203_v24  ;;  %v1247_v50 = vadd.f32 1e-07, %v4197_v23  ;;  %v1055_v5 = vand.u32 2147483647, %v1051_v58  ;;  %v1074_v29 = vsub.f32 %v5415_v57, %v1069_v15 }
 0x70f   :  { %v1035_v46 = vsub.f32 %v5295_v60, %v1029_v51  ;;  %v1038_v56 = vand.u32 2147483647, %v1034_v6  ;;  %v1053_v63 = vsub.f32 %v5351_v61, %v1047_v41  ;;  %v1056_v39 = vand.u32 2147483647, %v1052_v18 }
 0x710   :  { %v3083_v48 = vpop.eup %3082  ;;  %v1076_v3 = vand.u32 2147483647, %v1072_v55  ;;  %v1077_v52 = vand.u32 2147483647, %v1073_v0  ;;  %v1058_v32 = vadd.f32 %v1054_v2, %v1036_v35  ;;  %v1059_v62 = vadd.f32 %v1055_v5, %v1037_v20 }
 0x711   :  { %v3085_v1 = vpop.eup %3084  ;;  %v1241_v24 = vsub.f32 %v4150_v33, %v4139_v21  ;;  %v1240_v10 = vsub.f32 %v4157_v31, %v4142_v43  ;;  %v1098_v28 = vand.u32 2147483647, %v1094_v7  ;;  %v1099_v57 = vand.u32 2147483647, %v1095_v37 }
 0x712   :  { %v3087_v58 = vpop.eup %3086  ;;  %v1096_v51 = vsub.f32 %v5296_v25, %v1091_v42  ;;  %3096 = vrcp.f32 %v1247_v50  ;;  %v1075_v41 = vsub.f32 %v5298_v12, %v1069_v15  ;;  %v1078_v55 = vand.u32 2147483647, %v1074_v29 }
 0x713   :  { %v3089_v6 = vpop.eup %3088  ;;  %v1207_v0 = vmul.f32 %v3083_v48, %v4131_v49  ;;  %v1205_v20 = vmul.f32 %v3085_v1, %v4133_v9  ;;  %v1057_v21 = vand.u32 2147483647, %v1053_v63  ;;  %v1080_v33 = vadd.f32 %v1076_v3, %v1058_v32 }
 0x714   :  { %v3091_v2 = vpop.eup %3090  ;;  %v1081_v5 = vadd.f32 %v1077_v52, %v1059_v62  ;;  %v1060_v43 = vadd.f32 %v1056_v39, %v1038_v56  ;;  %v1039_v31 = vand.u32 2147483647, %v1035_v46  ;;  %v1251_v7 = vmul.f32 %v3087_v58, %v1241_v24  ;;  %v998_v46 = vpop.xlane.xlu1 %997 }
 0x715   :  { %v1249_v37 = vmul.f32 %v3089_v6, %v1240_v10  ;;  %v1242_v18 = vsub.f32 %v4178_v22, %v4162_v14  ;;  %v4226_v35 = vadd.f32 %v1098_v28, %v1080_v33  ;;  %v1100_v29 = vand.u32 2147483647, %v1096_v51 }
 0x716   :  { %v4228_v50 = vadd.f32 %v1099_v57, %v1081_v5  ;;  %v1097_v49 = vsub.f32 %v5300_v53, %v1091_v42  ;;  %v4231_v9 = vsub.f32 %v1207_v0, %v1251_v7  ;;  %v1209_v39 = vmul.f32 %v3091_v2, %v4152_v30 }
 0x717   :  { %5416 = vst [vmem:[#allocation79_spill] sm:$0xff] %v4226_v35  ;;  %v3093_v15 = vpop.eup %3092  ;;  %v4233_v48 = vsub.f32 %v1205_v20, %v1249_v37  ;;  %v1079_v32 = vand.u32 2147483647, %v1075_v41  ;;  %v1082_v62 = vadd.f32 %v1078_v55, %v1060_v43  ;;  %v1061_v1 = vadd.f32 %v1057_v21, %v1039_v31 }
 0x718   :  { %5417 = vst [vmem:[#allocation82_spill] sm:$0xff] %v4228_v50  ;;  %5418 = vst [vmem:[#allocation58_spill] sm:$0xff] %v4231_v9  ;;  %v3095_v56 = vpop.eup %3094  ;;  %v1002_v14 = vsub.f32 0.0, %v4206_v8  ;;  %v1003_v22 = vsub.f32 0.0, %v995_v11  ;;  %v1253_v57 = vmul.f32 %v3093_v15, %v1242_v18  ;;  %v1243_v28 = vsub.f32 %v4197_v23, %v4182_v17  ;;  %v1001_v0 = vpop.xlane.xlu1 %1000 }
 0x719   :  { %5419 = vst [vmem:[#allocation88_spill] sm:$0xff] %v4233_v48  ;;  %v1260_v42 = vmul.f32 5.0, %v4226_v35  ;;  %v1261_v63 = vmul.f32 5.0, %v4228_v50  ;;  %v4241_v3 = vadd.f32 %v1100_v29, %v1082_v62  ;;  %v1101_v52 = vand.u32 2147483647, %v1097_v49  ;;  %v5456_v50 = vld [vmem:[#allocation70_spill] sm:$0xff] }
 0x71a   :  { %v1269_v30 = vsub.f32 0.0, %v4231_v9  ;;  %v1268_v24 = vsub.f32 0.0, %v4233_v48  ;;  %v4245_v10 = vsub.f32 %v1209_v39, %v1253_v57  ;;  %v1211_v8 = vmul.f32 %v3095_v56, %v4173_v4 }
 0x71b   :  { %5420 = vst [vmem:[#allocation89_spill] sm:$0xff] %v4241_v3  ;;  %v1083_v58 = vadd.f32 %v1079_v32, %v1061_v1  ;;  %v1264_v51 = vadd.f32 %v1260_v42, %v1002_v14  ;;  %v1265_v6 = vadd.f32 %v1261_v63, %v1003_v22  ;;  %v1004_v17 = vsub.f32 0.0, %v998_v46 }
 0x71c   :  { %5421 = vst [vmem:[#allocation90_spill] sm:$0xff] %v4245_v10  ;;  %v3097_v11 = vpop.eup %3096  ;;  %v1262_v41 = vmul.f32 5.0, %v4241_v3  ;;  %v1273_v20 = vmul.f32 2.0, %v1269_v30  ;;  %v1272_v2 = vmul.f32 2.0, %v1268_v24  ;;  %v1270_v21 = vsub.f32 0.0, %v4245_v10  ;;  %v5454_v10 = vld [vmem:[#allocation54_spill] sm:$0xff] }
 0x71d   :  { %v1255_v23 = vmul.f32 %v3097_v11, %v1243_v28  ;;  %v4249_v55 = vadd.f32 %v1101_v52, %v1083_v58  ;;  %v1005_v43 = vsub.f32 0.0, %v1001_v0 }
 0x71e   :  { %v1266_v5 = vadd.f32 %v1262_v41, %v1004_v17  ;;  %v1277_v4 = vadd.f32 %v1273_v20, %v1265_v6  ;;  %v1276_v31 = vadd.f32 %v1272_v2, %v1264_v51  ;;  %v1274_v15 = vmul.f32 2.0, %v1270_v21 }
 0x71f   :  { %5422 = vst [vmem:[#allocation91_spill] sm:$0xff] %v4249_v55  ;;  %v4252_v33 = vsub.f32 %v1211_v8, %v1255_v23  ;;  %v1263_v7 = vmul.f32 5.0, %v4249_v55 }
 0x720   :  { %v1278_v32 = vadd.f32 %v1274_v15, %v1266_v5 }
 0x721   :  { %5423 = vst [vmem:[#allocation92_spill] sm:$0xff] %v4252_v33  ;;  %v1271_v39 = vsub.f32 0.0, %v4252_v33  ;;  %v1267_v56 = vadd.f32 %v1263_v7, %v1005_v43  ;;  %v5424_v43 = vmov 3  }
 0x723   :  { %v1275_v1 = vmul.f32 2.0, %v1271_v39 }
 0x725   :  { %v1279_v14 = vadd.f32 %v1275_v1, %v1267_v56  ;;  %v5426_v1 = vld [vmem:[#allocation3_spill] sm:$0xff] }
 0x764   :  { %v2167_v37 = vpop.permute.xlu0 %2166  ;;  %v2163_v18 = vpop.permute.xlu1 %2162 }
 0x765   :  { %v2184_v29 = vadd.f32 %v2167_v37, %v1277_v4  ;;  %v2183_v49 = vadd.f32 %v2163_v18, %v1276_v31  ;;  %v5425_v4 = vmov 0  }
 0x767   :  { %2195 = vperm.xlu0 %3031, %v2184_v29   ;;  %2192 = vperm.xlu1 %3027, %v2183_v49  }
 0x768   :  { %v2174_v62 = vpop.permute.xlu1 %2173 }
 0x769   :  { %v2185_v46 = vadd.f32 %v2174_v62, %v1278_v32 }
 0x76b   :  { %2198 = vperm.xlu1 %3027, %v2185_v46  }
 0x76c   :  { %v2178_v22 = vpop.permute.xlu1 %2177 }
 0x76d   :  { %v2186_v57 = vadd.f32 %v2178_v22, %v1279_v14  ;;  %v5427_v14 = vmov 0.0  }
 0x76f   :  { %2201 = vperm.xlu1 %3027, %v2186_v57  }
 0x7e6   :  { %v2193_v28 = vpop.permute.xlu1 %2192  ;;  %v2196_v42 = vpop.permute.xlu0 %2195 }
 0x7e7   :  { %v2210_v52 = vrot.slane %v2196_v42, %v5360_v36  ;;  %v2206_v30 = vrot.slane %v2193_v28, %v5361_v44 }
 0x7e9   :  { %v2211_v58 = vsel %vm1642_vm7, %v2210_v52, %v2206_v30 }
 0x7ea   :  { %v2199_v63 = vpop.permute.xlu1 %2198 }
 0x7eb   :  { %v2215_v8 = vrot.slane %v2199_v63, %v5361_v44 }
 0x7ee   :  { %v2202_v24 = vpop.permute.xlu1 %2201 }
 0x7ef   :  { %v2219_v11 = vrot.slane %v2202_v24, %v5360_v36  ;;  %v5429_v24 = vld [vmem:[#allocation33_spill] sm:$0xff] }
 0x7f1   :  { %v2220_v51 = vsel %vm1642_vm7, %v2219_v11, %v2215_v8 }
 0x7f2   :  { %v2221_v6 = vsel %vm1653_vm8, %v2220_v51, %v2211_v58  ;;  %v5430_v51 = vld [vmem:[#allocation28_spill] sm:$0xff] }
 0x7f3   :  { %v2223_v17 = vsel %vm1656_vm9, %v2221_v6, inf }
 0x7f4   :  { %2224 = vmin.xlane.f32.xlu0 %v2223_v17 }
 0x881   :  { %v2225_v23 = vpop.xlane.xlu0 %2224 }
 0x882   :  { %v2230_v41 = vrot.slane %v2225_v23, %v5362_v26  ;;  %v2234_v20 = vrot.slane %v2225_v23, %v3759_v47  ;;  %v5431_v23 = vld [vmem:[#allocation34_spill] sm:$0xff] }
 0x884   :  { %vm2237_vm14 = vcmp.le.f32.partialorder %v2183_v49, %v2230_v41  ;;  %vm2238_vm15 = vcmp.le.f32.partialorder %v2184_v29, %v2230_v41  ;;  %vm2239_vm2 = vcmp.le.f32.partialorder %v2185_v46, %v2234_v20  ;;  %vm2240_vm6 = vcmp.le.f32.partialorder %v2186_v57, %v2234_v20  ;;  %v5428_v57 = vld [vmem:[#allocation26_spill] sm:$0xff]  ;;  %v5432_v20 = vld [vmem:[#allocation37_spill] sm:$0xff] }
 0x885   :  { %v2241_v0 = vsel %vm2237_vm14, %v5363_v27, 16.0  ;;  %v2242_v2 = vsel %vm2238_vm15, %v5364_v34, 16.0  ;;  %v2243_v21 = vsel %vm2239_vm2, %v5363_v27, 16.0  ;;  %v2244_v5 = vsel %vm2240_vm6, %v5364_v34, 16.0 }
 0x886   :  { %2250 = vperm.xlu1 %3027, %v2241_v0  }
 0x88a   :  { %2253 = vperm.xlu1 %3027, %v2242_v2  }
 0x88e   :  { %2256 = vperm.xlu1 %3027, %v2243_v21  }
 0x892   :  { %2259 = vperm.xlu1 %3027, %v2244_v5  }
 0x896   :  { %3032 = vset.pattern.permute.xlu1 %v5424_v43  ;;  %v5433_v43 = vld [vmem:[#allocation75_spill] sm:$0xff] }
 0x897   :  { %1281 = vperm.xlu1 %3032, %v4019_v16  }
 0x89b   :  { %3033 = vset.pattern.permute.xlu1 %v5425_v4 }
 0x905   :  { %v2251_v31 = vpop.permute.xlu1 %2250 }
 0x906   :  { %v2264_v49 = vrot.slane %v2251_v31, %v5361_v44 }
 0x909   :  { %v2254_v7 = vpop.permute.xlu1 %2253 }
 0x90a   :  { %v2268_v18 = vrot.slane %v2254_v7, %v5360_v36  ;;  %v5435_v7 = vld [vmem:[#allocation78_spill] sm:$0xff] }
 0x90c   :  { %v2269_v56 = vsel %vm1642_vm7, %v2268_v18, %v2264_v49  ;;  %v5436_v49 = vld [vmem:[#allocation24_spill] sm:$0xff] }
 0x90d   :  { %v2257_v37 = vpop.permute.xlu1 %2256 }
 0x90e   :  { %v2273_v15 = vrot.slane %v2257_v37, %v5361_v44 }
 0x911   :  { %v2260_v29 = vpop.permute.xlu1 %2259 }
 0x912   :  { %v2277_v39 = vrot.slane %v2260_v29, %v5360_v36 }
 0x914   :  { %v2278_v32 = vsel %vm1642_vm7, %v2277_v39, %v2273_v15  ;;  %v4313_v15 = vsub.s32 3, %v5436_v49  ;;  %v5437_v39 = vld [vmem:[#allocation41_spill] sm:$0xff] }
 0x915   :  { %v2279_v16 = vsel %vm1653_vm8, %v2278_v32, %v2269_v56  ;;  %v5438_v32 = vld [vmem:[#allocation47_spill] sm:$0xff] }
 0x916   :  { %v1282_v62 = vpop.permute.xlu1 %1281  ;;  %v2281_v46 = vsel %vm1656_vm9, %v2279_v16, inf  ;;  %v1492_v56 = vrot.slane %v5437_v39, %v4313_v15  ;;  %v1478_v16 = vrot.slane %v5438_v32, %v4313_v15 }
 0x917   :  { %vm1283_vm10 = vcmp.eq.s32.totalorder %v5426_v1, %v1282_v62  ;;  %2282 = vmin.xlane.f32.xlu1 %v2281_v46  ;;  %v5439_v62 = vld [vmem:[#allocation38_spill] sm:$0xff] }
 0x918   :  { %v2971_v22 = vsel %vm1283_vm10, 1.0, %v5427_v14  ;;  %v1456_v46 = vrot.slane %v5439_v62, %v4313_v15  ;;  %v5449_v62 = vld [vmem:[#allocation53_spill] sm:$0xff]  ;;  %vm2740_vm10 = vcmp.eq.s32.totalorder %v5426_v1, 7 }
 0x919   :  { %v1293_v28 = vrot.slane %v2971_v22, %v5428_v57  ;;  %v5440_v22 = vld [vmem:[#allocation36_spill] sm:$0xff] }
 0x91b   :  { %v1294_v42 = vcombine.high %v1293_v28, %v1293_v28  ;;  %v1301_v63 = vrot.slane %v1293_v28, %v5428_v57  ;;  %v1500_v28 = vmax.f32 %v5330_v38, %v1492_v56 }
 0x91d   :  { %v1308_v52 = vrot.slane %v1294_v42, %v5428_v57  ;;  %v4287_v30 = vrot.slane %v1301_v63, %v5362_v26  ;;  %v1442_v57 = vrot.slane %v5440_v22, %v4313_v15  ;;  %v5441_v42 = vld [vmem:[#allocation40_spill] sm:$0xff]  ;;  %v1518_v22 = vrot.slane %v5449_v62, %v4313_v15 }
 0x91e   :  { %v4326_v63 = vrot.slane %v5441_v42, %v4313_v15 }
 0x91f   :  { %v1319_v8 = vmul.f32 %v4287_v30, %v5429_v24  ;;  %v4292_v11 = vrot.slane %v1308_v52, %v5362_v26  ;;  %v1320_v6 = vmul.f32 %v4287_v30, %v5430_v51  ;;  %v5442_v52 = vld [vmem:[#allocation61_spill] sm:$0xff]  ;;  %v1526_v55 = vadd.f32 %v1518_v22, %v5454_v10 }
 0x920   :  { %v1499_v24 = vmax.f32 %v5442_v52, %v1492_v56  ;;  %v5444_v51 = vld [vmem:[#allocation49_spill] sm:$0xff]  ;;  %v1487_v49 = vmin.f32 %v3575_v45, %v4326_v63  ;;  %v1561_v9 = vmin.f32 %v5442_v52, %v1492_v56  ;;  %v1525_v3 = vadd.f32 %v1518_v22, %v5456_v50  ;;  %v5458_v22 = vld [vmem:[#allocation71_spill] sm:$0xff] }
 0x921   :  { %v1323_v58 = vsel %vm28_vm0, %v1319_v8, 0.0  ;;  %v1326_v17 = vsel %vm28_vm0, %v1320_v6, 0.0  ;;  %v1321_v41 = vmul.f32 %v4292_v11, %v5431_v23  ;;  %v1322_v2 = vmul.f32 %v4292_v11, %v5432_v20  ;;  %v5443_v8 = vld [vmem:[#allocation55_spill] sm:$0xff] }
 0x922   :  { %1324 = vadd.xlane.f32.xlu0 %v1323_v58  ;;  %v4331_v58 = vrot.slane %v5443_v8, %v4313_v15  ;;  %v1464_v6 = vmax.f32 %v5444_v51, %v1456_v46  ;;  %v5447_v20 = vld [vmem:[#allocation39_spill] sm:$0xff]  ;;  %v1559_v50 = vmax.f32 %v3575_v45, %v4326_v63 }
 0x923   :  { %v1329_v0 = vsel %vm28_vm0, %v1321_v41, 0.0  ;;  %v1332_v21 = vsel %vm28_vm0, %v1322_v2, 0.0  ;;  %v5446_v41 = vld [vmem:[#allocation64_spill] sm:$0xff]  ;;  %v4341_v2 = vrot.slane %v5447_v20, %v4313_v15  ;;  %v1550_v20 = vmin.f32 %v5444_v51, %v1456_v46  ;;  %v5455_v51 = vld [vmem:[#allocation69_spill] sm:$0xff] }
 0x926   :  { %1327 = vadd.xlane.f32.xlu0 %v1326_v17  ;;  %v5445_v17 = vld [vmem:[#allocation52_spill] sm:$0xff] }
 0x927   :  { %v1486_v23 = vmin.f32 %v5445_v17, %v1478_v16  ;;  %v1558_v32 = vmax.f32 %v5445_v17, %v1478_v16  ;;  %v5452_v17 = vld [vmem:[#allocation62_spill] sm:$0xff] }
 0x928   :  { %v1502_v62 = vmax.f32 %v5452_v17, %v4331_v58 }
 0x92a   :  { %1330 = vadd.xlane.f32.xlu0 %v1329_v0  ;;  %v4337_v0 = vrot.slane %v5446_v41, %v4313_v15 }
 0x92c   :  { %v1451_v41 = vmin.f32 %v3569_v59, %v4337_v0  ;;  %v1547_v45 = vmax.f32 %v3569_v59, %v4337_v0 }
 0x92e   :  { %1333 = vadd.xlane.f32.xlu0 %v1332_v21  ;;  %v1463_v21 = vmax.f32 %v5390_v13, %v1456_v46 }
 0x9a4   :  { %v2283_v5 = vpop.xlane.xlu1 %2282 }
 0x9a5   :  { %vm2284_vm11 = vcmp.eq.f32.partialorder %v5433_v43, %v2283_v5  ;;  %v5448_v5 = vld [vmem:[#allocation65_spill] sm:$0xff] }
 0x9a6   :  { %v4306_v4 = vsel %vm2284_vm11, 1.0, %v5427_v14  ;;  %v1557_v39 = vmax.f32 %v5448_v5, %v1478_v16 }
 0x9a7   :  { %5434 = vst [vmem:[#allocation3_spill] sm:$0xff] %v4306_v4  ;;  %v2287_v31 = vmul.f32 1e+09, %v4306_v4  ;;  %v5457_v4 = vld [vmem:[#allocation59_spill] sm:$0xff] }
 0x9a9   :  { %v2288_v37 = vadd.f32 %v2287_v31, %v5435_v7  ;;  %v1485_v31 = vmin.f32 %v5448_v5, %v1478_v16  ;;  %v1450_v7 = vmin.f32 %v5336_v40, %v1442_v57  ;;  %v5451_v5 = vld [vmem:[#allocation60_spill] sm:$0xff] }
 0x9aa   :  { %v1452_v16 = vmin.f32 %v5451_v5, %v4337_v0 }
 0x9ab   :  { %v2438_v18 = vrot.slane %v2288_v37, %v5362_v26  ;;  %v2449_v29 = vrot.slane %v2288_v37, %v3759_v47  ;;  %v1504_v37 = vsub.f32 %v1486_v23, %v1500_v28  ;;  %v1468_v42 = vsub.f32 %v1450_v7, %v1464_v6 }
 0x9ac   :  { %v1465_v28 = vmax.f32 %v3551_v54, %v4341_v2  ;;  %v1562_v6 = vmin.f32 %v5330_v38, %v1492_v56  ;;  %v1466_v38 = vmax.f32 %v5457_v4, %v4341_v2 }
 0x9ad   :  { %2444 = vbcast.lane.b32.xlu1 %v2438_v18, 264  ;;  %2440 = vbcast.lane.b32.xlu0 %v2438_v18, 256  ;;  %v1449_v18 = vmin.f32 %v3548_v19, %v1442_v57  ;;  %v1472_v48 = vmax.f32 %v1468_v42, 0.0 }
 0x9ae   :  { %v1469_v43 = vsub.f32 %v1451_v41, %v1465_v28  ;;  %v1566_v10 = vsub.f32 %v1558_v32, %v1562_v6 }
 0x9af   :  { %v1467_v8 = vsub.f32 %v1449_v18, %v1463_v21  ;;  %v5453_v18 = vld [vmem:[#allocation63_spill] sm:$0xff] }
 0x9b0   :  { %v1488_v33 = vmin.f32 %v5453_v18, %v4326_v63 }
 0x9b1   :  { %2451 = vbcast.lane.b32.xlu0 %v2449_v29, 256  ;;  %v1471_v35 = vmax.f32 %v1467_v8, 0.0 }
 0x9b2   :  { %v1506_v42 = vsub.f32 %v1488_v33, %v1502_v62  ;;  %v1551_v33 = vmin.f32 %v3551_v54, %v4341_v2  ;;  %v5460_v62 = vld [vmem:[#allocation56_spill] sm:$0xff] }
 0x9b3   :  { %v1376_v6 = vrot.slane %v5460_v62, %v4313_v15 }
 0x9b5   :  { %2455 = vbcast.lane.b32.xlu0 %v2449_v29, 264  ;;  %v1503_v29 = vsub.f32 %v1485_v31, %v1499_v24  ;;  %v5450_v24 = vld [vmem:[#allocation67_spill] sm:$0xff]  ;;  %v1508_v31 = vmax.f32 %v1504_v37, 0.0  ;;  %v1522_v37 = vrot.slane %v5455_v51, %v4313_v15 }
 0x9b6   :  { %v1501_v23 = vmax.f32 %v5450_v24, %v4331_v58 }
 0x9b7   :  { %v1507_v21 = vmax.f32 %v1503_v29, 0.0  ;;  %v1545_v29 = vmax.f32 %v3548_v19, %v1442_v57  ;;  %v4377_v56 = vmul.f32 %v1508_v31, %v1472_v48  ;;  %v1527_v8 = vadd.f32 %v1522_v37, %v5458_v22 }
 0x9b8   :  { %v1505_v7 = vsub.f32 %v1487_v49, %v1501_v23  ;;  %v1546_v49 = vmax.f32 %v5336_v40, %v1442_v57  ;;  %v1549_v23 = vmin.f32 %v5390_v13, %v1456_v46  ;;  %v1565_v19 = vsub.f32 %v1557_v39, %v1561_v9 }
 0x9b9   :  { %v4379_v52 = vmul.f32 %v1507_v21, %v1471_v35  ;;  %v4385_v41 = vsub.f32 %v1526_v55, %v4377_v56  ;;  %v1473_v13 = vmax.f32 %v1469_v43, 0.0  ;;  %v1470_v48 = vsub.f32 %v1452_v16, %v1466_v38  ;;  %v5461_v38 = vld [vmem:[#allocation42_spill] sm:$0xff] }
 0x9ba   :  { %v1509_v51 = vmax.f32 %v1505_v7, 0.0  ;;  %v1554_v28 = vsub.f32 %v1546_v49, %v1550_v20  ;;  %v1563_v35 = vmin.f32 %v5450_v24, %v4331_v58  ;;  %v1553_v46 = vsub.f32 %v1545_v29, %v1549_v23  ;;  %v5459_v24 = vld [vmem:[#allocation72_spill] sm:$0xff]  ;;  %v5463_v23 = vld [vmem:[#allocation43_spill] sm:$0xff] }
 0x9bb   :  { %v4388_v40 = vsub.f32 %v1525_v3, %v4379_v52  ;;  %v1510_v9 = vmax.f32 %v1506_v42, 0.0  ;;  %v1560_v3 = vmax.f32 %v5453_v18, %v4326_v63  ;;  %v1534_v43 = vadd.f32 1e-07, %v4385_v41 }
 0x9bc   :  { %v4396_v57 = vmul.f32 %v1566_v10, %v1554_v28  ;;  %v4398_v55 = vmul.f32 %v1509_v51, %v1473_v13  ;;  %v4403_v39 = vmul.f32 %v1565_v19, %v1553_v46  ;;  %v1567_v32 = vsub.f32 %v1559_v50, %v1563_v35  ;;  %v5464_v51 = vld [vmem:[#allocation44_spill] sm:$0xff]  ;;  %v5465_v50 = vld [vmem:[#allocation45_spill] sm:$0xff]  ;;  %v5466_v19 = vld [vmem:[#allocation14_spill] sm:$0xff] }
 0x9bd   :  { %v1528_v20 = vadd.f32 %v1522_v37, %v5459_v24  ;;  %v1533_v54 = vadd.f32 1e-07, %v4388_v40  ;;  %v1474_v59 = vmax.f32 %v1470_v48, 0.0  ;;  %v1564_v16 = vmin.f32 %v5452_v17, %v4331_v58  ;;  %v5467_v13 = vld [vmem:[#allocation20_spill] sm:$0xff] }
 0x9be   :  { %v4408_v31 = vsub.f32 %v1527_v8, %v4398_v55  ;;  %v1555_v63 = vsub.f32 %v1547_v45, %v1551_v33  ;;  %v1548_v21 = vmax.f32 %v5451_v5, %v4337_v0  ;;  %v1552_v7 = vmin.f32 %v5457_v4, %v4341_v2  ;;  %v5462_v4 = vld [vmem:[#allocation16_spill] sm:$0xff]  ;;  %v5468_v33 = vld [vmem:[#allocation46_spill] sm:$0xff] }
 0x9bf   :  { %v1578_v18 = vadd.f32 1e-07, %v4396_v57  ;;  %v4419_v37 = vmul.f32 %v1510_v9, %v1474_v59  ;;  %v1358_v29 = vrot.slane %v5461_v38, %v4313_v15  ;;  %3098 = vrcp.f32 %v1534_v43  ;;  %v4452_v38 = vpop.xlane.xlu0 %1324 }
 0x9c0   :  { %v1577_v58 = vadd.f32 1e-07, %v4403_v39  ;;  %v4424_v17 = vmul.f32 %v1567_v32, %v1555_v63  ;;  %3100 = vrcp.f32 %v1533_v54  ;;  %v1535_v49 = vadd.f32 1e-07, %v4408_v31  ;;  %v5470_v32 = vld [vmem:[#allocation57_spill] sm:$0xff]  ;;  %v5473_v63 = vld [vmem:[#allocation8_spill] sm:$0xff] }
 0x9c1   :  { %v4428_v0 = vsub.f32 %v1528_v20, %v4419_v37  ;;  %v1568_v5 = vsub.f32 %v1560_v3, %v1564_v16  ;;  %v1383_v2 = vsub.f32 %v5462_v4, %v1376_v6  ;;  %v1362_v10 = vrot.slane %v5463_v23, %v4313_v15  ;;  %v5469_v3 = vld [vmem:[#allocation22_spill] sm:$0xff]  ;;  %v5471_v20 = vld [vmem:[#allocation15_spill] sm:$0xff]  ;;  %v5472_v16 = vld [vmem:[#allocation17_spill] sm:$0xff] }
 0x9c2   :  { %v1380_v42 = vrot.slane %v5464_v51, %v4313_v15  ;;  %v1398_v22 = vrot.slane %v5465_v50, %v4313_v15  ;;  %3102 = vrcp.f32 %v1578_v18  ;;  %v1556_v8 = vsub.f32 %v1548_v21, %v1552_v7  ;;  %v5474_v7 = vld [vmem:[#allocation18_spill] sm:$0xff]  ;;  %v5477_v23 = vld [vmem:[#allocation12_spill] sm:$0xff] }
 0x9c3   :  { %v1365_v28 = vsub.f32 %v5466_v19, %v1358_v29  ;;  %v1366_v48 = vsub.f32 %v5467_v13, %v1358_v29  ;;  %3104 = vrcp.f32 %v1577_v58  ;;  %v1579_v35 = vadd.f32 1e-07, %v4424_v17  ;;  %v5478_v19 = vld [vmem:[#allocation9_spill] sm:$0xff] }
 0x9c4   :  { %v1420_v46 = vrot.slane %v5468_v33, %v4313_v15  ;;  %3106 = vrcp.f32 %v1535_v49  ;;  %v1536_v45 = vadd.f32 1e-07, %v4428_v0  ;;  %v4443_v9 = vmul.f32 %v1568_v5, %v1556_v8  ;;  %v5475_v49 = vld [vmem:[#allocation50_spill] sm:$0xff] }
 0x9c5   :  { %v1384_v43 = vsub.f32 %v5469_v3, %v1376_v6  ;;  %v1402_v24 = vrot.slane %v5470_v32, %v4313_v15  ;;  %v1367_v54 = vsub.f32 %v5471_v20, %v1362_v10  ;;  %v1387_v59 = vand.u32 2147483647, %v1383_v2  ;;  %v5476_v6 = vld [vmem:[#allocation11_spill] sm:$0xff] }
 0x9c6   :  { %v1385_v62 = vsub.f32 %v5472_v16, %v1380_v42  ;;  %v1405_v21 = vsub.f32 %v5473_v63, %v1398_v22  ;;  %v1406_v18 = vsub.f32 %v5474_v7, %v1398_v22  ;;  %v1369_v29 = vand.u32 2147483647, %v1365_v28  ;;  %v1328_v7 = vpop.xlane.xlu0 %1327 }
 0x9c7   :  { %v1370_v58 = vand.u32 2147483647, %v1366_v48  ;;  %v1424_v5 = vrot.slane %v5475_v49, %v4313_v15  ;;  %3108 = vrcp.f32 %v1579_v35  ;;  %v1427_v4 = vsub.f32 %v5476_v6, %v1420_v46 }
 0x9c8   :  { %v1428_v51 = vsub.f32 %v5477_v23, %v1420_v46  ;;  %3110 = vrcp.f32 %v1536_v45  ;;  %v1580_v2 = vadd.f32 1e-07, %v4443_v9  ;;  %v1388_v8 = vand.u32 2147483647, %v1384_v43 }
 0x9c9   :  { %v3099_v50 = vpop.eup %3098  ;;  %v1407_v13 = vsub.f32 %v5478_v19, %v1402_v24  ;;  %v1368_v22 = vsub.f32 %v5295_v60, %v1362_v10  ;;  %v1371_v33 = vand.u32 2147483647, %v1367_v54  ;;  %v1386_v48 = vsub.f32 %v5351_v61, %v1380_v42 }
 0x9ca   :  { %v3101_v28 = vpop.eup %3100  ;;  %v1389_v3 = vand.u32 2147483647, %v1385_v62  ;;  %v1409_v15 = vand.u32 2147483647, %v1405_v21  ;;  %v1410_v35 = vand.u32 2147483647, %v1406_v18  ;;  %v1391_v32 = vadd.f32 %v1387_v59, %v1369_v29 }
 0x9cb   :  { %v1392_v20 = vadd.f32 %v1388_v8, %v1370_v58  ;;  %v1574_v46 = vsub.f32 %v4396_v57, %v4385_v41  ;;  %v1573_v45 = vsub.f32 %v4403_v39, %v4388_v40  ;;  %v1431_v16 = vand.u32 2147483647, %v1427_v4 }
 0x9cc   :  { %v3103_v43 = vpop.eup %3102  ;;  %v1432_v63 = vand.u32 2147483647, %v1428_v51  ;;  %v1429_v60 = vsub.f32 %v5296_v25, %v1424_v5  ;;  %3112 = vrcp.f32 %v1580_v2  ;;  %v1408_v61 = vsub.f32 %v5298_v12, %v1402_v24  ;;  %v1331_v2 = vpop.xlane.xlu0 %1330 }
 0x9cd   :  { %v3105_v10 = vpop.eup %3104  ;;  %v1411_v42 = vand.u32 2147483647, %v1407_v13  ;;  %v1540_v54 = vmul.f32 %v3099_v50, %v4377_v56  ;;  %v1538_v59 = vmul.f32 %v3101_v28, %v4379_v52  ;;  %v1390_v41 = vand.u32 2147483647, %v1386_v48 }
 0x9ce   :  { %v3107_v62 = vpop.eup %3106  ;;  %v1413_v57 = vadd.f32 %v1409_v15, %v1391_v32  ;;  %v1414_v21 = vadd.f32 %v1410_v35, %v1392_v20  ;;  %v1393_v40 = vadd.f32 %v1389_v3, %v1371_v33  ;;  %v1372_v39 = vand.u32 2147483647, %v1368_v22 }
 0x9cf   :  { %v1584_v18 = vmul.f32 %v3103_v43, %v1574_v46  ;;  %v1582_v29 = vmul.f32 %v3105_v10, %v1573_v45  ;;  %v1575_v25 = vsub.f32 %v4424_v17, %v4408_v31  ;;  %v1433_v12 = vand.u32 2147483647, %v1429_v60 }
 0x9d0   :  { %v4472_v58 = vadd.f32 %v1431_v16, %v1413_v57  ;;  %v4474_v49 = vadd.f32 %v1432_v63, %v1414_v21  ;;  %v1430_v56 = vsub.f32 %v5300_v53, %v1424_v5  ;;  %v1542_v4 = vmul.f32 %v3107_v62, %v4398_v55  ;;  %v1334_v45 = vpop.xlane.xlu0 %1333 }
 0x9d1   :  { %v3109_v24 = vpop.eup %3108  ;;  %v4477_v52 = vsub.f32 %v1540_v54, %v1584_v18  ;;  %v4479_v6 = vsub.f32 %v1538_v59, %v1582_v29  ;;  %v1415_v51 = vadd.f32 %v1411_v42, %v1393_v40  ;;  %v1394_v50 = vadd.f32 %v1390_v41, %v1372_v39 }
 0x9d2   :  { %v3111_v23 = vpop.eup %3110  ;;  %v1412_v8 = vand.u32 2147483647, %v1408_v61  ;;  %v1335_v31 = vsub.f32 0.0, %v4452_v38  ;;  %v1336_v17 = vsub.f32 0.0, %v1328_v7  ;;  %v1586_v19 = vmul.f32 %v3109_v24, %v1575_v25 }
 0x9d3   :  { %v1576_v13 = vsub.f32 %v4443_v9, %v4428_v0  ;;  %v1593_v53 = vmul.f32 5.0, %v4472_v58  ;;  %v1594_v5 = vmul.f32 5.0, %v4474_v49  ;;  %v4487_v22 = vadd.f32 %v1433_v12, %v1415_v51 }
 0x9d4   :  { %v1434_v33 = vand.u32 2147483647, %v1430_v56  ;;  %v1602_v55 = vsub.f32 0.0, %v4477_v52  ;;  %v1601_v28 = vsub.f32 0.0, %v4479_v6  ;;  %v4491_v48 = vsub.f32 %v1542_v4, %v1586_v19 }
 0x9d5   :  { %v1544_v38 = vmul.f32 %v3111_v23, %v4419_v37  ;;  %v1416_v15 = vadd.f32 %v1412_v8, %v1394_v50  ;;  %v1597_v35 = vadd.f32 %v1593_v53, %v1335_v31  ;;  %v1598_v32 = vadd.f32 %v1594_v5, %v1336_v17 }
 0x9d6   :  { %v3113_v3 = vpop.eup %3112  ;;  %v1337_v0 = vsub.f32 0.0, %v1331_v2  ;;  %v1595_v20 = vmul.f32 5.0, %v4487_v22  ;;  %v1606_v43 = vmul.f32 2.0, %v1602_v55  ;;  %v1605_v16 = vmul.f32 2.0, %v1601_v28  ;;  %v5479_v55 = vld [vmem:[#allocation29_spill] sm:$0xff] }
 0x9d7   :  { %v1588_v9 = vmul.f32 %v3113_v3, %v1576_v13  ;;  %v4495_v46 = vadd.f32 %v1434_v33, %v1416_v15  ;;  %v1603_v63 = vsub.f32 0.0, %v4491_v48  ;;  %v1338_v10 = vsub.f32 0.0, %v1334_v45  ;;  %v4525_v33 = vld [vmem:[%s5015_s0 + $0x8] sm:$0xff]  ;;  %v4533_v3 = vld [vmem:[%s5015_s0 + $0x10] sm:$0xff]  ;;  %v4549_v45 = vld [vmem:[%s5015_s0] sm:$0xff] }
 0x9d8   :  { %v1599_v60 = vadd.f32 %v1595_v20, %v1337_v0  ;;  %v1610_v37 = vadd.f32 %v1606_v43, %v1598_v32  ;;  %v1609_v61 = vadd.f32 %v1605_v16, %v1597_v35  ;;  %v253_v28 = vmul.f32 %v4525_v33, %v5479_v55  ;;  %v5480_v15 = vld [vmem:[#allocation35_spill] sm:$0xff]  ;;  %v4541_v0 = vld [vmem:[%s5015_s0 + $0x18] sm:$0xff]  ;;  %v5481_v43 = vld [vmem:[#allocation2_spill] sm:$0xff] }
 0x9d9   :  { %v4498_v7 = vsub.f32 %v1544_v38, %v1588_v9  ;;  %v1596_v42 = vmul.f32 5.0, %v4495_v46  ;;  %v1607_v57 = vmul.f32 2.0, %v1603_v63  ;;  %v254_v35 = vmul.f32 %v4533_v3, %v5480_v15 }
 0x9da   :  { %v259_v38 = vsel %vm28_vm0, %v253_v28, 0.0  ;;  %v255_v9 = vmul.f32 %v4541_v0, %v5480_v15  ;;  %v673_v16 = vmul.f32 %v4549_v45, %v5481_v43  ;;  %v252_v28 = vmul.f32 %v4549_v45, %v5479_v55 }
 0x9db   :  { %v1604_v21 = vsub.f32 0.0, %v4498_v7  ;;  %v1600_v40 = vadd.f32 %v1596_v42, %v1338_v10  ;;  %v1611_v39 = vadd.f32 %v1607_v57, %v1599_v60  ;;  %v262_v32 = vsel %vm28_vm0, %v254_v35, 0.0  ;;  %v5482_v60 = vld [vmem:[#allocation80_spill] sm:$0xff] }
 0x9dc   :  { %v265_v20 = vsel %vm28_vm0, %v255_v9, 0.0  ;;  %v677_v63 = vsel %vm28_vm0, %v673_v16, 0.0  ;;  %v675_v10 = vmul.f32 %v4533_v3, %v5482_v60  ;;  %v676_v35 = vmul.f32 %v4541_v0, %v5482_v60 }
 0x9dd   :  { %v1608_v25 = vmul.f32 2.0, %v1604_v21  ;;  %v1340_v16 = vmul.f32 %v4525_v33, %v4287_v30  ;;  %v1342_v60 = vmul.f32 %v4541_v0, %v4292_v11 }
 0x9df   :  { %v1612_v12 = vadd.f32 %v1608_v25, %v1600_v40  ;;  %v1339_v40 = vmul.f32 %v4549_v45, %v4287_v30  ;;  %v2743_v30 = vsel %vm2740_vm10, %v4533_v3, 0.0 }
 0xa1f   :  { %v2445_v54 = vpop.permute.xlu1 %2444  ;;  %v2441_v59 = vpop.permute.xlu0 %2440 }
 0xa20   :  { %v4501_v62 = vadd.f32 %v2445_v54, %v1610_v37  ;;  %v4503_v41 = vadd.f32 %v2441_v59, %v1609_v61  ;;  %v683_v37 = vsel %vm28_vm0, %v675_v10, 0.0  ;;  %v5483_v61 = vld [vmem:[#allocation77_spill] sm:$0xff]  ;;  %v5484_v59 = vld [vmem:[#allocation76_spill] sm:$0xff]  ;;  %v2741_v10 = vsel %vm2740_vm10, %v4549_v45, 0.0 }
 0xa21   :  { %v1006_v42 = vmul.f32 %v4549_v45, %v5483_v61  ;;  %v1008_v57 = vmul.f32 %v4533_v3, %v5484_v59  ;;  %v1007_v9 = vmul.f32 %v4525_v33, %v5483_v61  ;;  %v2745_v61 = vsel %vm28_vm0, %v2741_v10, 0.0 }
 0xa22   :  { %2473 = vperm.xlu0 %3031, %v4501_v62   ;;  %2470 = vperm.xlu1 %3033, %v4503_v41  }
 0xa23   :  { %v2452_v18 = vpop.permute.xlu0 %2451  ;;  %v1010_v54 = vsel %vm28_vm0, %v1006_v42, 0.0  ;;  %v1016_v21 = vsel %vm28_vm0, %v1008_v57, 0.0  ;;  %v1013_v55 = vsel %vm28_vm0, %v1007_v9, 0.0  ;;  %v2751_v42 = vsel %vm28_vm0, %v2743_v30, 0.0 }
 0xa24   :  { %v4508_v29 = vadd.f32 %v2452_v18, %v1611_v39  ;;  %v1343_v39 = vsel %vm28_vm0, %v1339_v40, 0.0  ;;  %v1341_v18 = vmul.f32 %v4533_v3, %v4292_v11  ;;  %v2874_v11 = vsel %vm2740_vm10, -1e+09, %v4549_v45  ;;  %v5488_v40 = vld [vmem:[#allocation74_spill] sm:$0xff] }
 0xa26   :  { %2476 = vperm.xlu1 %3033, %v4508_v29   ;;  %v1349_v25 = vsel %vm28_vm0, %v1341_v18, 0.0 }
 0xa27   :  { %v2456_v56 = vpop.permute.xlu0 %2455 }
 0xa28   :  { %v4511_v24 = vadd.f32 %v2456_v56, %v1612_v12 }
 0xa2a   :  { %2479 = vperm.xlu0 %3031, %v4511_v24  }
 0xaa1   :  { %v2471_v4 = vpop.permute.xlu1 %2470  ;;  %v2474_v23 = vpop.permute.xlu0 %2473 }
 0xaa2   :  { %v2484_v2 = vrot.slane %v2471_v4, %v5361_v44  ;;  %v2488_v50 = vrot.slane %v2474_v23, %v5360_v36 }
 0xaa4   :  { %v2489_v19 = vsel %vm1642_vm7, %v2488_v50, %v2484_v2 }
 0xaa5   :  { %v2477_v51 = vpop.permute.xlu1 %2476 }
 0xaa6   :  { %v2493_v31 = vrot.slane %v2477_v51, %v5361_v44 }
 0xaa9   :  { %v2480_v8 = vpop.permute.xlu0 %2479 }
 0xaaa   :  { %v2497_v17 = vrot.slane %v2480_v8, %v5360_v36  ;;  %v5485_v8 = vld [vmem:[#allocation5_spill] sm:$0xff] }
 0xaac   :  { %v2498_v13 = vsel %vm1642_vm7, %v2497_v17, %v2493_v31 }
 0xaad   :  { %v2499_v53 = vsel %vm1653_vm8, %v2498_v13, %v2489_v19 }
 0xaae   :  { %v2501_v5 = vsel %vm1656_vm9, %v2499_v53, inf }
 0xaaf   :  { %2502 = vmin.xlane.f32.xlu1 %v2501_v5 }
 0xab3   :  { %260 = vadd.xlane.f32.xlu1 %v259_v38  ;;  %v256_v38 = vsel %vm28_vm0, %v252_v28, 0.0  ;;  %v2877_v28 = vsel %vm2740_vm10, -1e+09, %v4541_v0 }
 0xab7   :  { %263 = vadd.xlane.f32.xlu1 %v262_v32  ;;  %v686_v32 = vsel %vm28_vm0, %v676_v35, 0.0  ;;  %v5491_v35 = vld [vmem:[#allocation19_spill] sm:$0xff] }
 0xabb   :  { %266 = vadd.xlane.f32.xlu1 %v265_v20  ;;  %v1009_v20 = vmul.f32 %v4541_v0, %v5484_v59  ;;  %v2876_v59 = vsel %vm2740_vm10, -1e+09, %v4533_v3 }
 0xabc   :  { %v2884_v57 = vsel %vm28_vm0, %v2876_v59, -inf }
 0xabf   :  { %678 = vadd.xlane.f32.xlu1 %v677_v63  ;;  %v1346_v63 = vsel %vm28_vm0, %v1340_v16, 0.0 }
 0xac3   :  { %684 = vadd.xlane.f32.xlu1 %v683_v37  ;;  %v1352_v37 = vsel %vm28_vm0, %v1342_v60, 0.0 }
 0xac7   :  { %1011 = vadd.xlane.f32.xlu1 %v1010_v54  ;;  %v2878_v54 = vsel %vm28_vm0, %v2874_v11, -inf }
 0xacb   :  { %1017 = vadd.xlane.f32.xlu1 %v1016_v21  ;;  %v5487_v21 = vld [vmem:[#allocation68_spill] sm:$0xff] }
 0xacf   :  { %1344 = vadd.xlane.f32.xlu1 %v1343_v39  ;;  %v5489_v39 = vld [vmem:[#allocation66_spill] sm:$0xff] }
 0xad0   :  { %v1799_v18 = vsub.f32 1.0, %v5489_v39 }
 0xad3   :  { %1350 = vadd.xlane.f32.xlu1 %v1349_v25 }
 0xb3c   :  { %v2503_v12 = vpop.xlane.xlu1 %2502 }
 0xb3d   :  { %v2508_v56 = vrot.slane %v2503_v12, %v5362_v26  ;;  %v2512_v51 = vrot.slane %v2503_v12, %v3759_v47 }
 0xb3f   :  { %vm2515_vm12 = vcmp.le.f32.partialorder %v4503_v41, %v2508_v56  ;;  %vm2516_vm13 = vcmp.le.f32.partialorder %v4501_v62, %v2508_v56  ;;  %vm2517_vm14 = vcmp.le.f32.partialorder %v4508_v29, %v2512_v51  ;;  %vm2518_vm2 = vcmp.le.f32.partialorder %v4511_v24, %v2512_v51  ;;  %v5486_v62 = vld [vmem:[#allocation7_spill] sm:$0xff] }
 0xb40   :  { %v4571_v4 = vpop.xlane.xlu1 %260  ;;  %v2519_v23 = vsel %vm2515_vm12, %v5363_v27, 16.0  ;;  %v2520_v50 = vsel %vm2516_vm13, %v5364_v34, 16.0  ;;  %v2521_v17 = vsel %vm2517_vm14, %v5363_v27, 16.0  ;;  %v2522_v53 = vsel %vm2518_vm2, %v5364_v34, 16.0 }
 0xb41   :  { %2528 = vperm.xlu0 %3031, %v2519_v23   ;;  %v2742_v27 = vsel %vm2740_vm10, %v4525_v33, 0.0  ;;  %v674_v34 = vmul.f32 %v4525_v33, %v5481_v43  ;;  %v1019_v43 = vsel %vm28_vm0, %v1009_v20, 0.0 }
 0xb42   :  { %v2748_v24 = vsel %vm28_vm0, %v2742_v27, 0.0  ;;  %v2875_v27 = vsel %vm2740_vm10, -1e+09, %v4525_v33  ;;  %v5492_v33 = vld [vmem:[#allocation21_spill] sm:$0xff] }
 0xb43   :  { %2749 = vadd.xlane.f32.xlu1 %v2748_v24  ;;  %v680_v15 = vsel %vm28_vm0, %v674_v34, 0.0  ;;  %v2881_v24 = vsel %vm28_vm0, %v2875_v27, -inf  ;;  %v1798_v9 = vsub.f32 1.0, %v5492_v33 }
 0xb44   :  { %v4576_v2 = vpop.xlane.xlu1 %263 }
 0xb45   :  { %vm1842_vm15 = vcmp.ge.f32.partialorder %v4576_v2, %v5485_v8  ;;  %2531 = vperm.xlu0 %3031, %v2520_v50  }
 0xb46   :  { %v2975_v41 = vsel %vm1842_vm15, 1.0, %v5427_v14 }
 0xb47   :  { %v1868_v29 = vrot.slane %v2975_v41, %v5361_v44 }
 0xb48   :  { %v4583_v31 = vpop.xlane.xlu1 %266 }
 0xb49   :  { %vm1843_vm6 = vcmp.ge.f32.partialorder %v4583_v31, %v5486_v62  ;;  %2534 = vperm.xlu0 %3031, %v2521_v17  }
 0xb4a   :  { %v2976_v19 = vsel %vm1843_vm6, 1.0, %v5427_v14 }
 0xb4b   :  { %v1872_v13 = vrot.slane %v2976_v19, %v5360_v36 }
 0xb4c   :  { %v4661_v34 = vpop.xlane.xlu1 %678 }
 0xb4d   :  { %v4595_v5 = vsel %vm1642_vm7, %v1872_v13, %v1868_v29  ;;  %2537 = vperm.xlu0 %3031, %v2522_v53   ;;  %v2744_v29 = vsel %vm2740_vm10, %v4541_v0, 0.0 }
 0xb4e   :  { %v2754_v53 = vsel %vm28_vm0, %v2744_v29, 0.0 }
 0xb6c   :  { %257 = vadd.xlane.f32.xlu0 %v256_v38  ;;  %v2887_v38 = vsel %vm28_vm0, %v2877_v28, -inf }
 0xb70   :  { %681 = vadd.xlane.f32.xlu0 %v680_v15  ;;  %v5490_v15 = vld [vmem:[#allocation13_spill] sm:$0xff] }
 0xb74   :  { %687 = vadd.xlane.f32.xlu0 %v686_v32  ;;  %v4665_v32 = vpop.xlane.xlu1 %684 }
 0xb75   :  { %vm2120_vm13 = vcmp.ge.f32.partialorder %v4665_v32, %v5485_v8 }
 0xb78   :  { %1014 = vadd.xlane.f32.xlu0 %v1013_v55  ;;  %v5493_v55 = vld [vmem:[#allocation6_spill] sm:$0xff]  ;;  %v4678_v60 = vpop.xlane.xlu1 %1011 }
 0xb79   :  { %vm1841_vm11 = vcmp.ge.f32.partialorder %v4571_v4, %v5493_v55 }
 0xb7a   :  { %v2974_v0 = vsel %vm1841_vm11, 1.0, %v5427_v14 }
 0xb7c   :  { %1020 = vadd.xlane.f32.xlu0 %v1019_v43  ;;  %v5494_v43 = vld [vmem:[#allocation10_spill] sm:$0xff]  ;;  %v4697_v39 = vpop.xlane.xlu1 %1017 }
 0xb7d   :  { %v1800_v16 = vsub.f32 1.0, %v5494_v43  ;;  %vm2398_vm6 = vcmp.ge.f32.partialorder %v4697_v39, %v5485_v8 }
 0xb7e   :  { %v2985_v29 = vsel %vm2398_vm6, 1.0, %v5427_v14 }
 0xb80   :  { %1347 = vadd.xlane.f32.xlu0 %v1346_v63  ;;  %v5495_v63 = vld [vmem:[#allocation4_spill] sm:$0xff] }
 0xb81   :  { %vm2118_vm0 = vcmp.ge.f32.partialorder %v4661_v34, %v5495_v63  ;;  %vm2396_vm15 = vcmp.ge.f32.partialorder %v4678_v60, %v5495_v63 }
 0xb82   :  { %v2978_v30 = vsel %vm2118_vm0, 1.0, %v5427_v14 }
 0xb84   :  { %1353 = vadd.xlane.f32.xlu0 %v1352_v37  ;;  %v1863_v37 = vrot.slane %v2974_v0, %v5360_v36 }
 0xb88   :  { %2746 = vadd.xlane.f32.xlu0 %v2745_v61 }
 0xb8c   :  { %2752 = vadd.xlane.f32.xlu0 %v2751_v42 }
 0xb90   :  { %2879 = vmax.xlane.f32.xlu0 %v2878_v54 }
 0xb94   :  { %2885 = vmax.xlane.f32.xlu0 %v2884_v57  ;;  %v2137_v57 = vrot.slane %v2978_v30, %v5361_v44 }
 0xbaa   :  { %1768 = vperm.xlu0 %3031, %v5487_v21  }
 0xbae   :  { %1774 = vperm.xlu0 %3031, %v5488_v40   ;;  %v2980_v40 = vsel %vm2120_vm13, 1.0, %v5427_v14 }
 0xbb2   :  { %1810 = vperm.xlu0 %3031, %v1799_v18  }
 0xbc0   :  { %v2529_v25 = vpop.permute.xlu0 %2528 }
 0xbc1   :  { %v2542_v51 = vrot.slane %v2529_v25, %v5361_v44 }
 0xbc4   :  { %v2532_v45 = vpop.permute.xlu0 %2531 }
 0xbc5   :  { %v2546_v56 = vrot.slane %v2532_v45, %v5360_v36  ;;  %v2146_v45 = vrot.slane %v2980_v40, %v5361_v44 }
 0xbc7   :  { %v2547_v41 = vsel %vm1642_vm7, %v2546_v56, %v2542_v51  ;;  %v2983_v56 = vsel %vm2396_vm15, 1.0, %v5427_v14 }
 0xbc8   :  { %v2535_v12 = vpop.permute.xlu0 %2534 }
 0xbc9   :  { %v2551_v3 = vrot.slane %v2535_v12, %v5361_v44 }
 0xbcc   :  { %v2538_v23 = vpop.permute.xlu0 %2537 }
 0xbcd   :  { %v2555_v50 = vrot.slane %v2538_v23, %v5360_v36 }
 0xbcf   :  { %v2556_v17 = vsel %vm1642_vm7, %v2555_v50, %v2551_v3  ;;  %v4717_v3 = vpop.xlane.xlu1 %1344 }
 0xbd0   :  { %v2557_v19 = vsel %vm1653_vm8, %v2556_v17, %v2547_v41  ;;  %v2415_v17 = vrot.slane %v2983_v56, %v5361_v44  ;;  %vm2672_vm11 = vcmp.ge.f32.partialorder %v4717_v3, %v5495_v63 }
 0xbd1   :  { %v2559_v13 = vsel %vm1656_vm9, %v2557_v19, inf }
 0xbd2   :  { %2560 = vmin.xlane.f32.xlu1 %v2559_v13 }
 0xbd6   :  { %2755 = vadd.xlane.f32.xlu1 %v2754_v53 }
 0xbda   :  { %2882 = vmax.xlane.f32.xlu1 %v2881_v24  ;;  %v2424_v24 = vrot.slane %v2985_v29, %v5361_v44  ;;  %v2028_v29 = vrot.slane %v4665_v32, %v5361_v44  ;;  %v2019_v32 = vrot.slane %v4661_v34, %v5361_v44 }
 0xbde   :  { %2888 = vmax.xlane.f32.xlu1 %v2887_v38  ;;  %v2988_v38 = vsel %vm2672_vm11, 1.0, %v5427_v14 }
 0xbef   :  { %1765 = vperm.xlu1 %3033, %v5490_v15  }
 0xbf3   :  { %1771 = vperm.xlu1 %3033, %v5491_v35  }
 0xbf7   :  { %1807 = vperm.xlu1 %3033, %v1798_v9   ;;  %v2691_v9 = vrot.slane %v2988_v38, %v5361_v44 }
 0xbf9   :  { %v4671_v20 = vpop.xlane.xlu0 %257 }
 0xbfa   :  { %vm1840_vm12 = vcmp.ge.f32.partialorder %v4671_v20, %v5495_v63 }
 0xbfb   :  { %v2973_v10 = vsel %vm1840_vm12, 1.0, %v5427_v14  ;;  %1813 = vperm.xlu1 %3033, %v1800_v16  }
 0xbfc   :  { %v1859_v61 = vrot.slane %v2973_v10, %v5361_v44  ;;  %v5496_v10 = vld [vmem:[#allocation81_spill] sm:$0xff] }
 0xbfd   :  { %v4684_v42 = vpop.xlane.xlu0 %681 }
 0xbfe   :  { %v1864_v11 = vsel %vm1642_vm7, %v1863_v37, %v1859_v61  ;;  %vm2119_vm14 = vcmp.ge.f32.partialorder %v4684_v42, %v5493_v55  ;;  %v5497_v61 = vld [vmem:[#allocation27_spill] sm:$0xff] }
 0xbff   :  { %v1874_v54 = vsel %vm1653_vm8, %v4595_v5, %v1864_v11  ;;  %v2979_v59 = vsel %vm2119_vm14, 1.0, %v5427_v14  ;;  %v1351_v11 = vpop.xlane.xlu1 %1350 }
 0xc00   :  { %v2141_v21 = vrot.slane %v2979_v59, %v5360_v36  ;;  %v1876_v37 = vmul.f32 %v5496_v10, %v1874_v54  ;;  %vm2674_vm14 = vcmp.ge.f32.partialorder %v1351_v11, %v5485_v8 }
 0xc01   :  { %v4699_v18 = vpop.xlane.xlu0 %687 }
 0xc02   :  { %v2142_v25 = vsel %vm1642_vm7, %v2141_v21, %v2137_v57  ;;  %vm2121_vm2 = vcmp.ge.f32.partialorder %v4699_v18, %v5486_v62  ;;  %v2990_v21 = vsel %vm2674_vm14, 1.0, %v5427_v14 }
 0xc03   :  { %v2981_v5 = vsel %vm2121_vm2, 1.0, %v5427_v14  ;;  %v2700_v54 = vrot.slane %v2990_v21, %v5361_v44 }
 0xc04   :  { %v2150_v12 = vrot.slane %v2981_v5, %v5360_v36  ;;  %v5498_v5 = vld [vmem:[#allocation3_spill] sm:$0xff] }
 0xc05   :  { %v4710_v23 = vpop.xlane.xlu0 %1014 }
 0xc06   :  { %v2151_v51 = vsel %vm1642_vm7, %v2150_v12, %v2146_v45  ;;  %vm2397_vm10 = vcmp.ge.f32.partialorder %v4710_v23, %v5493_v55 }
 0xc07   :  { %v2152_v50 = vsel %vm1653_vm8, %v2151_v51, %v2142_v25  ;;  %v2984_v41 = vsel %vm2397_vm10, 1.0, %v5427_v14 }
 0xc08   :  { %v2419_v19 = vrot.slane %v2984_v41, %v5360_v36  ;;  %v2154_v30 = vmul.f32 %v5497_v61, %v2152_v50  ;;  %v2032_v41 = vrot.slane %v4699_v18, %v5360_v36  ;;  %v2306_v18 = vrot.slane %v4697_v39, %v5361_v44 }
 0xc09   :  { %v1021_v13 = vpop.xlane.xlu0 %1020 }
 0xc0a   :  { %v2420_v53 = vsel %vm1642_vm7, %v2419_v19, %v2415_v17  ;;  %vm2399_vm0 = vcmp.ge.f32.partialorder %v1021_v13, %v5486_v62  ;;  %v2155_v59 = vadd.f32 %v2154_v30, %v1876_v37  ;;  %v1741_v17 = vrot.slane %v4671_v20, %v5361_v44 }
 0xc0b   :  { %v2986_v27 = vsel %vm2399_vm0, 1.0, %v5427_v14  ;;  %v2310_v19 = vrot.slane %v1021_v13, %v5360_v36  ;;  %v2301_v20 = vrot.slane %v4710_v23, %v5360_v36  ;;  %v4778_v13 = vpop.xlane.xlu1 %2749  ;;  %vm2931_vm0 = vcmask 1024  }
 0xc0c   :  { %v2428_v28 = vrot.slane %v2986_v27, %v5360_v36  ;;  %v1745_v27 = vrot.slane %v4571_v4, %v5360_v36  ;;  %v1750_v4 = vrot.slane %v4576_v2, %v5361_v44  ;;  %v2011_v2 = vadd.f32 %v5497_v61, %v5496_v10 }
 0xc0d   :  { %v4732_v15 = vpop.xlane.xlu0 %1347  ;;  %v2311_v38 = vsel %vm1642_vm7, %v2310_v19, %v2306_v18 }
 0xc0e   :  { %v2429_v35 = vsel %vm1642_vm7, %v2428_v28, %v2424_v24  ;;  %vm2673_vm12 = vcmp.ge.f32.partialorder %v4732_v15, %v5493_v55  ;;  %v1754_v24 = vrot.slane %v4583_v31, %v5360_v36  ;;  %v2297_v31 = vrot.slane %v4678_v60, %v5361_v44 }
 0xc0f   :  { %v2989_v33 = vsel %vm2673_vm12, 1.0, %v5427_v14  ;;  %v2430_v40 = vsel %vm1653_vm8, %v2429_v35, %v2420_v53  ;;  %v2023_v53 = vrot.slane %v4684_v42, %v5360_v36  ;;  %v2033_v42 = vsel %vm1642_vm7, %v2032_v41, %v2028_v29 }
 0xc10   :  { %v2695_v0 = vrot.slane %v2989_v33, %v5360_v36  ;;  %v2432_v45 = vmul.f32 %v5498_v5, %v2430_v40  ;;  %v1746_v39 = vsel %vm1642_vm7, %v1745_v27, %v1741_v17  ;;  %v1755_v33 = vsel %vm1642_vm7, %v1754_v24, %v1750_v4 }
 0xc11   :  { %v1354_v16 = vpop.xlane.xlu0 %1353  ;;  %v2024_v23 = vsel %vm1642_vm7, %v2023_v53, %v2019_v32  ;;  %v1756_v60 = vsel %vm1653_vm8, %v1755_v33, %v1746_v39  ;;  %v2577_v37 = vrot.slane %v4732_v15, %v5360_v36  ;;  %v2769_v15 = vrot.slane %v4778_v13, %v5360_v36 }
 0xc12   :  { %v2696_v43 = vsel %vm1642_vm7, %v2695_v0, %v2691_v9  ;;  %vm2675_vm13 = vcmp.ge.f32.partialorder %v1354_v16, %v5486_v62  ;;  %v4751_v12 = vadd.f32 %v2432_v45, %v2155_v59  ;;  %v2586_v35 = vrot.slane %v1354_v16, %v5360_v36 }
 0xc13   :  { %v2991_v57 = vsel %vm2675_vm13, 1.0, %v5427_v14  ;;  %v2034_v34 = vsel %vm1653_vm8, %v2033_v42, %v2024_v23  ;;  %v2302_v9 = vsel %vm1642_vm7, %v2301_v20, %v2297_v31  ;;  %v2582_v0 = vrot.slane %v1351_v11, %v5361_v44  ;;  %v5499_v11 = vld [vmem:[#allocation75_spill] sm:$0xff] }
 0xc14   :  { %v2704_v25 = vrot.slane %v2991_v57, %v5360_v36  ;;  %v2289_v16 = vadd.f32 %v5498_v5, %v2011_v2  ;;  %v2573_v57 = vrot.slane %v4717_v3, %v5361_v44  ;;  %v2036_v21 = vmul.f32 %v5497_v61, %v2034_v34 }
 0xc15   :  { %v4757_v50 = vpop.xlane.xlu0 %2746  ;;  %v2587_v40 = vsel %vm1642_vm7, %v2586_v35, %v2582_v0 }
 0xc16   :  { %v2705_v56 = vsel %vm1642_vm7, %v2704_v25, %v2700_v54  ;;  %v1758_v25 = vmul.f32 %v5496_v10, %v1756_v60  ;;  %v2765_v3 = vrot.slane %v4757_v50, %v5361_v44 }
 0xc17   :  { %v4755_v51 = vsel %vm1653_vm8, %v2705_v56, %v2696_v43  ;;  %v2312_v43 = vsel %vm1653_vm8, %v2311_v38, %v2302_v9  ;;  %v2578_v56 = vsel %vm1642_vm7, %v2577_v37, %v2573_v57 }
 0xc18   :  { %v2314_v45 = vmul.f32 %v5498_v5, %v2312_v43  ;;  %v2588_v19 = vsel %vm1653_vm8, %v2587_v40, %v2578_v56  ;;  %v2037_v53 = vadd.f32 %v2036_v21, %v1758_v25  ;;  %v2770_v20 = vsel %vm1642_vm7, %v2769_v15, %v2765_v3  ;;  %v5501_v25 = vld [vmem:[#allocation48_spill] sm:$0xff]  ;;  %v5503_v15 = vld [vmem:[#allocation51_spill] sm:$0xff] }
 0xc19   :  { %v4776_v28 = vpop.xlane.xlu0 %2752  ;;  %v5504_v56 = vld [vmem:[#allocation23_spill] sm:$0xff] }
 0xc1a   :  { %v2774_v41 = vrot.slane %v4776_v28, %v5361_v44  ;;  %v2315_v4 = vadd.f32 %v2314_v45, %v2037_v53  ;;  %v2076_v3 = vsub.f32 1.0, %v5504_v56 }
 0xc1d   :  { %v4801_v30 = vpop.xlane.xlu0 %2879 }
 0xc1e   :  { %vm2890_vm10 = vcmp.ge.f32.partialorder %v4801_v30, %v4757_v50  ;;  %v5510_v30 = vld [vmem:[#allocation89_spill] sm:$0xff] }
 0xc21   :  { %v2886_v18 = vpop.xlane.xlu0 %2885 }
 0xc22   :  { %vm2892_vm11 = vcmp.ge.f32.partialorder %v2886_v18, %v4776_v28  ;;  %v5511_v18 = vld [vmem:[#allocation82_spill] sm:$0xff] }
 0xc29   :  { %v1769_v33 = vpop.permute.xlu0 %1768 }
 0xc2a   :  { %v1783_v0 = vrot.slane %v1769_v33, %v5360_v36 }
 0xc2d   :  { %v1775_v37 = vpop.permute.xlu0 %1774 }
 0xc2e   :  { %v1792_v57 = vrot.slane %v1775_v37, %v5360_v36 }
 0xc31   :  { %v4902_v56 = vpop.permute.xlu0 %1810 }
 0xc5f   :  { %v2561_v59 = vpop.xlane.xlu1 %2560 }
 0xc60   :  { %vm2562_vm15 = vcmp.eq.f32.partialorder %v5499_v11, %v2561_v59 }
 0xc61   :  { %v4814_v54 = vsel %vm2562_vm15, 1.0, %v5427_v14 }
 0xc62   :  { %v4822_v17 = vadd.f32 %v4814_v54, %v2289_v16  ;;  %v2590_v27 = vmul.f32 %v4814_v54, %v2588_v19  ;;  %v5506_v19 = vld [vmem:[#allocation85_spill] sm:$0xff] }
 0xc63   :  { %v2756_v29 = vpop.xlane.xlu1 %2755  ;;  %v2078_v53 = vsub.f32 1.0, %v5506_v19 }
 0xc64   :  { %v2778_v24 = vrot.slane %v2756_v29, %v5360_v36  ;;  %v2757_v32 = vsub.f32 1.0, %v4822_v17  ;;  %v2591_v38 = vadd.f32 %v2590_v27, %v2315_v4  ;;  %v5507_v27 = vld [vmem:[#allocation83_spill] sm:$0xff] }
 0xc66   :  { %v2779_v42 = vsel %vm1642_vm7, %v2778_v24, %v2774_v41  ;;  %v5505_v41 = vld [vmem:[#allocation86_spill] sm:$0xff]  ;;  %v2077_v24 = vsub.f32 1.0, %v5507_v27 }
 0xc67   :  { %v2780_v31 = vsel %vm1653_vm8, %v2779_v42, %v2770_v20  ;;  %v2883_v39 = vpop.xlane.xlu1 %2882  ;;  %v5508_v20 = vld [vmem:[#allocation87_spill] sm:$0xff] }
 0xc68   :  { %v2782_v23 = vmul.f32 %v2780_v31, %v2757_v32  ;;  %vm2891_vm2 = vcmp.ge.f32.partialorder %v2883_v39, %v4778_v13  ;;  %v2079_v42 = vsub.f32 1.0, %v5508_v20  ;;  %v2994_v13 = vsel %vm2892_vm11, 1.0, %v5427_v14 }
 0xc69   :  { %v2993_v4 = vsel %vm2891_vm2, 1.0, %v5427_v14  ;;  %v2918_v28 = vrot.slane %v2994_v13, %v5361_v44 }
 0xc6a   :  { %v2783_v35 = vadd.f32 %v2782_v23, %v2591_v38  ;;  %v5509_v38 = vld [vmem:[#allocation79_spill] sm:$0xff]  ;;  %v2992_v23 = vsel %vm2890_vm10, 1.0, %v5427_v14 }
 0xc6b   :  { %v2889_v34 = vpop.xlane.xlu1 %2888  ;;  %v2909_v50 = vrot.slane %v2992_v23, %v5361_v44 }
 0xc6c   :  { %v2790_v9 = vrot.slane %v2783_v35, %v5362_v26  ;;  %v2801_v43 = vrot.slane %v2783_v35, %v3759_v47  ;;  %v5500_v26 = vld [vmem:[#allocation73_spill] sm:$0xff]  ;;  %v5502_v47 = vld [vmem:[#allocation84_spill] sm:$0xff]  ;;  %vm2893_vm6 = vcmp.ge.f32.partialorder %v2889_v34, %v2756_v29  ;;  %v2913_v29 = vrot.slane %v2993_v4, %v5360_v36 }
 0xc6d   :  { %v1801_v40 = vsub.f32 1.0, %v5500_v26  ;;  %v2995_v31 = vsel %vm2893_vm6, 1.0, %v5427_v14  ;;  %v5512_v35 = vld [vmem:[#allocation88_spill] sm:$0xff]  ;;  %v2784_v26 = vmul.f32 0.1, %v2757_v32  ;;  %v5518_v32 = vld [vmem:[#allocation30_spill] sm:$0xff] }
 0xc6e   :  { %2796 = vbcast.lane.b32.xlu1 %v2790_v9, 264  ;;  %2792 = vbcast.lane.b32.xlu0 %v2790_v9, 256  ;;  %v2922_v39 = vrot.slane %v2995_v31, %v5360_v36  ;;  %v2354_v33 = vsub.f32 1.0, %v5512_v35  ;;  %v2914_v34 = vsel %vm1642_vm7, %v2913_v29, %v2909_v50 }
 0xc6f   :  { %v1766_v2 = vpop.permute.xlu1 %1765 }
 0xc70   :  { %v1779_v60 = vrot.slane %v1766_v2, %v5361_v44  ;;  %v2923_v9 = vsel %vm1642_vm7, %v2922_v39, %v2918_v28  ;;  %v5513_v2 = vld [vmem:[#allocation91_spill] sm:$0xff] }
 0xc71   :  { %v4872_v14 = vsel %vm1653_vm8, %v2923_v9, %v2914_v34 }
 0xc72   :  { %v1784_v16 = vsel %vm1642_vm7, %v1783_v0, %v1779_v60  ;;  %2803 = vbcast.lane.b32.xlu1 %v2801_v43, 256  ;;  %2807 = vbcast.lane.b32.xlu0 %v2801_v43, 264  ;;  %v5514_v0 = vld [vmem:[#allocation90_spill] sm:$0xff] }
 0xc73   :  { %v1772_v59 = vpop.permute.xlu1 %1771  ;;  %v2356_v60 = vsub.f32 1.0, %v5514_v0  ;;  %v5515_v43 = vld [vmem:[#allocation58_spill] sm:$0xff] }
 0xc74   :  { %v1788_v21 = vrot.slane %v1772_v59, %v5361_v44  ;;  %v2355_v37 = vsub.f32 1.0, %v5515_v43 }
 0xc76   :  { %v1793_v11 = vsel %vm1642_vm7, %v1792_v57, %v1788_v21  ;;  %2043 = vperm.xlu1 %3033, %v5501_v25   ;;  %1816 = vperm.xlu0 %3031, %v1801_v40   ;;  %v5516_v57 = vld [vmem:[#allocation92_spill] sm:$0xff]  ;;  %v4887_v40 = vadd.f32 %v2784_v26, %v4822_v17  ;;  %v5517_v17 = vld [vmem:[#allocation25_spill] sm:$0xff] }
 0xc77   :  { %v4844_v45 = vsel %vm1653_vm8, %v1793_v11, %v1784_v16  ;;  %v2708_v16 = vmul.f32 %v4814_v54, %v4755_v51  ;;  %v2357_v21 = vsub.f32 1.0, %v5516_v57  ;;  %v2630_v51 = vsub.f32 1.0, %v4479_v6  ;;  %v4900_v6 = vpop.permute.xlu1 %1807 }
 0xc78   :  { %v2631_v11 = vsub.f32 1.0, %v4477_v52  ;;  %3114 = vlog2.f32 %v5517_v17  ;;  %v2864_v57 = vsel %vm1656_vm9, %v4887_v40, 0.0 }
 0xc79   :  { %v4880_v59 = vadd.f32 %v2708_v16, %v4751_v12  ;;  %v2632_v12 = vsub.f32 1.0, %v4491_v48  ;;  %3116 = vlog2.f32 %v5518_v32 }
 0xc7a   :  { %2049 = vperm.xlu1 %3033, %v5502_v47   ;;  %2046 = vperm.xlu0 %3031, %v5503_v15  }
 0xc7e   :  { %2085 = vperm.xlu1 %3033, %v2076_v3   ;;  %2052 = vperm.xlu0 %3031, %v5505_v41  }
 0xc82   :  { %2091 = vperm.xlu1 %3033, %v2078_v53   ;;  %2088 = vperm.xlu0 %3031, %v2077_v24  }
 0xc86   :  { %2321 = vperm.xlu1 %3033, %v5509_v38   ;;  %2094 = vperm.xlu0 %3031, %v2079_v42  }
 0xc8a   :  { %2327 = vperm.xlu1 %3033, %v5510_v30   ;;  %2324 = vperm.xlu0 %3031, %v5511_v18  }
 0xc8e   :  { %2363 = vperm.xlu1 %3033, %v2354_v33   ;;  %2330 = vperm.xlu0 %3031, %v5513_v2  }
 0xc92   :  { %2369 = vperm.xlu1 %3033, %v2356_v60   ;;  %2366 = vperm.xlu0 %3031, %v2355_v37   ;;  %v2730_v60 = vsel %vm1656_vm9, %v4880_v59, 0.0 }
 0xc96   :  { %2597 = vperm.xlu1 %3033, %v4472_v58   ;;  %2372 = vperm.xlu0 %3031, %v2357_v21   ;;  %v2633_v58 = vsub.f32 1.0, %v4498_v7  ;;  %v4904_v7 = vpop.permute.xlu1 %1813 }
 0xc9a   :  { %2603 = vperm.xlu1 %3033, %v4487_v22   ;;  %2600 = vperm.xlu0 %3031, %v4474_v49   ;;  %v5519_v22 = vld [vmem:[#allocation31_spill] sm:$0xff]  ;;  %v5520_v49 = vld [vmem:[#allocation32_spill] sm:$0xff] }
 0xc9b   :  { %3118 = vlog2.f32 %v5519_v22 }
 0xc9c   :  { %3120 = vlog2.f32 %v5520_v49 }
 0xc9e   :  { %2639 = vperm.xlu1 %3033, %v2630_v51   ;;  %2606 = vperm.xlu0 %3031, %v4495_v46   ;;  %v3115_v46 = vpop.eup %3114 }
 0xc9f   :  { %v3117_v25 = vpop.eup %3116  ;;  %v76_v52 = vmul.f32 0.6931472, %v3115_v46 }
 0xca0   :  { %v74_v47 = vmul.f32 0.6931472, %v3117_v25 }
 0xca1   :  { %v82_v41 = vadd.f32 %v76_v52, %v5493_v55  ;;  %v1796_v52 = vmul.f32 %v5496_v10, %v4844_v45 }
 0xca2   :  { %2645 = vperm.xlu1 %3033, %v2632_v12   ;;  %2642 = vperm.xlu0 %3031, %v2631_v11   ;;  %v81_v3 = vadd.f32 %v74_v47, %v5495_v63 }
 0xca5   :  { %v3119_v48 = vpop.eup %3118 }
 0xca6   :  { %2648 = vperm.xlu0 %3031, %v2633_v58   ;;  %v3121_v15 = vpop.eup %3120  ;;  %v78_v53 = vmul.f32 0.6931472, %v3119_v48 }
 0xca7   :  { %v80_v19 = vmul.f32 0.6931472, %v3121_v15  ;;  %v1821_v15 = vrot.slane %v4900_v6, %v5361_v44 }
 0xca8   :  { %v83_v31 = vadd.f32 %v78_v53, %v5485_v8  ;;  %v2926_v8 = vsel %vm1656_vm9, %v4872_v14, 0.0 }
 0xca9   :  { %v84_v4 = vadd.f32 %v80_v19, %v5486_v62 }
 0xce0   :  { %v2793_v27 = vpop.permute.xlu0 %2792  ;;  %v2797_v24 = vpop.permute.xlu1 %2796 }
 0xce1   :  { %v2813_v20 = vsub.f32 %v81_v3, %v2793_v27  ;;  %v2814_v42 = vsub.f32 %v82_v41, %v2797_v24  ;;  %v1830_v24 = vrot.slane %v4904_v7, %v5361_v44 }
 0xce3   :  { %2822 = vperm.xlu1 %3033, %v2813_v20   ;;  %2825 = vperm.xlu0 %3031, %v2814_v42  }
 0xce4   :  { %v2808_v38 = vpop.permute.xlu0 %2807  ;;  %v2804_v23 = vpop.permute.xlu1 %2803 }
 0xce5   :  { %v2816_v13 = vsub.f32 %v84_v4, %v2808_v38  ;;  %v2815_v29 = vsub.f32 %v83_v31, %v2804_v23 }
 0xce7   :  { %2831 = vperm.xlu0 %3031, %v2816_v13   ;;  %2828 = vperm.xlu1 %3033, %v2815_v29  }
 0xcf5   :  { %v4910_v63 = vpop.permute.xlu0 %1816  ;;  %v2044_v55 = vpop.permute.xlu1 %2043 }
 0xcf6   :  { %v2057_v11 = vrot.slane %v2044_v55, %v5361_v44  ;;  %v1834_v41 = vrot.slane %v4910_v63, %v5360_v36 }
 0xcf9   :  { %v2047_v39 = vpop.permute.xlu0 %2046  ;;  %v2050_v50 = vpop.permute.xlu1 %2049 }
 0xcfa   :  { %v2061_v21 = vrot.slane %v2047_v39, %v5360_v36  ;;  %v2066_v26 = vrot.slane %v2050_v50, %v5361_v44  ;;  %v1825_v39 = vrot.slane %v4902_v56, %v5360_v36  ;;  %v1835_v50 = vsel %vm1642_vm7, %v1834_v41, %v1830_v24 }
 0xcfc   :  { %v2062_v32 = vsel %vm1642_vm7, %v2061_v21, %v2057_v11 }
 0xcfd   :  { %v2053_v28 = vpop.permute.xlu0 %2052  ;;  %v2086_v30 = vpop.permute.xlu1 %2085 }
 0xcfe   :  { %v2070_v16 = vrot.slane %v2053_v28, %v5360_v36  ;;  %v2099_v42 = vrot.slane %v2086_v30, %v5361_v44 }
 0xd00   :  { %v2071_v59 = vsel %vm1642_vm7, %v2070_v16, %v2066_v26 }
 0xd01   :  { %v2089_v18 = vpop.permute.xlu0 %2088  ;;  %v2092_v35 = vpop.permute.xlu1 %2091  ;;  %v2072_v46 = vsel %vm1653_vm8, %v2071_v59, %v2062_v32 }
 0xd02   :  { %v2108_v19 = vrot.slane %v2092_v35, %v5361_v44  ;;  %v2074_v20 = vmul.f32 %v5497_v61, %v2072_v46  ;;  %v2103_v45 = vrot.slane %v2089_v18, %v5360_v36 }
 0xd04   :  { %v2104_v18 = vsel %vm1642_vm7, %v2103_v45, %v2099_v42 }
 0xd05   :  { %v2095_v33 = vpop.permute.xlu0 %2094  ;;  %v2322_v34 = vpop.permute.xlu1 %2321 }
 0xd06   :  { %v2335_v22 = vrot.slane %v2322_v34, %v5361_v44  ;;  %v2112_v25 = vrot.slane %v2095_v33, %v5360_v36  ;;  %v2075_v34 = vadd.f32 %v2074_v20, %v1796_v52 }
 0xd08   :  { %v2113_v4 = vsel %vm1642_vm7, %v2112_v25, %v2108_v19 }
 0xd09   :  { %v2325_v62 = vpop.permute.xlu0 %2324  ;;  %v2328_v9 = vpop.permute.xlu1 %2327 }
 0xd0a   :  { %v2339_v58 = vrot.slane %v2325_v62, %v5360_v36  ;;  %v2344_v17 = vrot.slane %v2328_v9, %v5361_v44  ;;  %v1826_v62 = vsel %vm1642_vm7, %v1825_v39, %v1821_v15  ;;  %v2114_v9 = vsel %vm1653_vm8, %v2113_v4, %v2104_v18 }
 0xd0b   :  { %2927 = vadd.xlane.f32.xlu1 %v2926_v8 }
 0xd0c   :  { %v2340_v3 = vsel %vm1642_vm7, %v2339_v58, %v2335_v22 }
 0xd0d   :  { %v2331_v2 = vpop.permute.xlu0 %2330  ;;  %v2364_v0 = vpop.permute.xlu1 %2363 }
 0xd0e   :  { %v2348_v14 = vrot.slane %v2331_v2, %v5360_v36  ;;  %v2377_v28 = vrot.slane %v2364_v0, %v5361_v44  ;;  %v1836_v0 = vsel %vm1653_vm8, %v1835_v50, %v1826_v62 }
 0xd0f   :  { %2731 = vadd.xlane.f32.xlu1 %v2730_v60 }
 0xd10   :  { %v2349_v49 = vsel %vm1642_vm7, %v2348_v14, %v2344_v17  ;;  %v1838_v14 = vmul.f32 %v5496_v10, %v1836_v0 }
 0xd11   :  { %v2367_v43 = vpop.permute.xlu0 %2366  ;;  %v2370_v37 = vpop.permute.xlu1 %2369  ;;  %v2350_v53 = vsel %vm1653_vm8, %v2349_v49, %v2340_v3 }
 0xd12   :  { %v2381_v31 = vrot.slane %v2367_v43, %v5360_v36  ;;  %v2386_v38 = vrot.slane %v2370_v37, %v5361_v44  ;;  %v2352_v55 = vmul.f32 %v5498_v5, %v2350_v53 }
 0xd13   :  { %2865 = vadd.xlane.f32.xlu1 %v2864_v57  ;;  %v2116_v57 = vmul.f32 %v5497_v61, %v2114_v9 }
 0xd14   :  { %v2382_v8 = vsel %vm1642_vm7, %v2381_v31, %v2377_v28  ;;  %v2353_v43 = vadd.f32 %v2352_v55, %v2075_v34 }
 0xd15   :  { %v2373_v51 = vpop.permute.xlu0 %2372  ;;  %v2598_v12 = vpop.permute.xlu1 %2597  ;;  %v2117_v22 = vadd.f32 %v2116_v57, %v1838_v14 }
 0xd16   :  { %v2390_v27 = vrot.slane %v2373_v51, %v5360_v36  ;;  %v2611_v29 = vrot.slane %v2598_v12, %v5361_v44 }
 0xd18   :  { %v2391_v30 = vsel %vm1642_vm7, %v2390_v27, %v2386_v38 }
 0xd19   :  { %v2601_v48 = vpop.permute.xlu0 %2600  ;;  %v2604_v47 = vpop.permute.xlu1 %2603  ;;  %v2392_v60 = vsel %vm1653_vm8, %v2391_v30, %v2382_v8 }
 0xd1a   :  { %v2615_v6 = vrot.slane %v2601_v48, %v5360_v36  ;;  %v2620_v7 = vrot.slane %v2604_v47, %v5361_v44  ;;  %v2394_v12 = vmul.f32 %v5498_v5, %v2392_v60 }
 0xd1c   :  { %v2616_v35 = vsel %vm1642_vm7, %v2615_v6, %v2611_v29  ;;  %v2395_v10 = vadd.f32 %v2394_v12, %v2117_v22 }
 0xd1d   :  { %v2607_v23 = vpop.permute.xlu0 %2606  ;;  %v2640_v13 = vpop.permute.xlu1 %2639 }
 0xd1e   :  { %v2624_v63 = vrot.slane %v2607_v23, %v5360_v36  ;;  %v2653_v11 = vrot.slane %v2640_v13, %v5361_v44 }
 0xd20   :  { %v2625_v33 = vsel %vm1642_vm7, %v2624_v63, %v2620_v7 }
 0xd21   :  { %v2643_v56 = vpop.permute.xlu0 %2642  ;;  %v2626_v2 = vsel %vm1653_vm8, %v2625_v33, %v2616_v35  ;;  %v2646_v16 = vpop.permute.xlu1 %2645 }
 0xd22   :  { %v2628_v37 = vmul.f32 %v4814_v54, %v2626_v2  ;;  %v2657_v21 = vrot.slane %v2643_v56, %v5360_v36  ;;  %v2662_v59 = vrot.slane %v2646_v16, %v5361_v44 }
 0xd24   :  { %v2629_v26 = vadd.f32 %v2628_v37, %v2353_v43  ;;  %v2658_v32 = vsel %vm1642_vm7, %v2657_v21, %v2653_v11 }
 0xd25   :  { %v2649_v51 = vpop.permute.xlu0 %2648 }
 0xd26   :  { %v2666_v58 = vrot.slane %v2649_v51, %v5360_v36  ;;  %v2710_v17 = vsel %vm1656_vm9, %v2629_v26, 0.0 }
 0xd27   :  { %2711 = vadd.xlane.f32.xlu0 %v2710_v17 }
 0xd28   :  { %v2667_v61 = vsel %vm1642_vm7, %v2666_v58, %v2662_v59 }
 0xd29   :  { %v2668_v49 = vsel %vm1653_vm8, %v2667_v61, %v2658_v32 }
 0xd2a   :  { %v2670_v46 = vmul.f32 %v4814_v54, %v2668_v49 }
 0xd2c   :  { %v2671_v5 = vadd.f32 %v2670_v46, %v2395_v10 }
 0xd2e   :  { %v2720_v25 = vsel %vm1656_vm9, %v2671_v5, 0.0 }
 0xd2f   :  { %2721 = vadd.xlane.f32.xlu0 %v2720_v25 }
 0xd62   :  { %v2826_v48 = vpop.permute.xlu0 %2825  ;;  %v2823_v47 = vpop.permute.xlu1 %2822 }
 0xd63   :  { %v2840_v52 = vrot.slane %v2826_v48, %v5360_v36  ;;  %v2836_v15 = vrot.slane %v2823_v47, %v5361_v44 }
 0xd65   :  { %v2841_v27 = vsel %vm1642_vm7, %v2840_v52, %v2836_v15 }
 0xd66   :  { %v2832_v3 = vpop.permute.xlu0 %2831  ;;  %v2829_v41 = vpop.permute.xlu1 %2828 }
 0xd67   :  { %v2849_v19 = vrot.slane %v2832_v3, %v5360_v36  ;;  %v2845_v53 = vrot.slane %v2829_v41, %v5361_v44 }
 0xd69   :  { %v2850_v54 = vsel %vm1642_vm7, %v2849_v19, %v2845_v53  ;;  %vm2957_vm7 = vcmp.eq.s32.totalorder %v5426_v1, 4 }
 0xd6a   :  { %v2851_v24 = vsel %vm1653_vm8, %v2850_v54, %v2841_v27 }
 0xd6b   :  { %v2853_v20 = vmul.f32 %v2851_v24, %v4887_v40 }
 0xd6d   :  { %v2854_v45 = vsel %vm1656_vm9, %v2853_v20, 0.0 }
 0xd6e   :  { %2855 = vadd.xlane.f32.xlu0 %v2854_v45 }
 0xd98   :  { %v2928_v6 = vpop.xlane.xlu1 %2927 }
 0xd99   :  { %v2996_v42 = vadd.f32 -4.0, %v2928_v6 }
 0xd9b   :  { %v2930_v4 = vand.u32 2147483647, %v2996_v42 }
 0xd9c   :  { %v2732_v36 = vpop.xlane.xlu1 %2731 }
 0xd9d   :  { %v2932_v31 = vsel %vm2931_vm0, %v2930_v4, 0.0  ;;  %v2733_v38 = vrot.slane %v2732_v36, 4 }
 0xd9e   :  { %2933 = vadd.xlane.f32.xlu0 %v2932_v31 }
 0xd9f   :  { %v2734_v29 = vadd.f32 %v2733_v38, %v2732_v36 }
 0xda0   :  { %v2866_v56 = vpop.xlane.xlu1 %2865 }
 0xda1   :  { %v2735_v55 = vrot.slane %v2734_v29, 2  ;;  %v2867_v2 = vrot.slane %v2866_v56, 4 }
 0xda3   :  { %v2736_v18 = vadd.f32 %v2735_v55, %v2734_v29  ;;  %v2868_v0 = vadd.f32 %v2867_v2, %v2866_v56 }
 0xda5   :  { %v2737_v34 = vrot.slane %v2736_v18, 1  ;;  %v2869_v60 = vrot.slane %v2868_v0, 2 }
 0xda7   :  { %v2738_v8 = vadd.f32 %v2737_v34, %v2736_v18  ;;  %v2870_v57 = vadd.f32 %v2869_v60, %v2868_v0 }
 0xda9   :  { %v2871_v14 = vrot.slane %v2870_v57, 1 }
 0xdab   :  { %v2872_v11 = vadd.f32 %v2871_v14, %v2870_v57 }
 0xdb4   :  { %v2712_v44 = vpop.xlane.xlu0 %2711 }
 0xdb5   :  { %v2713_v23 = vrot.slane %v2712_v44, 4 }
 0xdb7   :  { %v2714_v13 = vadd.f32 %v2713_v23, %v2712_v44 }
 0xdb9   :  { %v2715_v7 = vrot.slane %v2714_v13, 2 }
 0xdbb   :  { %v2716_v63 = vadd.f32 %v2715_v7, %v2714_v13 }
 0xdbc   :  { %v2722_v39 = vpop.xlane.xlu0 %2721 }
 0xdbd   :  { %v2723_v40 = vrot.slane %v2722_v39, 4  ;;  %v2717_v50 = vrot.slane %v2716_v63, 1 }
 0xdbf   :  { %v2724_v28 = vadd.f32 %v2723_v40, %v2722_v39  ;;  %v2718_v30 = vadd.f32 %v2717_v50, %v2716_v63 }
 0xdc1   :  { %v2725_v35 = vrot.slane %v2724_v28, 2  ;;  %2997 = vpush %v2718_v30 }
 0xdc3   :  { %v2726_v33 = vadd.f32 %v2725_v35, %v2724_v28 }
 0xdc5   :  { %v2727_v62 = vrot.slane %v2726_v33, 1 }
 0xdc7   :  { %v2728_v9 = vadd.f32 %v2727_v62, %v2726_v33 }
 0xdc9   :  { %2999 = vpush %v2728_v9 }
 0xdca   :  { %3001 = vpush %v2738_v8 }
 0xdf2   :  { %s2998_s0 = spop %2997 }
 0xdf3   :  { %v2954_v53 = vstv %s2998_s0 }
 0xdfa   :  { %s3000_s20 = spop %2999 }
 0xdfb   :  { %v2856_v43 = vpop.xlane.xlu0 %2855  ;;  %s3002_s21 = spop %3001  ;;  %v2958_v54 = vstv %s3000_s20 }
 0xdfc   :  { %v2857_v37 = vrot.slane %v2856_v43, 4  ;;  %s2942_s24 = ssub.f32 8.0, %s3002_s21 }
 0xdfe   :  { %v2858_v16 = vadd.f32 %v2857_v37, %v2856_v43  ;;  %s2943_s25 = smul.f32 100.0, %s2942_s24 }
 0xe00   :  { %v2859_v21 = vrot.slane %v2858_v16, 2  ;;  %v2948_v3 = vstv %s2943_s25 }
 0xe02   :  { %v2860_v26 = vadd.f32 %v2859_v21, %v2858_v16 }
 0xe04   :  { %v2861_v51 = vrot.slane %v2860_v26, 1 }
 0xe06   :  { %v2862_v12 = vadd.f32 %v2861_v51, %v2860_v26 }
 0xe08   :  { %3003 = vpush %v2862_v12 }
 0xe09   :  { %3005 = vpush %v2872_v11 }
 0xe2b   :  { %v2934_v59 = vpop.xlane.xlu0 %2933 }
 0xe2c   :  { %v2935_v58 = vrot.slane %v2934_v59, 4 }
 0xe2e   :  { %v2936_v17 = vadd.f32 %v2935_v58, %v2934_v59 }
 0xe30   :  { %v2937_v32 = vrot.slane %v2936_v17, 2 }
 0xe32   :  { %v2938_v61 = vadd.f32 %v2937_v32, %v2936_v17 }
 0xe34   :  { %v2939_v22 = vrot.slane %v2938_v61, 1 }
 0xe36   :  { %v2940_v49 = vadd.f32 %v2939_v22, %v2938_v61 }
 0xe38   :  { %3007 = vpush %v2940_v49 }
 0xe39   :  { %s3004_s22 = spop %3003 }
 0xe3a   :  { %s3006_s23 = spop %3005  ;;  %v2944_v52 = vstv %s3004_s22 }
 0xe3b   :  { %v2946_v10 = vstv %s3006_s23  ;;  %v2945_v15 = vsel %vm87_vm4, %v2944_v52, 0.0 }
 0xe3c   :  { %v2947_v46 = vsel %vm87_vm4, %v2946_v10, 1.0  ;;  %v2949_v41 = vsel %vm105_vm5, %v2948_v3, %v2945_v15 }
 0xe3d   :  { %v2950_v5 = vsel %vm105_vm5, 8.0, %v2947_v46 }
 0xe3e   :  { %v2953_v25 = vsel %vm122_vm1, 2.0, %v2950_v5 }
 0xe3f   :  { %v2956_v48 = vsel %vm139_vm3, 8.0, %v2953_v25 }
 0xe40   :  { %v2960_v47 = vsel %vm2957_vm7, 8.0, %v2956_v48 }
 0xe41   :  { %3122 = vrcp.f32 %v2960_v47 }
 0xe4b   :  { %v3123_v20 = vpop.eup %3122 }
 0xe69   :  { %s3008_s26 = spop %3007 }
 0xe6a   :  { %v2951_v19 = vstv %s3008_s26 }
 0xe6b   :  { %v2952_v27 = vsel %vm122_vm1, %v2951_v19, %v2949_v41 }
 0xe6c   :  { %v2955_v24 = vsel %vm139_vm3, %v2954_v53, %v2952_v27 }
 0xe6d   :  { %v2959_v45 = vsel %vm2957_vm7, %v2958_v54, %v2955_v24 }
 0xe6e   :  { %v2962_v6 = vmul.f32 %v3123_v20, %v2959_v45 }
 0xe70   :  { %2963 = vst [vmem:[%s5019_s4] sm:$0x1] %v2962_v6 }

</bundles_post_ra>
